<compile_context>
chip_gen: v7x
topology: tpu7x:2x2x1
jax: 0.10.0
libtpu: 0.0.40
codegen_flags: <defaults>
</compile_context>

<pallas_src>
import jax
import jax.numpy as jnp
from jax.experimental import pallas as pl
from jax.experimental.pallas import tpu as pltpu

# ---------------- problem sizes (small, consistent with the module) ----------
N = 8                  # nodes per graph
E = 16                 # edges per graph
VAE_INS, VAE_HIDS0, VAE_LATS, VAE_HIDS1, VAE_OUTS = 32, 24, 16, 24, 16
EC_INS, EC_HIDS, EC_OUTS = 64, 32, 16
GAT_INS, GAT_HIDS, GAT_OUTS = 32, 16, 16     # GAT_INS == VAE_INS (both eat x)
NUM_LABELS = 4
# cat(z0, z1) width = VAE_OUTS + GAT_OUTS = 32 == VAE_INS (classifier in-dim).

TILE = 128             # node-rows per grid step (lane/sublane aligned)
GPB = TILE // N        # graphs per block-diagonal tile = 16
LANES = 128

# ---------------- packed-parameter slab layout --------------------------------
# weight slab (bf16), [W_ROWS, 128]; every weight starts on an 8-row boundary.
R_WXF = 0              # [we1 | wg1]            (32, 40)
R_WMU = 32             # wmu                    (24, 16)
R_WD1 = 56             # wd1                    (16, 24)
R_WD2 = 72             # wd2                    (24, 16)
R_WEC1 = 96            # wec1                   (64, 32)
R_WEC2 = 160           # wec2                   (32, 16)
R_WG2 = 192            # wg2                    (16, 16)
R_WCLS0 = 208          # wcls[:VAE_OUTS]        (16, 4)
R_WCLS1 = 224          # wcls[VAE_OUTS:]        (16, 4)
R_A1 = 240             # [a_src1 | a_dst1]      (16, 2)
R_A2 = 256             # [a_src2 | a_dst2]      (16, 2)
W_ROWS = 272
# bias slab (f32), [8, 128]; one bias per row.
B_BE1, B_BMU, B_BD1, B_BD2, B_BEC1, B_BEC2, B_BCLS = 0, 1, 2, 3, 4, 5, 6
B_ROWS = 8


# ---------------- small math helpers (shared by kernel and reference) --------
def _relu(v):
    return jnp.maximum(v, 0.0)


def _leaky_relu(v, slope=0.2):
    return jnp.where(v > 0, v, slope * v)


def _elu(v):
    # clamp the discarded branch so exp never overflows (benign but noisy).
    return jnp.where(v > 0, v, jnp.exp(jnp.minimum(v, 0.0)) - 1.0)


def _mm(a, b):
    """Matmul with bf16 operands and f32 accumulation (MXU-friendly)."""
    return jnp.dot(a.astype(jnp.bfloat16), b.astype(jnp.bfloat16),
                   preferred_element_type=jnp.float32)


# ---------------------------------- kernel -----------------------------------
def _gat_attend(h, adj_scaled, mask, a_sd):
    """Masked single-head GAT attention on a block-diagonal [TILE, TILE] tile.

    h: [T, H] projected features (f32); a_sd: [H, 2] = [a_src | a_dst];
    adj_scaled: a_edge * adj (already folded in the wrapper); mask: 0/1 + self-loops.
    """
    sd = _mm(h, a_sd)                                          # [T, 2]
    e = _leaky_relu(sd[:, 0:1] + jnp.transpose(sd[:, 1:2]) + adj_scaled)
    e = jnp.where(mask > 0, e, -1e9)
    e = e - jnp.max(e, axis=-1, keepdims=True)
    p = jnp.where(mask > 0, jnp.exp(e), 0.0)
    inv = pl.reciprocal(jnp.sum(p, axis=-1, keepdims=True) + 1e-9, approx=True)
    return _mm(p * inv, h)                                     # [T, H]


def au_net_kernel(x_ref, cx_ref, graph_ref, w_ref, b_ref, out_ref):
    x = x_ref[...]          # [T, 32]  bf16
    cx = cx_ref[...]        # [T, 64]  bf16
    adj1 = graph_ref[0]     # [T, T]   f32  (ae1 * adj, block-diagonal)
    adj2 = graph_ref[1]     # [T, T]   f32  (ae2 * adj, block-diagonal)
    mask = graph_ref[2]     # [T, T]   f32  (0/1 with self-loops)
    bias = b_ref[...]       # [8, 128] f32

    def w(r0, rows, cols):              # static ref slice of the weight slab
        return w_ref[r0:r0 + rows, 0:cols]

    def b(r, cols):                     # static slice of the loaded bias block
        return bias[r:r + 1, 0:cols]

    # ---- fused x-projection: x @ [we1 | wg1] -------------------------------
    xw = _mm(x, w(R_WXF, VAE_INS, VAE_HIDS0 + GAT_HIDS))       # [T, 40]
    h0 = _relu(xw[:, :VAE_HIDS0] + b(B_BE1, VAE_HIDS0))        # VAE encoder h
    hg = xw[:, VAE_HIDS0:]                                     # GAT layer-1 proj

    # ---- VAE branch: encoder -> mu -> decoder (deterministic latent) -------
    mu = _mm(h0, w(R_WMU, VAE_HIDS0, VAE_LATS)) + b(B_BMU, VAE_LATS)
    h1 = _relu(_mm(mu, w(R_WD1, VAE_LATS, VAE_HIDS1)) + b(B_BD1, VAE_HIDS1))
    z0 = _mm(h1, w(R_WD2, VAE_HIDS1, VAE_OUTS)) + b(B_BD2, VAE_OUTS)

    # ---- edge-conv MLP on concat_x, then outer ReLU -------------------------
    e0 = _relu(_mm(cx, w(R_WEC1, EC_INS, EC_HIDS)) + b(B_BEC1, EC_HIDS))
    z11 = _relu(_mm(e0, w(R_WEC2, EC_HIDS, EC_OUTS)) + b(B_BEC2, EC_OUTS))

    # ---- GAT branch (2 layers), then outer ReLU -----------------------------
    g1 = _elu(_gat_attend(hg, adj1, mask, w(R_A1, GAT_HIDS, 2)))
    h2 = _mm(g1, w(R_WG2, GAT_HIDS, GAT_OUTS))
    z12 = _relu(_gat_attend(h2, adj2, mask, w(R_A2, GAT_OUTS, 2)))

    # ---- fuse branches and classify -----------------------------------------
    z1 = jnp.sqrt(z11 * z12)
    z = (_mm(z0, w(R_WCLS0, VAE_OUTS, NUM_LABELS))
         + _mm(z1, w(R_WCLS1, GAT_OUTS, NUM_LABELS))
         + b(B_BCLS, NUM_LABELS))
    out_ref[...] = z


# ---------------------------- wrapper / glue ----------------------------------
def init_params(key):
    shapes = [
        # vae
        (VAE_INS, VAE_HIDS0), (1, VAE_HIDS0),
        (VAE_HIDS0, VAE_LATS), (1, VAE_LATS),
        (VAE_LATS, VAE_HIDS1), (1, VAE_HIDS1),
        (VAE_HIDS1, VAE_OUTS), (1, VAE_OUTS),
        # edge conv
        (EC_INS, EC_HIDS), (1, EC_HIDS),
        (EC_HIDS, EC_OUTS), (1, EC_OUTS),
        # gat layer 1
        (GAT_INS, GAT_HIDS), (GAT_HIDS, 1), (GAT_HIDS, 1), (1, 1),
        # gat layer 2
        (GAT_HIDS, GAT_OUTS), (GAT_OUTS, 1), (GAT_OUTS, 1), (1, 1),
        # classifier
        (VAE_OUTS + GAT_OUTS, NUM_LABELS), (1, NUM_LABELS),
    ]
    keys = jax.random.split(key, len(shapes))
    return tuple(0.1 * jax.random.normal(k, s, dtype=jnp.float32)
                 for k, s in zip(keys, shapes))


def densify_graph(edge_index, edge_attr, n):
    src, dst = edge_index[0], edge_index[1]
    adj = jnp.zeros((n, n), jnp.float32).at[dst, src].set(edge_attr)
    mask = jnp.zeros((n, n), jnp.float32).at[dst, src].set(1.0)
    mask = jnp.maximum(mask, jnp.eye(n, dtype=jnp.float32))     # self-loops
    return adj, mask


def _put(slab, r, w):
    return slab.at[r:r + w.shape[0], 0:w.shape[1]].set(w)


def pack_weight_slab(params):
    (we1, be1, wmu, bmu, wd1, bd1, wd2, bd2,
     wec1, bec1, wec2, bec2,
     wg1, as1, ad1, ae1, wg2, as2, ad2, ae2,
     wcls, bcls) = params
    s = jnp.zeros((W_ROWS, LANES), jnp.float32)
    s = _put(s, R_WXF, jnp.concatenate([we1, wg1], axis=1))     # fused x-proj
    s = _put(s, R_WMU, wmu)
    s = _put(s, R_WD1, wd1)
    s = _put(s, R_WD2, wd2)
    s = _put(s, R_WEC1, wec1)
    s = _put(s, R_WEC2, wec2)
    s = _put(s, R_WG2, wg2)
    s = _put(s, R_WCLS0, wcls[:VAE_OUTS, :])                    # pre-split wcls
    s = _put(s, R_WCLS1, wcls[VAE_OUTS:, :])
    s = _put(s, R_A1, jnp.concatenate([as1, ad1], axis=1))      # fused a_src|a_dst
    s = _put(s, R_A2, jnp.concatenate([as2, ad2], axis=1))
    return s.astype(jnp.bfloat16)


def pack_bias_slab(params):
    (we1, be1, wmu, bmu, wd1, bd1, wd2, bd2,
     wec1, bec1, wec2, bec2,
     wg1, as1, ad1, ae1, wg2, as2, ad2, ae2,
     wcls, bcls) = params
    s = jnp.zeros((B_ROWS, LANES), jnp.float32)
    for r, v in ((B_BE1, be1), (B_BMU, bmu), (B_BD1, bd1), (B_BD2, bd2),
                 (B_BEC1, bec1), (B_BEC2, bec2), (B_BCLS, bcls)):
        s = _put(s, r, v)
    return s


def _block_diag_tiles(a):
    """[num_tiles, G, n, n] -> [num_tiles, G*n, G*n] block-diagonal tiles."""
    t, g, n, _ = a.shape
    eye = jnp.eye(g, dtype=a.dtype)
    return jnp.einsum('tgij,gh->tgihj', a, eye).reshape(t, g * n, g * n)


def au_net_forward(x, edge_index, edge_attr, concat_x, params):
    """x: [B, N, VAE_INS], edge_index: [B, 2, E], edge_attr: [B, E],
       concat_x: [B, N, EC_INS] -> [B, N, NUM_LABELS]."""
    batch = x.shape[0]
    assert (batch * N) % TILE == 0, "batch of graphs must fill whole tiles"
    num_tiles = (batch * N) // TILE

    (we1, be1, wmu, bmu, wd1, bd1, wd2, bd2,
     wec1, bec1, wec2, bec2,
     wg1, as1, ad1, ae1, wg2, as2, ad2, ae2,
     wcls, bcls) = params

    adj, mask = jax.vmap(densify_graph, in_axes=(0, 0, None))(edge_index, edge_attr, N)

    # fold the per-layer edge scalars into the adjacency, block-diagonalize
    # GPB graphs per tile and stack [adj_l1, adj_l2, mask] into one input.
    adj1 = _block_diag_tiles((ae1[0, 0] * adj).reshape(num_tiles, GPB, N, N))
    adj2 = _block_diag_tiles((ae2[0, 0] * adj).reshape(num_tiles, GPB, N, N))
    maskt = _block_diag_tiles(mask.reshape(num_tiles, GPB, N, N))
    graph = jnp.stack([adj1.reshape(num_tiles * TILE, TILE),
                       adj2.reshape(num_tiles * TILE, TILE),
                       maskt.reshape(num_tiles * TILE, TILE)], axis=0)

    xf = x.reshape(batch * N, VAE_INS).astype(jnp.bfloat16)
    cxf = concat_x.reshape(batch * N, EC_INS).astype(jnp.bfloat16)
    wslab = pack_weight_slab(params)
    bslab = pack_bias_slab(params)

    out = pl.pallas_call(
        au_net_kernel,
        out_shape=jax.ShapeDtypeStruct((batch * N, NUM_LABELS), jnp.float32),
        grid=(num_tiles,),
        in_specs=[
            pl.BlockSpec((TILE, VAE_INS), lambda i: (i, 0)),            # x
            pl.BlockSpec((TILE, EC_INS), lambda i: (i, 0)),             # concat_x
            pl.BlockSpec((3, TILE, TILE), lambda i: (0, i, 0)),         # adj1/adj2/mask
            pl.BlockSpec((W_ROWS, LANES), lambda i: (0, 0)),            # weight slab
            pl.BlockSpec((B_ROWS, LANES), lambda i: (0, 0)),            # bias slab
        ],
        out_specs=pl.BlockSpec((TILE, NUM_LABELS), lambda i: (i, 0)),
        compiler_params=pltpu.CompilerParams(
            dimension_semantics=("parallel",),        # shard tiles across TCs (v7x)
            vmem_limit_bytes=32 * 1024 * 1024),       # explicit budget (v7x: 64 MiB phys)
    )(xf, cxf, graph, wslab, bslab)
    return out.reshape(batch, N, NUM_LABELS)


# --------------------------- pure-JAX reference -------------------------------
def au_net_ref(x, edge_index, edge_attr, concat_x, params):
    (we1, be1, wmu, bmu, wd1, bd1, wd2, bd2,
     wec1, bec1, wec2, bec2,
     wg1, as1, ad1, ae1, wg2, as2, ad2, ae2,
     wcls, bcls) = params

    def gat(h_in, wg, a_s, a_d, a_e, adj, mask):
        h = _mm(h_in, wg)
        e = _leaky_relu(_mm(h, a_s) + jnp.transpose(_mm(h, a_d)) + a_e * adj)
        e = jnp.where(mask > 0, e, -1e9)
        e = e - jnp.max(e, axis=-1, keepdims=True)
        p = jnp.where(mask > 0, jnp.exp(e), 0.0)
        alpha = p / (jnp.sum(p, axis=-1, keepdims=True) + 1e-9)
        return _mm(alpha, h)

    def one(xg, eig, eag, cxg):
        adj, mask = densify_graph(eig, eag, xg.shape[0])
        h0 = _relu(_mm(xg, we1) + be1)
        mu = _mm(h0, wmu) + bmu
        z0 = _mm(_relu(_mm(mu, wd1) + bd1), wd2) + bd2
        z11 = _relu(_mm(_relu(_mm(cxg, wec1) + bec1), wec2) + bec2)
        g1 = _elu(gat(xg, wg1, as1, ad1, ae1, adj, mask))
        z12 = _relu(gat(g1, wg2, as2, ad2, ae2, adj, mask))
        z1 = jnp.sqrt(z11 * z12)
        return _mm(jnp.concatenate([z0, z1], axis=1), wcls) + bcls

    return jax.vmap(one)(x, edge_index, edge_attr, concat_x)


if __name__ == "__main__":
    key = jax.random.PRNGKey(0)
    k_x, k_cx, k_attr, k_p = jax.random.split(key, 4)

    B = 2 * GPB                                  # 32 graphs -> 256 nodes -> 2 tiles
    x = jax.random.normal(k_x, (B, N, VAE_INS), dtype=jnp.float32)
    concat_x = jax.random.normal(k_cx, (B, N, EC_INS), dtype=jnp.float32)

    # deterministic ring graph (both directions) per sample -> E = 2 * N = 16
    src = jnp.concatenate([jnp.arange(N), (jnp.arange(N) + 1) % N]).astype(jnp.int32)
    dst = jnp.concatenate([(jnp.arange(N) + 1) % N, jnp.arange(N)]).astype(jnp.int32)
    edge_index = jnp.broadcast_to(jnp.stack([src, dst], axis=0), (B, 2, E))
    edge_attr = jax.random.uniform(k_attr, (B, E), dtype=jnp.float32)

    params = init_params(k_p)

    out = jax.block_until_ready(au_net_forward(x, edge_index, edge_attr,
                                               concat_x, params))
    ref = au_net_ref(x, edge_index, edge_attr, concat_x, params)

    assert out.shape == (B, N, NUM_LABELS)
    assert bool(jnp.all(jnp.isfinite(out)))
    # reference uses the same bf16-matmul precision; tolerance covers the
    # approx-reciprocal softmax and bf16 rounding-order differences.
    max_diff = jnp.max(jnp.abs(out - ref))
    assert bool(jnp.allclose(out, ref, rtol=1e-2, atol=5e-3)), \
        f"max abs diff {max_diff}"

    print("KERNEL_OK")
</pallas_src>

<mosaic_0001>
module attributes {stable_mosaic.version = 11 : i64} {
  func.func @au_net_kernel(%arg0: i32, %arg1: memref<128x32xbf16, #tpu.memory_space<vmem>>, %arg2: memref<128x64xbf16, #tpu.memory_space<vmem>>, %arg3: memref<3x128x128xf32, #tpu.memory_space<vmem>>, %arg4: memref<272x128xbf16, #tpu.memory_space<vmem>>, %arg5: memref<8x128xf32, #tpu.memory_space<vmem>>, %arg6: memref<128x4xf32, #tpu.memory_space<vmem>>) attributes {dimension_semantics = [#tpu.dimension_semantics<parallel>], iteration_bounds = array<i64: 2>, scalar_prefetch = 0 : i64, scratch_operands = 0 : i64, tpu.core_type = #tpu.core_type<tc>, window_params = [{transform_indices = @transform_0, window_bounds = array<i64: 128, 32>}, {transform_indices = @transform_1, window_bounds = array<i64: 128, 64>}, {transform_indices = @transform_2, window_bounds = array<i64: 3, 128, 128>}, {pipeline_mode = #tpu.pipeline_mode<synchronous>, transform_indices = @transform_3, window_bounds = array<i64: 272, 128>}, {pipeline_mode = #tpu.pipeline_mode<synchronous>, transform_indices = @transform_4, window_bounds = array<i64: 8, 128>}, {transform_indices = @transform_5, window_bounds = array<i64: 128, 4>}]} {
    %c0 = arith.constant 0 : index
    %c0_0 = arith.constant 0 : index
    %0 = vector.load %arg1[%c0, %c0_0] : memref<128x32xbf16, #tpu.memory_space<vmem>>, vector<128x32xbf16>
    %c0_1 = arith.constant 0 : index
    %c0_2 = arith.constant 0 : index
    %1 = vector.load %arg2[%c0_1, %c0_2] : memref<128x64xbf16, #tpu.memory_space<vmem>>, vector<128x64xbf16>
    %c0_3 = arith.constant 0 : index
    %c0_4 = arith.constant 0 : index
    %c0_5 = arith.constant 0 : index
    %2 = vector.load %arg3[%c0_3, %c0_4, %c0_5] : memref<3x128x128xf32, #tpu.memory_space<vmem>>, vector<1x128x128xf32>
    %3 = vector.shape_cast %2 : vector<1x128x128xf32> to vector<128x128xf32>
    %c1 = arith.constant 1 : index
    %c0_6 = arith.constant 0 : index
    %c0_7 = arith.constant 0 : index
    %4 = vector.load %arg3[%c1, %c0_6, %c0_7] : memref<3x128x128xf32, #tpu.memory_space<vmem>>, vector<1x128x128xf32>
    %5 = vector.shape_cast %4 : vector<1x128x128xf32> to vector<128x128xf32>
    %c2 = arith.constant 2 : index
    %c0_8 = arith.constant 0 : index
    %c0_9 = arith.constant 0 : index
    %6 = vector.load %arg3[%c2, %c0_8, %c0_9] : memref<3x128x128xf32, #tpu.memory_space<vmem>>, vector<1x128x128xf32>
    %7 = vector.shape_cast %6 : vector<1x128x128xf32> to vector<128x128xf32>
    %c0_10 = arith.constant 0 : index
    %c0_11 = arith.constant 0 : index
    %8 = vector.load %arg5[%c0_10, %c0_11] : memref<8x128xf32, #tpu.memory_space<vmem>>, vector<8x128xf32>
    %c0_12 = arith.constant 0 : index
    %c0_13 = arith.constant 0 : index
    %9 = vector.load %arg4[%c0_12, %c0_13] : memref<272x128xbf16, #tpu.memory_space<vmem>>, vector<32x40xbf16>
    %cst = arith.constant dense<0.000000e+00> : vector<128x40xf32>
    %10 = tpu.matmul %0, %9, %cst {dimension_numbers = #tpu.dot_dimension_numbers<[1], [0], [0], [1], [0, 0, 1, 1], [], []>} : vector<128x32xbf16>, vector<32x40xbf16>, vector<128x40xf32> -> vector<128x40xf32>
    %11 = vector.extract_strided_slice %10 {offsets = [0, 0], sizes = [128, 24], strides = [1, 1]} : vector<128x40xf32> to vector<128x24xf32>
    %12 = vector.extract_strided_slice %8 {offsets = [0, 0], sizes = [1, 24], strides = [1, 1]} : vector<8x128xf32> to vector<1x24xf32>
    %13 = vector.broadcast %12 : vector<1x24xf32> to vector<128x24xf32>
    %14 = arith.addf %11, %13 : vector<128x24xf32>
    %cst_14 = arith.constant 0.000000e+00 : f32
    %15 = vector.broadcast %cst_14 : f32 to vector<128x24xf32>
    %16 = arith.maximumf %14, %15 : vector<128x24xf32>
    %17 = vector.extract_strided_slice %10 {offsets = [0, 24], sizes = [128, 16], strides = [1, 1]} : vector<128x40xf32> to vector<128x16xf32>
    %c32 = arith.constant 32 : index
    %c0_15 = arith.constant 0 : index
    %18 = vector.load %arg4[%c32, %c0_15] : memref<272x128xbf16, #tpu.memory_space<vmem>>, vector<24x16xbf16>
    %19 = arith.truncf %16 : vector<128x24xf32> to vector<128x24xbf16>
    %cst_16 = arith.constant dense<0.000000e+00> : vector<128x16xf32>
    %20 = tpu.matmul %19, %18, %cst_16 {dimension_numbers = #tpu.dot_dimension_numbers<[1], [0], [0], [1], [0, 0, 1, 1], [], []>} : vector<128x24xbf16>, vector<24x16xbf16>, vector<128x16xf32> -> vector<128x16xf32>
    %21 = vector.extract_strided_slice %8 {offsets = [1, 0], sizes = [1, 16], strides = [1, 1]} : vector<8x128xf32> to vector<1x16xf32>
    %22 = vector.broadcast %21 : vector<1x16xf32> to vector<128x16xf32>
    %23 = arith.addf %20, %22 : vector<128x16xf32>
    %c56 = arith.constant 56 : index
    %c0_17 = arith.constant 0 : index
    %24 = vector.load %arg4[%c56, %c0_17] : memref<272x128xbf16, #tpu.memory_space<vmem>>, vector<16x24xbf16>
    %25 = arith.truncf %23 : vector<128x16xf32> to vector<128x16xbf16>
    %cst_18 = arith.constant dense<0.000000e+00> : vector<128x24xf32>
    %26 = tpu.matmul %25, %24, %cst_18 {dimension_numbers = #tpu.dot_dimension_numbers<[1], [0], [0], [1], [0, 0, 1, 1], [], []>} : vector<128x16xbf16>, vector<16x24xbf16>, vector<128x24xf32> -> vector<128x24xf32>
    %27 = vector.extract_strided_slice %8 {offsets = [2, 0], sizes = [1, 24], strides = [1, 1]} : vector<8x128xf32> to vector<1x24xf32>
    %28 = vector.broadcast %27 : vector<1x24xf32> to vector<128x24xf32>
    %29 = arith.addf %26, %28 : vector<128x24xf32>
    %cst_19 = arith.constant 0.000000e+00 : f32
    %30 = vector.broadcast %cst_19 : f32 to vector<128x24xf32>
    %31 = arith.maximumf %29, %30 : vector<128x24xf32>
    %c72 = arith.constant 72 : index
    %c0_20 = arith.constant 0 : index
    %32 = vector.load %arg4[%c72, %c0_20] : memref<272x128xbf16, #tpu.memory_space<vmem>>, vector<24x16xbf16>
    %33 = arith.truncf %31 : vector<128x24xf32> to vector<128x24xbf16>
    %cst_21 = arith.constant dense<0.000000e+00> : vector<128x16xf32>
    %34 = tpu.matmul %33, %32, %cst_21 {dimension_numbers = #tpu.dot_dimension_numbers<[1], [0], [0], [1], [0, 0, 1, 1], [], []>} : vector<128x24xbf16>, vector<24x16xbf16>, vector<128x16xf32> -> vector<128x16xf32>
    %35 = vector.extract_strided_slice %8 {offsets = [3, 0], sizes = [1, 16], strides = [1, 1]} : vector<8x128xf32> to vector<1x16xf32>
    %36 = vector.broadcast %35 : vector<1x16xf32> to vector<128x16xf32>
    %37 = arith.addf %34, %36 : vector<128x16xf32>
    %c96 = arith.constant 96 : index
    %c0_22 = arith.constant 0 : index
    %38 = vector.load %arg4[%c96, %c0_22] : memref<272x128xbf16, #tpu.memory_space<vmem>>, vector<64x32xbf16>
    %cst_23 = arith.constant dense<0.000000e+00> : vector<128x32xf32>
    %39 = tpu.matmul %1, %38, %cst_23 {dimension_numbers = #tpu.dot_dimension_numbers<[1], [0], [0], [1], [0, 0, 1, 1], [], []>} : vector<128x64xbf16>, vector<64x32xbf16>, vector<128x32xf32> -> vector<128x32xf32>
    %40 = vector.extract_strided_slice %8 {offsets = [4, 0], sizes = [1, 32], strides = [1, 1]} : vector<8x128xf32> to vector<1x32xf32>
    %41 = vector.broadcast %40 : vector<1x32xf32> to vector<128x32xf32>
    %42 = arith.addf %39, %41 : vector<128x32xf32>
    %cst_24 = arith.constant 0.000000e+00 : f32
    %43 = vector.broadcast %cst_24 : f32 to vector<128x32xf32>
    %44 = arith.maximumf %42, %43 : vector<128x32xf32>
    %c160 = arith.constant 160 : index
    %c0_25 = arith.constant 0 : index
    %45 = vector.load %arg4[%c160, %c0_25] : memref<272x128xbf16, #tpu.memory_space<vmem>>, vector<32x16xbf16>
    %46 = arith.truncf %44 : vector<128x32xf32> to vector<128x32xbf16>
    %cst_26 = arith.constant dense<0.000000e+00> : vector<128x16xf32>
    %47 = tpu.matmul %46, %45, %cst_26 {dimension_numbers = #tpu.dot_dimension_numbers<[1], [0], [0], [1], [0, 0, 1, 1], [], []>} : vector<128x32xbf16>, vector<32x16xbf16>, vector<128x16xf32> -> vector<128x16xf32>
    %48 = vector.extract_strided_slice %8 {offsets = [5, 0], sizes = [1, 16], strides = [1, 1]} : vector<8x128xf32> to vector<1x16xf32>
    %49 = vector.broadcast %48 : vector<1x16xf32> to vector<128x16xf32>
    %50 = arith.addf %47, %49 : vector<128x16xf32>
    %cst_27 = arith.constant 0.000000e+00 : f32
    %51 = vector.broadcast %cst_27 : f32 to vector<128x16xf32>
    %52 = arith.maximumf %50, %51 : vector<128x16xf32>
    %c240 = arith.constant 240 : index
    %c0_28 = arith.constant 0 : index
    %53 = vector.load %arg4[%c240, %c0_28] : memref<272x128xbf16, #tpu.memory_space<vmem>>, vector<16x2xbf16>
    %54 = arith.truncf %17 : vector<128x16xf32> to vector<128x16xbf16>
    %cst_29 = arith.constant dense<0.000000e+00> : vector<128x2xf32>
    %55 = tpu.matmul %54, %53, %cst_29 {dimension_numbers = #tpu.dot_dimension_numbers<[1], [0], [0], [1], [0, 0, 1, 1], [], []>} : vector<128x16xbf16>, vector<16x2xbf16>, vector<128x2xf32> -> vector<128x2xf32>
    %56 = vector.extract_strided_slice %55 {offsets = [0, 0], sizes = [128, 1], strides = [1, 1]} : vector<128x2xf32> to vector<128x1xf32>
    %57 = vector.extract_strided_slice %55 {offsets = [0, 1], sizes = [128, 1], strides = [1, 1]} : vector<128x2xf32> to vector<128x1xf32>
    %58 = tpu.transpose %57, [1, 0] : vector<128x1xf32> -> vector<1x128xf32>
    %59 = vector.broadcast %56 : vector<128x1xf32> to vector<128x128xf32>
    %60 = vector.broadcast %58 : vector<1x128xf32> to vector<128x128xf32>
    %61 = arith.addf %59, %60 : vector<128x128xf32>
    %62 = arith.addf %61, %3 : vector<128x128xf32>
    %cst_30 = arith.constant 0.000000e+00 : f32
    %63 = vector.broadcast %cst_30 : f32 to vector<128x128xf32>
    %64 = arith.cmpf ogt, %62, %63 : vector<128x128xf32>
    %cst_31 = arith.constant 2.000000e-01 : f32
    %65 = vector.broadcast %cst_31 : f32 to vector<128x128xf32>
    %66 = arith.mulf %65, %62 : vector<128x128xf32>
    %67 = arith.select %64, %62, %66 : vector<128x128xi1>, vector<128x128xf32>
    %cst_32 = arith.constant 0.000000e+00 : f32
    %68 = vector.broadcast %cst_32 : f32 to vector<128x128xf32>
    %69 = arith.cmpf ogt, %7, %68 : vector<128x128xf32>
    %cst_33 = arith.constant -1.000000e+09 : f32
    %70 = vector.broadcast %cst_33 : f32 to vector<128x128xf32>
    %71 = arith.select %69, %67, %70 : vector<128x128xi1>, vector<128x128xf32>
    %cst_34 = arith.constant dense<0xFF800000> : vector<128xf32>
    %72 = vector.multi_reduction <maximumf>, %71, %cst_34 [1] : vector<128x128xf32> to vector<128xf32>
    %73 = vector.shape_cast %72 : vector<128xf32> to vector<128x1xf32>
    %74 = vector.broadcast %73 : vector<128x1xf32> to vector<128x128xf32>
    %75 = arith.subf %71, %74 : vector<128x128xf32>
    %cst_35 = arith.constant 0.000000e+00 : f32
    %76 = vector.broadcast %cst_35 : f32 to vector<128x128xf32>
    %77 = arith.cmpf ogt, %7, %76 : vector<128x128xf32>
    %78 = math.exp %75 : vector<128x128xf32>
    %cst_36 = arith.constant 0.000000e+00 : f32
    %79 = vector.broadcast %cst_36 : f32 to vector<128x128xf32>
    %80 = arith.select %77, %78, %79 : vector<128x128xi1>, vector<128x128xf32>
    %cst_37 = arith.constant dense<0.000000e+00> : vector<128xf32>
    %81 = vector.multi_reduction <add>, %80, %cst_37 [1] : vector<128x128xf32> to vector<128xf32>
    %82 = vector.shape_cast %81 : vector<128xf32> to vector<128x1xf32>
    %cst_38 = arith.constant 9.99999971E-10 : f32
    %83 = vector.broadcast %cst_38 : f32 to vector<128x1xf32>
    %84 = arith.addf %82, %83 : vector<128x1xf32>
    %85 = tpu.reciprocal %84 {approx = true} : vector<128x1xf32> -> vector<128x1xf32>
    %86 = vector.broadcast %85 : vector<128x1xf32> to vector<128x128xf32>
    %87 = arith.mulf %80, %86 : vector<128x128xf32>
    %88 = arith.truncf %87 : vector<128x128xf32> to vector<128x128xbf16>
    %89 = arith.truncf %17 : vector<128x16xf32> to vector<128x16xbf16>
    %cst_39 = arith.constant dense<0.000000e+00> : vector<128x16xf32>
    %90 = tpu.matmul %88, %89, %cst_39 {dimension_numbers = #tpu.dot_dimension_numbers<[1], [0], [0], [1], [0, 0, 1, 1], [], []>} : vector<128x128xbf16>, vector<128x16xbf16>, vector<128x16xf32> -> vector<128x16xf32>
    %cst_40 = arith.constant 0.000000e+00 : f32
    %91 = vector.broadcast %cst_40 : f32 to vector<128x16xf32>
    %92 = arith.cmpf ogt, %90, %91 : vector<128x16xf32>
    %cst_41 = arith.constant 0.000000e+00 : f32
    %93 = vector.broadcast %cst_41 : f32 to vector<128x16xf32>
    %94 = arith.minimumf %90, %93 : vector<128x16xf32>
    %95 = math.exp %94 : vector<128x16xf32>
    %cst_42 = arith.constant 1.000000e+00 : f32
    %96 = vector.broadcast %cst_42 : f32 to vector<128x16xf32>
    %97 = arith.subf %95, %96 : vector<128x16xf32>
    %98 = arith.select %92, %90, %97 : vector<128x16xi1>, vector<128x16xf32>
    %c192 = arith.constant 192 : index
    %c0_43 = arith.constant 0 : index
    %99 = vector.load %arg4[%c192, %c0_43] : memref<272x128xbf16, #tpu.memory_space<vmem>>, vector<16x16xbf16>
    %100 = arith.truncf %98 : vector<128x16xf32> to vector<128x16xbf16>
    %cst_44 = arith.constant dense<0.000000e+00> : vector<128x16xf32>
    %101 = tpu.matmul %100, %99, %cst_44 {dimension_numbers = #tpu.dot_dimension_numbers<[1], [0], [0], [1], [0, 0, 1, 1], [], []>} : vector<128x16xbf16>, vector<16x16xbf16>, vector<128x16xf32> -> vector<128x16xf32>
    %c256 = arith.constant 256 : index
    %c0_45 = arith.constant 0 : index
    %102 = vector.load %arg4[%c256, %c0_45] : memref<272x128xbf16, #tpu.memory_space<vmem>>, vector<16x2xbf16>
    %103 = arith.truncf %101 : vector<128x16xf32> to vector<128x16xbf16>
    %cst_46 = arith.constant dense<0.000000e+00> : vector<128x2xf32>
    %104 = tpu.matmul %103, %102, %cst_46 {dimension_numbers = #tpu.dot_dimension_numbers<[1], [0], [0], [1], [0, 0, 1, 1], [], []>} : vector<128x16xbf16>, vector<16x2xbf16>, vector<128x2xf32> -> vector<128x2xf32>
    %105 = vector.extract_strided_slice %104 {offsets = [0, 0], sizes = [128, 1], strides = [1, 1]} : vector<128x2xf32> to vector<128x1xf32>
    %106 = vector.extract_strided_slice %104 {offsets = [0, 1], sizes = [128, 1], strides = [1, 1]} : vector<128x2xf32> to vector<128x1xf32>
    %107 = tpu.transpose %106, [1, 0] : vector<128x1xf32> -> vector<1x128xf32>
    %108 = vector.broadcast %105 : vector<128x1xf32> to vector<128x128xf32>
    %109 = vector.broadcast %107 : vector<1x128xf32> to vector<128x128xf32>
    %110 = arith.addf %108, %109 : vector<128x128xf32>
    %111 = arith.addf %110, %5 : vector<128x128xf32>
    %cst_47 = arith.constant 0.000000e+00 : f32
    %112 = vector.broadcast %cst_47 : f32 to vector<128x128xf32>
    %113 = arith.cmpf ogt, %111, %112 : vector<128x128xf32>
    %cst_48 = arith.constant 2.000000e-01 : f32
    %114 = vector.broadcast %cst_48 : f32 to vector<128x128xf32>
    %115 = arith.mulf %114, %111 : vector<128x128xf32>
    %116 = arith.select %113, %111, %115 : vector<128x128xi1>, vector<128x128xf32>
    %cst_49 = arith.constant 0.000000e+00 : f32
    %117 = vector.broadcast %cst_49 : f32 to vector<128x128xf32>
    %118 = arith.cmpf ogt, %7, %117 : vector<128x128xf32>
    %cst_50 = arith.constant -1.000000e+09 : f32
    %119 = vector.broadcast %cst_50 : f32 to vector<128x128xf32>
    %120 = arith.select %118, %116, %119 : vector<128x128xi1>, vector<128x128xf32>
    %cst_51 = arith.constant dense<0xFF800000> : vector<128xf32>
    %121 = vector.multi_reduction <maximumf>, %120, %cst_51 [1] : vector<128x128xf32> to vector<128xf32>
    %122 = vector.shape_cast %121 : vector<128xf32> to vector<128x1xf32>
    %123 = vector.broadcast %122 : vector<128x1xf32> to vector<128x128xf32>
    %124 = arith.subf %120, %123 : vector<128x128xf32>
    %cst_52 = arith.constant 0.000000e+00 : f32
    %125 = vector.broadcast %cst_52 : f32 to vector<128x128xf32>
    %126 = arith.cmpf ogt, %7, %125 : vector<128x128xf32>
    %127 = math.exp %124 : vector<128x128xf32>
    %cst_53 = arith.constant 0.000000e+00 : f32
    %128 = vector.broadcast %cst_53 : f32 to vector<128x128xf32>
    %129 = arith.select %126, %127, %128 : vector<128x128xi1>, vector<128x128xf32>
    %cst_54 = arith.constant dense<0.000000e+00> : vector<128xf32>
    %130 = vector.multi_reduction <add>, %129, %cst_54 [1] : vector<128x128xf32> to vector<128xf32>
    %131 = vector.shape_cast %130 : vector<128xf32> to vector<128x1xf32>
    %cst_55 = arith.constant 9.99999971E-10 : f32
    %132 = vector.broadcast %cst_55 : f32 to vector<128x1xf32>
    %133 = arith.addf %131, %132 : vector<128x1xf32>
    %134 = tpu.reciprocal %133 {approx = true} : vector<128x1xf32> -> vector<128x1xf32>
    %135 = vector.broadcast %134 : vector<128x1xf32> to vector<128x128xf32>
    %136 = arith.mulf %129, %135 : vector<128x128xf32>
    %137 = arith.truncf %136 : vector<128x128xf32> to vector<128x128xbf16>
    %138 = arith.truncf %101 : vector<128x16xf32> to vector<128x16xbf16>
    %cst_56 = arith.constant dense<0.000000e+00> : vector<128x16xf32>
    %139 = tpu.matmul %137, %138, %cst_56 {dimension_numbers = #tpu.dot_dimension_numbers<[1], [0], [0], [1], [0, 0, 1, 1], [], []>} : vector<128x128xbf16>, vector<128x16xbf16>, vector<128x16xf32> -> vector<128x16xf32>
    %cst_57 = arith.constant 0.000000e+00 : f32
    %140 = vector.broadcast %cst_57 : f32 to vector<128x16xf32>
    %141 = arith.maximumf %139, %140 : vector<128x16xf32>
    %142 = arith.mulf %52, %141 : vector<128x16xf32>
    %143 = math.sqrt %142 : vector<128x16xf32>
    %c208 = arith.constant 208 : index
    %c0_58 = arith.constant 0 : index
    %144 = vector.load %arg4[%c208, %c0_58] : memref<272x128xbf16, #tpu.memory_space<vmem>>, vector<16x4xbf16>
    %145 = arith.truncf %37 : vector<128x16xf32> to vector<128x16xbf16>
    %cst_59 = arith.constant dense<0.000000e+00> : vector<128x4xf32>
    %146 = tpu.matmul %145, %144, %cst_59 {dimension_numbers = #tpu.dot_dimension_numbers<[1], [0], [0], [1], [0, 0, 1, 1], [], []>} : vector<128x16xbf16>, vector<16x4xbf16>, vector<128x4xf32> -> vector<128x4xf32>
    %c224 = arith.constant 224 : index
    %c0_60 = arith.constant 0 : index
    %147 = vector.load %arg4[%c224, %c0_60] : memref<272x128xbf16, #tpu.memory_space<vmem>>, vector<16x4xbf16>
    %148 = arith.truncf %143 : vector<128x16xf32> to vector<128x16xbf16>
    %cst_61 = arith.constant dense<0.000000e+00> : vector<128x4xf32>
    %149 = tpu.matmul %148, %147, %cst_61 {dimension_numbers = #tpu.dot_dimension_numbers<[1], [0], [0], [1], [0, 0, 1, 1], [], []>} : vector<128x16xbf16>, vector<16x4xbf16>, vector<128x4xf32> -> vector<128x4xf32>
    %150 = arith.addf %146, %149 : vector<128x4xf32>
    %151 = vector.extract_strided_slice %8 {offsets = [6, 0], sizes = [1, 4], strides = [1, 1]} : vector<8x128xf32> to vector<1x4xf32>
    %152 = vector.broadcast %151 : vector<1x4xf32> to vector<128x4xf32>
    %153 = arith.addf %150, %152 : vector<128x4xf32>
    %c0_62 = arith.constant 0 : index
    %c0_63 = arith.constant 0 : index
    %154 = vector.load %arg6[%c0_62, %c0_63] : memref<128x4xf32, #tpu.memory_space<vmem>>, vector<128x4xf32>
    tpu.vector_store %arg6[%c0_62, %c0_63], %153 {strides = array<i32>} : memref<128x4xf32, #tpu.memory_space<vmem>>, vector<128x4xf32>,
    return
  }
  func.func @transform_0(%arg0: i32) -> (i32, i32) {
    %c0_i32 = arith.constant 0 : i32
    %c0_i32_0 = arith.constant 0 : i32
    return %arg0, %c0_i32 : i32, i32
  }
  func.func @transform_1(%arg0: i32) -> (i32, i32) {
    %c0_i32 = arith.constant 0 : i32
    %c0_i32_0 = arith.constant 0 : i32
    return %arg0, %c0_i32 : i32, i32
  }
  func.func @transform_2(%arg0: i32) -> (i32, i32, i32) {
    %c0_i32 = arith.constant 0 : i32
    %c0_i32_0 = arith.constant 0 : i32
    %c0_i32_1 = arith.constant 0 : i32
    return %c0_i32, %arg0, %c0_i32_0 : i32, i32, i32
  }
  func.func @transform_3(%arg0: i32) -> (i32, i32) {
    %c0_i32 = arith.constant 0 : i32
    %c0_i32_0 = arith.constant 0 : i32
    %c0_i32_1 = arith.constant 0 : i32
    return %c0_i32, %c0_i32_0 : i32, i32
  }
  func.func @transform_4(%arg0: i32) -> (i32, i32) {
    %c0_i32 = arith.constant 0 : i32
    %c0_i32_0 = arith.constant 0 : i32
    %c0_i32_1 = arith.constant 0 : i32
    return %c0_i32, %c0_i32_0 : i32, i32
  }
  func.func @transform_5(%arg0: i32) -> (i32, i32) {
    %c0_i32 = arith.constant 0 : i32
    %c0_i32_0 = arith.constant 0 : i32
    return %arg0, %c0_i32 : i32, i32
  }
}

</mosaic_0001>

<bundles_post_ra>
// kernel: tpu_custom_call.1
= control target key start
LH: loop header
LB: loop body
LE: loop exit
PB: predicated region body
PF: predicated region fallthrough
CT: control target
= control target key end

     0   :  { %10 = vsyncpa [#allocation3], 0  ;;  %s5824_s0 = inlined_call_operand.vmem [shape: bf16[256,32], index: 0, kind: input, shape index: {}]   ;;  %s5825_s1 = inlined_call_operand.vmem [shape: bf16[256,64], index: 1, kind: input, shape index: {}]   ;;  %s5826_s2 = inlined_call_operand.hbm [shape: f32[3,256,128], index: 2, kind: input, shape index: {}]   ;;  %s5827_s3 = inlined_call_operand.vmem [shape: bf16[272,128], index: 3, kind: input, shape index: {}]   ;;  %s5828_s4 = inlined_call_operand.vmem [shape: f32[8,128], index: 4, kind: input, shape index: {}]   ;;  %s5829_s5 = inlined_call_operand.vmem [shape: f32[256,4], index: 5, kind: output, shape index: {}]  }
   0x1   :  { %12 = vsyncpa [#allocation3 + $0x1], 0  ;;  %s4613_s18 = smov 0   ;;  %s4615_s19 = smov 0  }
   0x2   :  { %s4617_s20 = smov 0   ;;  %s4619_s21 = smov 0  }
   0x3 LB: > { %s3632_s22 = sadd.s32 4294967295, %s4572_s21   ;;  %s4633_s23 = sadd.s32 1, %s4572_s21   ;;  %s4572_s21 = sphi %s4619_s21, %s5948_s21   ;;  %s4568_s20 = sphi %s4617_s20, %s5947_s20   ;;  %s4564_s19 = sphi %s4615_s19, %s5946_s19   ;;  %s4560_s18 = sphi %s4613_s18, %s5945_s18  }
   0x4   : > { %s74_s24 = ssub.s32 %s4572_s21, %s4633_s23  ;;  %s77_s25 = sadd.s32 1, %s4568_s20 }
   0x5   : > { %p75_p0 = scmp.eq.s32.totalorder %s74_s24, 0  ;;  %p84_p1 = scmp.ne.s32.totalorder %s4568_s20, %s4564_s19 }
   0x6   : > { %p85_p2 = scmp.eq.s32.totalorder %s4572_s21, 0  ;;  %p90_p3 = scmp.ne.s32.totalorder %s4564_s19, %s4560_s18 }
   0x7   : > { %s4643_s26 = scalar_select %p75_p0, %s4568_s20, %s77_s25  }
   0x8   : > { %p4645_p4 = por %p85_p2, %p84_p1  ;;  %p91_p5 = scmp.eq.s32.totalorder %s3632_s22, 0 }
   0x9   : > { %p3635_p7 = scmp.ge.s32.totalorder %s4572_s21, 2 }
   0xa   : > { %p4651_p6 = por %p91_p5, %p90_p3 }
   0xb   : > { %184 = sbr.rel (%p3635_p7) target bundleno = 32 (0x20), region = 24 }
  0x12   : > { %s206_s29 = sand.u32 1, %s4568_s20   ;;  %s3819_s6 = sshll.u32 %s4572_s21, 11 }
  0x13   : > { %s4257_s30 = smul.u32 384, %s206_s29  ;;  %s4574_s7 = smov 4096  }
  0x14   : > { %4260 = sst [smem:[#allocation5]] (%p4645_p4), %s4574_s7  ;;  %s216_s11 = scalar_lea.hbm %s5826_s2, %s3819_s6 }
  0x15   : > { %s4259_s8 = scalar_select %p4645_p4, [#allocation0], [#allocation6] }
  0x16   : > { %s210_s13 = scalar_lea.vmem [#allocation2], %s4257_s30  ;;  %s4575_s15 = smov 2048  }
  0x17   : > { %s221_s12 = sld [smem:[%s4259_s8]]   ;;  %s229_s14 = sshll.u32 %s210_s13, 4  ;;  %s230_s14 = int_to_ptr.vmem [resolvable:$true] %s229_s14 }
  0x18   : > { %4261 = sst [smem:[#allocation5 + $0x1]] (%p4645_p4), %s4575_s15  ;;  %s4576_s16 = smov 16  }
  0x19   : > { %4262 = sst [smem:[#allocation5 + $0x2]] (%p4645_p4), %s4576_s16  ;;  %s4577_s17 = smov 128  }
  0x1a   : > { %4263 = sst [smem:[#allocation5 + $0x3]] (%p4645_p4), %s4577_s17  ;;  %s4578_s18 = smov 8  }
  0x1b   : > { %4264 = sst [smem:[#allocation5 + $0x4]] (%p4645_p4), %s4577_s17  ;;  %s207_s30 = scalar_lea.sflag [#allocation3], %s206_s29 }
  0x1c   : > { %4265 = sst [smem:[#allocation5 + $0x5]] (%p4645_p4), %s4578_s18  ;;  %s4579_s6 = smov [#allocation4]  }
  0x1d   : > { %s3638_s24 = sshll.u32 %s221_s12, 26 }
  0x1e   : > { %s3639_s25 = sadd.s32 134217728, %s3638_s24 }
  0x1f   : > { %4266 = dma.general (%p4645_p4), %s216_s11, 6144, %s230_s14, %s207_s30, %s4579_s6, [#allocation5], %s3639_s25, 0  }
  0x20 PF: > { %p3640_p8 = scmp.ge.s32.totalorder %s4572_s21, 1  ;;  %p250_p9 = scmp.lt.s32.totalorder %s4572_s21, 3 }
  0x22   : > { %p251_p10 = pnand %p3640_p8, %p250_p9 }
  0x24   : > { %254 = sbr.rel (%p251_p10) target bundleno = 3186 (0xc72), region = 40 }
  0x2b   : > { %s256_s7 = sand.u32 1, %s4564_s19  }
  0x2c   : > { %s4258_s8 = smul.u32 384, %s256_s7  ;;  %s257_s9 = scalar_lea.sflag [#allocation3], %s256_s7 }
  0x2e   : > { %s4680_s10 = scalar_lea.vmem [#allocation2], %s4258_s8 }
  0x2f   : > { %4555 = dma.done.wait (%p4651_p6), %s257_s9, 6144  }
  0x30   : > { %4557 = vsyncadd (%p4651_p6), %s257_s9, 4294961152  ;;  %s3641_s27 = sshll.u32 %s3632_s22, 4  ;;  %v4311_v0 = vld [vmem:[%s5827_s3] sm:$0xff]   ;;  %v4312_v1 = vld [vmem:[%s5827_s3 + $0x8] sm:$0xff]   ;;  %vm456_vm0 = vcmask 261120   ;;  %vm663_vm1 = vcmask 1043456   ;;  %v578_v13 = vlaneseq }
  0x31   : > { %p298_p11 = scmp.lt.s32.totalorder %s3641_s27, 31  ;;  %3958 = vmatprep.subr.bf16.mxu0 %v4311_v0  ;;  %v4321_v5 = vld [vmem:[%s5827_s3 + $0x10] sm:$0xff]   ;;  %v4322_v6 = vld [vmem:[%s5827_s3 + $0x18] ss:$0 sps:$4 sm:$0xff]   ;;  %v4740_v16 = vld [vmem:[%s5828_s4] sm:$0xff]  ;;  %s4580_s8 = smov 104  }
  0x32   : > { %3959 = vmatpush3.bf16.msra.mxu0 %v4311_v0  ;;  %4234 = vmatprep.subr.bf16.mxu1 %v4321_v5  ;;  %v665_v9 = vsel %vm663_vm1, %v4322_v6, 0  ;;  %v4732_v14 = vshrl.u32 %v578_v13, 7  ;;  %vm638_vm2 = vcmask 195584   ;;  %v4323_v51 = vld [vmem:[%s5827_s3 + $0x1c] sm:$0xff]   ;;  %vm5840_vm3 = vcmask 130048  }
  0x33   : > { %s5950_s27 = smov (!%p298_p11, %s3641_s27), 31  ;;  %3960 = vmatprep.subr.bf16.mxu0 %v4312_v1  ;;  %4236 = vmatpush3.bf16.msra.mxu1 %v4321_v5  ;;  %vm1146_vm4 = vcmask 523264  }
  0x34   : > { %s3642_s29 = sshll.u32 %s5950_s27, 2  ;;  %4255 = vmatprep.subr.msk.bf16.mxu1 %vm663_vm1, %v4322_v6  ;;  %v4735_v15 = vsub.s32 0, %v4732_v14  ;;  %s3646_s17 = sshll.u32 %s5950_s27, 3 }
  0x35   : > { %s4694_s13 = scalar_lea.vmem %s5824_s0, %s3642_s29  ;;  %s4720_s30 = scalar_lea.vmem %s5825_s1, %s3642_s29 }
  0x36   : > { %v4313_v2 = vld [vmem:[%s4694_s13] sm:$0xff]   ;;  %v4314_v3 = vld [vmem:[%s4694_s13 + $0x8] sm:$0xff]   ;;  %3961 = vmatpush3.bf16.msra.mxu0 %v4312_v1  ;;  %v4315_v4 = vld [vmem:[%s4694_s13 + $0x10] sm:$0xff]   ;;  %v4744_v17 = vrot.slane %v4740_v16, %v4735_v15  ;;  %s4582_s29 = smov 127   ;;  %s5777_s25 = scalar_lea.vmem %s5829_s5, %s3646_s17 }
  0x37   : > { %3962 = vmatprep.mubr.msk.bf16.mxu0 %vm456_vm0, %v4313_v2  ;;  %v4316_v7 = vld [vmem:[%s4694_s13 + $0x18] sm:$0xff]   ;;  %3978 = vmatprep.subr.bf16.mxu0 %v4321_v5  ;;  %v4317_v8 = vld [vmem:[%s4694_s13 + $0x20] sm:$0xff]   ;;  %v4318_v10 = vld [vmem:[%s4694_s13 + $0x28] sm:$0xff]  }
  0x38   : > { %4237 = vmatpush3.bf16.msra.mxu1 %v665_v9  ;;  %v4319_v11 = vld [vmem:[%s4694_s13 + $0x30] sm:$0xff]   ;;  %v4320_v12 = vld [vmem:[%s4694_s13 + $0x38] sm:$0xff]  }
  0x39   : > { %3963 = vmatmul.mubr.msk.bf16.vlgmr.msra.gmra.mrb[0].mxu0 %vm456_vm0, %v4314_v3 }
  0x3a   : > { %3966 = vmatprep.mubr.msk.bf16.mxu0 %vm456_vm0, %v4315_v4  ;;  %3979 = vmatpush3.bf16.msra.mxu0 %v4321_v5 }
  0x3b   : > { %4254 = vmatprep.subr.msk.bf16.mxu0 %vm663_vm1, %v4322_v6 }
  0x3e   : > { %3981 = vmatpush3.bf16.msra.mxu0 %v665_v9 }
  0x3f   : > { %3998 = vmatprep.subr.bf16.mxu0 %v4323_v51 }
  0x41   : > { %3967 = vmatmul.mubr.msk.bf16.gmra.mrb[4].mxu0 %vm456_vm0, %v4316_v7 }
  0x42   : > { %3970 = vmatprep.mubr.msk.bf16.mxu0 %vm456_vm0, %v4317_v8 }
  0x49   : > { %3971 = vmatmul.mubr.msk.bf16.gmra.mrb[8].mxu0 %vm456_vm0, %v4318_v10 }
  0x4a   : > { %3974 = vmatprep.mubr.msk.bf16.mxu0 %vm456_vm0, %v4319_v11 }
  0x51   : > { %3975 = vmatmul.mubr.msk.bf16.gmra.mrb[12].mxu0 %vm456_vm0, %v4320_v12 }
 0x10c   : > { %v3964_v18 = vpop.f32.mrb[0].mxu0 }
 0x10d   : > { %v584_v19 = vadd.f32 %v3964_v18, %v4744_v17  ;;  %v515_v20 = vpop.f32.mrb[1].mxu0 }
 0x10e   : > { %v582_v21 = vadd.f32 %v4744_v17, %v515_v20  ;;  %v3965_v22 = vpop.f32.mrb[2].mxu0 }
 0x10f   : > { %v585_v23 = vadd.f32 %v3965_v22, %v4744_v17  ;;  %v1452_v24 = vpack.c.bf16 %v3965_v22, %v3964_v18  ;;  %v518_v25 = vpop.f32.mrb[3].mxu0  ;;  %v600_v28 = vmax.f32 %v584_v19, 0.0 }
 0x110   : > { %v583_v26 = vadd.f32 %v4744_v17, %v518_v25  ;;  %v1451_v27 = vpack.c.bf16 %v518_v25, %v515_v20  ;;  %v598_v30 = vmax.f32 %v582_v21, 0.0 }
 0x111   : > { %v601_v29 = vmax.f32 %v585_v23, 0.0  ;;  %v4324_v23 = vld [vmem:[%s5827_s3 + $0x30] sm:$0xff]  }
 0x112   : > { %v599_v31 = vmax.f32 %v583_v26, 0.0  ;;  %1467 = vrot.lane.b32.xlu0 %v1451_v27, %s4580_s8 }
 0x113   : > { %v618_v32 = vpack.c.bf16 %v601_v29, %v600_v28 }
 0x114   : > { %v617_v33 = vpack.c.bf16 %v599_v31, %v598_v30  ;;  %v3968_v34 = vpop.f32.mrb[4].mxu0 }
 0x115   : > { %v588_v35 = vadd.f32 %v3968_v34, %v4744_v17  ;;  %v531_v36 = vpop.f32.mrb[5].mxu0 }
 0x116   : > { %v586_v37 = vadd.f32 %v4744_v17, %v531_v36  ;;  %1469 = vrot.lane.b32.xlu0 %v1452_v24, %s4580_s8  ;;  %v3969_v38 = vpop.f32.mrb[6].mxu0  ;;  %3982 = vmatprep.mubr.msk.bf16.mxu0 %vm638_vm2, %v617_v33 }
 0x117   : > { %v589_v39 = vadd.f32 %v3969_v38, %v4744_v17  ;;  %v1454_v40 = vpack.c.bf16 %v3969_v38, %v3968_v34  ;;  %v534_v41 = vpop.f32.mrb[7].mxu0  ;;  %3983 = vmatmul.mubr.msk.bf16.vlgmr.msra.gmra.mrb[16].mxu0 %vm638_vm2, %v618_v32  ;;  %v604_v44 = vmax.f32 %v588_v35, 0.0  ;;  %v4325_v35 = vld [vmem:[%s5827_s3 + $0x38] sm:$0xff]  }
 0x118   : > { %v587_v42 = vadd.f32 %v4744_v17, %v534_v41  ;;  %v1453_v43 = vpack.c.bf16 %v534_v41, %v531_v36  ;;  %v602_v46 = vmax.f32 %v586_v37, 0.0  ;;  %3999 = vmatpush3.bf16.msra.mxu0 %v4323_v51 }
 0x119   : > { %v605_v45 = vmax.f32 %v589_v39, 0.0  ;;  %4036 = vmatprep.subr.bf16.mxu0 %v4324_v23 }
 0x11a   : > { %v603_v47 = vmax.f32 %v587_v42, 0.0  ;;  %1471 = vrot.lane.b32.xlu1 %v1453_v43, %s4580_s8  ;;  %v4326_v42 = vld [vmem:[%s5827_s3 + $0x40] sm:$0xff]  }
 0x11b   : > { %v620_v48 = vpack.c.bf16 %v605_v45, %v604_v44 }
 0x11c   : > { %v619_v49 = vpack.c.bf16 %v603_v47, %v602_v46  ;;  %v3972_v50 = vpop.f32.mrb[8].mxu0  ;;  %v4327_v47 = vld [vmem:[%s5827_s3 + $0x48] sm:$0xff]  }
 0x11d   : > { %v592_v52 = vadd.f32 %v3972_v50, %v4744_v17  ;;  %v547_v53 = vpop.f32.mrb[9].mxu0 }
 0x11e   : > { %v590_v54 = vadd.f32 %v4744_v17, %v547_v53  ;;  %1473 = vrot.lane.b32.xlu1 %v1454_v40, %s4580_s8  ;;  %v3973_v55 = vpop.f32.mrb[10].mxu0  ;;  %3986 = vmatprep.mubr.msk.bf16.mxu0 %vm638_vm2, %v619_v49 }
 0x11f   : > { %v593_v56 = vadd.f32 %v3973_v55, %v4744_v17  ;;  %v1456_v57 = vpack.c.bf16 %v3973_v55, %v3972_v50  ;;  %v550_v58 = vpop.f32.mrb[11].mxu0  ;;  %3987 = vmatmul.mubr.msk.bf16.gmra.mrb[20].mxu0 %vm638_vm2, %v620_v48  ;;  %v608_v61 = vmax.f32 %v592_v52, 0.0 }
 0x120   : > { %v591_v59 = vadd.f32 %v4744_v17, %v550_v58  ;;  %v1455_v60 = vpack.c.bf16 %v550_v58, %v547_v53  ;;  %v606_v63 = vmax.f32 %v590_v54, 0.0  ;;  %v4329_v54 = vld [vmem:[%s5827_s3 + $0x78] sm:$0xff]  }
 0x121   : > { %v609_v62 = vmax.f32 %v593_v56, 0.0 }
 0x122   : > { %v607_v0 = vmax.f32 %v591_v59, 0.0  ;;  %1477 = vrot.lane.b32.xlu1 %v1456_v57, %s4580_s8  ;;  %1475 = vrot.lane.b32.xlu0 %v1455_v60, %s4580_s8 }
 0x123   : > { %v622_v1 = vpack.c.bf16 %v609_v62, %v608_v61 }
 0x124   : > { %v3976_v2 = vpop.f32.mrb[12].mxu0  ;;  %v621_v3 = vpack.c.bf16 %v607_v0, %v606_v63 }
 0x125   : > { %v596_v4 = vadd.f32 %v3976_v2, %v4744_v17  ;;  %v563_v5 = vpop.f32.mrb[13].mxu0 }
 0x126   : > { %v594_v6 = vadd.f32 %v4744_v17, %v563_v5  ;;  %v3977_v7 = vpop.f32.mrb[14].mxu0  ;;  %3990 = vmatprep.mubr.msk.bf16.mxu1 %vm638_vm2, %v621_v3 }
 0x127   : > { %v597_v8 = vadd.f32 %v3977_v7, %v4744_v17  ;;  %v1458_v9 = vpack.c.bf16 %v3977_v7, %v3976_v2  ;;  %v566_v10 = vpop.f32.mrb[15].mxu0  ;;  %3991 = vmatmul.mubr.msk.bf16.vlgmr.msra.gmra.mrb[0].mxu1 %vm638_vm2, %v622_v1  ;;  %v612_v13 = vmax.f32 %v596_v4, 0.0  ;;  %v4331_v7 = vld [vmem:[%s4720_s30 + $0x10] sm:$0xff]  }
 0x128   : > { %v595_v11 = vadd.f32 %v4744_v17, %v566_v10  ;;  %v1457_v12 = vpack.c.bf16 %v566_v10, %v563_v5  ;;  %v610_v19 = vmax.f32 %v594_v6, 0.0  ;;  %v627_v17 = vsub.s32 1, %v4732_v14  ;;  %v4328_v5 = vld [vmem:[%s4720_s30] sm:$0xff]   ;;  %v4330_v6 = vld [vmem:[%s4720_s30 + $0x8] sm:$0xff]  }
 0x129   : > { %v613_v18 = vmax.f32 %v597_v8, 0.0  ;;  %1481 = vrot.lane.b32.xlu1 %v1458_v9, %s4580_s8  ;;  %v4332_v8 = vld [vmem:[%s4720_s30 + $0x18] sm:$0xff]   ;;  %v4333_v9 = vld [vmem:[%s4720_s30 + $0x20] sm:$0xff]   ;;  %v4334_v10 = vld [vmem:[%s4720_s30 + $0x28] sm:$0xff]  }
 0x12a   : > { %v611_v20 = vmax.f32 %v595_v11, 0.0  ;;  %1479 = vrot.lane.b32.xlu0 %v1457_v12, %s4580_s8  ;;  %v628_v24 = vrot.slane %v4740_v16, %v627_v17  ;;  %v4335_v11 = vld [vmem:[%s4720_s30 + $0x30] sm:$0xff]   ;;  %v4336_v12 = vld [vmem:[%s4720_s30 + $0x38] sm:$0xff]   ;;  %v4337_v17 = vld [vmem:[%s5827_s3 + $0x24] sm:$0xff]  }
 0x12b   : > { %v624_v21 = vpack.c.bf16 %v613_v18, %v612_v13  ;;  %4016 = vmatprep.subr.bf16.mxu1 %v4337_v17 }
 0x12c   : > { %v623_v22 = vpack.c.bf16 %v611_v20, %v610_v19  ;;  %4017 = vmatpush3.bf16.msra.mxu1 %v4337_v17  ;;  %v1080_v17 = vsub.s32 4, %v4732_v14 }
 0x12e   : > { %3994 = vmatprep.mubr.msk.bf16.mxu1 %vm638_vm2, %v623_v22 }
 0x12f   : > { %3995 = vmatmul.mubr.msk.bf16.gmra.mrb[4].mxu1 %vm638_vm2, %v624_v21 }
 0x184   : > { %v4821_v13 = vpop.permute.xlu0 %1467 }
 0x188   : > { %v4826_v18 = vpop.permute.xlu0 %1469 }
 0x18c   : > { %v4828_v19 = vpop.permute.xlu1 %1471 }
 0x190   : > { %v4834_v20 = vpop.permute.xlu1 %1473 }
 0x194   : > { %v4836_v21 = vpop.permute.xlu0 %1475  ;;  %v4842_v22 = vpop.permute.xlu1 %1477 }
 0x1ea   : > { %v3984_v25 = vpop.f32.mrb[16].mxu0 }
 0x1eb   : > { %v701_v26 = vpop.f32.mrb[17].mxu0  ;;  %v710_v28 = vadd.f32 %v3984_v25, %v628_v24  ;;  %v4338_v25 = vld [vmem:[%s5827_s3 + $0x2c] ss:$0 sps:$4 sm:$0xff]  }
 0x1ec   : > { %v3985_v27 = vpop.f32.mrb[18].mxu0  ;;  %v702_v31 = vadd.f32 %v701_v26, %v628_v24  ;;  %4256 = vmatprep.subr.msk.bf16.mxu1 %vm663_vm1, %v4338_v25  ;;  %v971_v26 = vsel %vm663_vm1, %v4338_v25, 0 }
 0x1ed   : > { %v713_v29 = vadd.f32 %v3985_v27, %v628_v24  ;;  %v704_v30 = vpop.f32.mrb[19].mxu0  ;;  %4019 = vmatpush3.bf16.msra.mxu1 %v971_v26  ;;  %v4339_v27 = vld [vmem:[%s5827_s3 + $0x50] sm:$0xff]  }
 0x1ee   : > { %v705_v32 = vadd.f32 %v704_v30, %v628_v24  ;;  %4060 = vmatprep.subr.bf16.mxu1 %v4339_v27 }
 0x1ef   : > { %v767_v33 = vpack.c.bf16 %v713_v29, %v710_v28  ;;  %v4581_v28 = vmov 0   ;;  %v776_v29 = vsub.s32 2, %v4732_v14 }
 0x1f0   : > { %v766_v34 = vpack.c.bf16 %v705_v32, %v702_v31  ;;  %4310 = vset.pattern.permute.xlu1 %v4581_v28  ;;  %4309 = vset.pattern.permute.xlu0 %v4581_v28 }
 0x1f1   : > { %v777_v30 = vrot.slane %v4740_v16, %v776_v29 }
 0x1f2   : > { %v3988_v36 = vpop.f32.mrb[20].mxu0  ;;  %4000 = vmatprep.mubr.msk.bf16.mxu0 %vm5840_vm3, %v766_v34 }
 0x1f3   : > { %v717_v37 = vpop.f32.mrb[21].mxu0  ;;  %4001 = vmatmul.mubr.msk.bf16.vlgmr.msra.gmra.mrb[24].mxu0 %vm5840_vm3, %v767_v33  ;;  %v726_v39 = vadd.f32 %v3988_v36, %v628_v24 }
 0x1f4   : > { %4037 = vmatpush3.bf16.msra.mxu0 %v4324_v23  ;;  %v3989_v38 = vpop.f32.mrb[22].mxu0  ;;  %v718_v43 = vadd.f32 %v717_v37, %v628_v24  ;;  %v4844_v23 = vpop.permute.xlu0 %1479 }
 0x1f5   : > { %v729_v40 = vadd.f32 %v3989_v38, %v628_v24  ;;  %v720_v41 = vpop.f32.mrb[23].mxu0  ;;  %4038 = vmatprep.subr.bf16.mxu0 %v4325_v35 }
 0x1f6   : > { %v721_v44 = vadd.f32 %v720_v41, %v628_v24 }
 0x1f7   : > { %v769_v45 = vpack.c.bf16 %v729_v40, %v726_v39 }
 0x1f8   : > { %v768_v46 = vpack.c.bf16 %v721_v44, %v718_v43  ;;  %4039 = vmatpush3.bf16.msra.mxu0 %v4325_v35 }
 0x1f9   : > { %4040 = vmatprep.subr.bf16.mxu0 %v4326_v42 }
 0x1fa   : > { %v3992_v48 = vpop.f32.mrb[0].mxu1  ;;  %4004 = vmatprep.mubr.msk.bf16.mxu0 %vm5840_vm3, %v768_v46 }
 0x1fb   : > { %v733_v49 = vpop.f32.mrb[1].mxu1  ;;  %4005 = vmatmul.mubr.msk.bf16.gmra.mrb[28].mxu0 %vm5840_vm3, %v769_v45  ;;  %v742_v51 = vadd.f32 %v3992_v48, %v628_v24  ;;  %v4340_v48 = vld [vmem:[%s5827_s3 + $0x58] sm:$0xff]  }
 0x1fc   : > { %v3993_v50 = vpop.f32.mrb[2].mxu1  ;;  %4041 = vmatpush3.bf16.msra.mxu0 %v4326_v42  ;;  %v734_v55 = vadd.f32 %v733_v49, %v628_v24 }
 0x1fd   : > { %v745_v52 = vadd.f32 %v3993_v50, %v628_v24  ;;  %v736_v53 = vpop.f32.mrb[3].mxu1  ;;  %4042 = vmatprep.subr.bf16.mxu0 %v4327_v47 }
 0x1fe   : > { %v737_v56 = vadd.f32 %v736_v53, %v628_v24 }
 0x1ff   : > { %v771_v57 = vpack.c.bf16 %v745_v52, %v742_v51 }
 0x200   : > { %v770_v58 = vpack.c.bf16 %v737_v56, %v734_v55  ;;  %4043 = vmatpush3.bf16.msra.mxu0 %v4327_v47 }
 0x201   : > { %4080 = vmatprep.subr.bf16.mxu0 %v4329_v54 }
 0x202   : > { %v3996_v59 = vpop.f32.mrb[4].mxu1  ;;  %4008 = vmatprep.mubr.msk.bf16.mxu0 %vm5840_vm3, %v770_v58 }
 0x203   : > { %v749_v60 = vpop.f32.mrb[5].mxu1  ;;  %4009 = vmatmul.mubr.msk.bf16.gmra.mrb[32].mxu0 %vm5840_vm3, %v771_v57  ;;  %v758_v62 = vadd.f32 %v3996_v59, %v628_v24 }
 0x204   : > { %v3997_v61 = vpop.f32.mrb[6].mxu1  ;;  %v750_v1 = vadd.f32 %v749_v60, %v628_v24 }
 0x205   : > { %v761_v63 = vadd.f32 %v3997_v61, %v628_v24  ;;  %v752_v0 = vpop.f32.mrb[7].mxu1 }
 0x206   : > { %v753_v2 = vadd.f32 %v752_v0, %v628_v24  ;;  %v4853_v24 = vpop.permute.xlu1 %1481 }
 0x207   : > { %v773_v3 = vpack.c.bf16 %v761_v63, %v758_v62 }
 0x208   : > { %v772_v4 = vpack.c.bf16 %v753_v2, %v750_v1 }
 0x20a   : > { %4012 = vmatprep.mubr.msk.bf16.mxu0 %vm5840_vm3, %v772_v4 }
 0x20b   : > { %4013 = vmatmul.mubr.msk.bf16.gmra.mrb[36].mxu0 %vm5840_vm3, %v773_v3 }
 0x20c   : > { %4044 = vmatprep.mubr.msk.bf16.mxu0 %vm1146_vm4, %v4328_v5 }
 0x213   : > { %4045 = vmatmul.mubr.msk.bf16.vlgmr.msra.gmra.mrb[40].mxu0 %vm1146_vm4, %v4330_v6 }
 0x214   : > { %4081 = vmatpush3.bf16.msra.mxu0 %v4329_v54  ;;  %4048 = vmatprep.mubr.msk.bf16.mxu0 %vm1146_vm4, %v4331_v7 }
 0x21b   : > { %4049 = vmatmul.mubr.msk.bf16.gmra.mrb[44].mxu0 %vm1146_vm4, %v4332_v8 }
 0x21c   : > { %4052 = vmatprep.mubr.msk.bf16.mxu0 %vm1146_vm4, %v4333_v9 }
 0x223   : > { %4053 = vmatmul.mubr.msk.bf16.gmra.mrb[48].mxu0 %vm1146_vm4, %v4334_v10 }
 0x224   : > { %4056 = vmatprep.mubr.msk.bf16.mxu0 %vm1146_vm4, %v4335_v11 }
 0x22b   : > { %4057 = vmatmul.mubr.msk.bf16.gmra.mrb[52].mxu0 %vm1146_vm4, %v4336_v12 }
 0x22c   : > { %4082 = vmatprep.mubr.msk.bf16.mxu0 %vm5840_vm3, %v4821_v13 }
 0x233   : > { %4083 = vmatmul.mubr.msk.bf16.vlgmr.msra.gmra.mrb[56].mxu0 %vm5840_vm3, %v4826_v18 }
 0x234   : > { %4086 = vmatprep.mubr.msk.bf16.mxu0 %vm5840_vm3, %v4828_v19 }
 0x23b   : > { %4087 = vmatmul.mubr.msk.bf16.gmra.mrb[60].mxu0 %vm5840_vm3, %v4834_v20 }
 0x23c   : > { %4090 = vmatprep.mubr.msk.bf16.mxu0 %vm5840_vm3, %v4836_v21 }
 0x243   : > { %4091 = vmatmul.mubr.msk.bf16.gmra.mrb[64].mxu0 %vm5840_vm3, %v4842_v22 }
 0x244   : > { %4094 = vmatprep.mubr.msk.bf16.mxu0 %vm5840_vm3, %v4844_v23 }
 0x24b   : > { %4095 = vmatmul.mubr.msk.bf16.gmra.mrb[68].mxu0 %vm5840_vm3, %v4853_v24 }
 0x2c6   : > { %v4002_v31 = vpop.f32.mrb[24].mxu0 }
 0x2c7   : > { %v852_v32 = vadd.f32 %v4002_v31, %v777_v30  ;;  %v843_v33 = vpop.f32.mrb[25].mxu0 }
 0x2c8   : > { %v844_v34 = vadd.f32 %v843_v33, %v777_v30  ;;  %v4003_v35 = vpop.f32.mrb[26].mxu0  ;;  %v4879_v33 = vrot.slane %v4740_v16, %v1080_v17 }
 0x2c9   : > { %v855_v36 = vadd.f32 %v4003_v35, %v777_v30  ;;  %v846_v37 = vpop.f32.mrb[27].mxu0  ;;  %v908_v39 = vmax.f32 %v852_v32, 0.0 }
 0x2ca   : > { %v847_v38 = vadd.f32 %v846_v37, %v777_v30  ;;  %v906_v41 = vmax.f32 %v844_v34, 0.0 }
 0x2cb   : > { %v909_v40 = vmax.f32 %v855_v36, 0.0 }
 0x2cc   : > { %v907_v42 = vmax.f32 %v847_v38, 0.0 }
 0x2cd   : > { %v926_v43 = vpack.c.bf16 %v909_v40, %v908_v39 }
 0x2ce   : > { %v925_v44 = vpack.c.bf16 %v907_v42, %v906_v41  ;;  %v4006_v45 = vpop.f32.mrb[28].mxu0 }
 0x2cf   : > { %v868_v46 = vadd.f32 %v4006_v45, %v777_v30  ;;  %v859_v47 = vpop.f32.mrb[29].mxu0 }
 0x2d0   : > { %v860_v49 = vadd.f32 %v859_v47, %v777_v30  ;;  %v4007_v50 = vpop.f32.mrb[30].mxu0  ;;  %4020 = vmatprep.mubr.msk.bf16.mxu1 %vm638_vm2, %v925_v44 }
 0x2d1   : > { %v871_v51 = vadd.f32 %v4007_v50, %v777_v30  ;;  %v862_v52 = vpop.f32.mrb[31].mxu0  ;;  %4021 = vmatmul.mubr.msk.bf16.vlgmr.msra.gmra.mrb[8].mxu1 %vm638_vm2, %v926_v43  ;;  %v912_v54 = vmax.f32 %v868_v46, 0.0 }
 0x2d2   : > { %v863_v53 = vadd.f32 %v862_v52, %v777_v30  ;;  %4061 = vmatpush3.bf16.msra.mxu1 %v4339_v27  ;;  %v910_v56 = vmax.f32 %v860_v49, 0.0 }
 0x2d3   : > { %v913_v55 = vmax.f32 %v871_v51, 0.0  ;;  %4062 = vmatprep.subr.bf16.mxu1 %v4340_v48 }
 0x2d4   : > { %v911_v57 = vmax.f32 %v863_v53, 0.0 }
 0x2d5   : > { %v928_v58 = vpack.c.bf16 %v913_v55, %v912_v54 }
 0x2d6   : > { %v927_v59 = vpack.c.bf16 %v911_v57, %v910_v56  ;;  %4063 = vmatpush3.bf16.msra.mxu1 %v4340_v48  ;;  %v4010_v60 = vpop.f32.mrb[32].mxu0 }
 0x2d7   : > { %v884_v61 = vadd.f32 %v4010_v60, %v777_v30  ;;  %4098 = vmatprep.subr.bf16.mxu1 %v4821_v13  ;;  %v875_v62 = vpop.f32.mrb[33].mxu0 }
 0x2d8   : > { %v876_v63 = vadd.f32 %v875_v62, %v777_v30  ;;  %v4011_v0 = vpop.f32.mrb[34].mxu0  ;;  %4024 = vmatprep.mubr.msk.bf16.mxu1 %vm638_vm2, %v927_v59 }
 0x2d9   : > { %v887_v1 = vadd.f32 %v4011_v0, %v777_v30  ;;  %v878_v2 = vpop.f32.mrb[35].mxu0  ;;  %4025 = vmatmul.mubr.msk.bf16.gmra.mrb[12].mxu1 %vm638_vm2, %v928_v58  ;;  %v916_v4 = vmax.f32 %v884_v61, 0.0 }
 0x2da   : > { %v879_v3 = vadd.f32 %v878_v2, %v777_v30  ;;  %v914_v6 = vmax.f32 %v876_v63, 0.0 }
 0x2db   : > { %v917_v5 = vmax.f32 %v887_v1, 0.0 }
 0x2dc   : > { %v915_v7 = vmax.f32 %v879_v3, 0.0 }
 0x2dd   : > { %v930_v8 = vpack.c.bf16 %v917_v5, %v916_v4 }
 0x2de   : > { %v929_v9 = vpack.c.bf16 %v915_v7, %v914_v6  ;;  %v4014_v10 = vpop.f32.mrb[36].mxu0 }
 0x2df   : > { %v900_v11 = vadd.f32 %v4014_v10, %v777_v30  ;;  %v891_v12 = vpop.f32.mrb[37].mxu0 }
 0x2e0   : > { %v892_v25 = vadd.f32 %v891_v12, %v777_v30  ;;  %v4015_v26 = vpop.f32.mrb[38].mxu0  ;;  %4028 = vmatprep.mubr.msk.bf16.mxu1 %vm638_vm2, %v929_v9 }
 0x2e1   : > { %v903_v27 = vadd.f32 %v4015_v26, %v777_v30  ;;  %v894_v28 = vpop.f32.mrb[39].mxu0  ;;  %4029 = vmatmul.mubr.msk.bf16.gmra.mrb[16].mxu1 %vm638_vm2, %v930_v8  ;;  %v920_v31 = vmax.f32 %v900_v11, 0.0 }
 0x2e2   : > { %v895_v29 = vadd.f32 %v894_v28, %v777_v30  ;;  %v918_v34 = vmax.f32 %v892_v25, 0.0 }
 0x2e3   : > { %v921_v32 = vmax.f32 %v903_v27, 0.0 }
 0x2e4   : > { %v919_v35 = vmax.f32 %v895_v29, 0.0 }
 0x2e5   : > { %v932_v36 = vpack.c.bf16 %v921_v32, %v920_v31 }
 0x2e6   : > { %v931_v37 = vpack.c.bf16 %v919_v35, %v918_v34  ;;  %v4046_v38 = vpop.f32.mrb[40].mxu0 }
 0x2e7   : > { %v1214_v39 = vadd.f32 %v4046_v38, %v4879_v33  ;;  %v1205_v40 = vpop.f32.mrb[41].mxu0 }
 0x2e8   : > { %v1206_v41 = vadd.f32 %v1205_v40, %v4879_v33  ;;  %4032 = vmatprep.mubr.msk.bf16.mxu1 %vm638_vm2, %v931_v37  ;;  %v4047_v42 = vpop.f32.mrb[42].mxu0 }
 0x2e9   : > { %v1217_v30 = vadd.f32 %v4047_v42, %v4879_v33  ;;  %4033 = vmatmul.mubr.msk.bf16.gmra.mrb[20].mxu1 %vm638_vm2, %v932_v36  ;;  %v1208_v43 = vpop.f32.mrb[43].mxu0  ;;  %v1270_v45 = vmax.f32 %v1214_v39, 0.0 }
 0x2ea   : > { %v1209_v44 = vadd.f32 %v1208_v43, %v4879_v33  ;;  %v1268_v47 = vmax.f32 %v1206_v41, 0.0 }
 0x2eb   : > { %v1271_v46 = vmax.f32 %v1217_v30, 0.0 }
 0x2ec   : > { %v1269_v48 = vmax.f32 %v1209_v44, 0.0 }
 0x2ed   : > { %v1289_v49 = vpack.c.bf16 %v1271_v46, %v1270_v45 }
 0x2ee   : > { %v1288_v50 = vpack.c.bf16 %v1269_v48, %v1268_v47  ;;  %v4050_v51 = vpop.f32.mrb[44].mxu0 }
 0x2ef   : > { %v1230_v52 = vadd.f32 %v4050_v51, %v4879_v33  ;;  %v1221_v53 = vpop.f32.mrb[45].mxu0 }
 0x2f0   : > { %v1222_v54 = vadd.f32 %v1221_v53, %v4879_v33  ;;  %v4051_v55 = vpop.f32.mrb[46].mxu0  ;;  %4064 = vmatprep.mubr.msk.bf16.mxu1 %vm456_vm0, %v1288_v50 }
 0x2f1   : > { %v1233_v56 = vadd.f32 %v4051_v55, %v4879_v33  ;;  %v1224_v57 = vpop.f32.mrb[47].mxu0  ;;  %4065 = vmatmul.mubr.msk.bf16.vlgmr.msra.gmra.mrb[24].mxu1 %vm456_vm0, %v1289_v49  ;;  %v1274_v59 = vmax.f32 %v1230_v52, 0.0 }
 0x2f2   : > { %v1225_v58 = vadd.f32 %v1224_v57, %v4879_v33  ;;  %4099 = vmatpush3.bf16.msra.mxu1 %v4821_v13  ;;  %v1272_v61 = vmax.f32 %v1222_v54, 0.0 }
 0x2f3   : > { %v1275_v60 = vmax.f32 %v1233_v56, 0.0  ;;  %4100 = vmatprep.subr.bf16.mxu1 %v4826_v18 }
 0x2f4   : > { %v1273_v62 = vmax.f32 %v1225_v58, 0.0 }
 0x2f5   : > { %v1291_v63 = vpack.c.bf16 %v1275_v60, %v1274_v59  ;;  %v935_v59 = vsub.s32 3, %v4732_v14 }
 0x2f6   : > { %v1290_v0 = vpack.c.bf16 %v1273_v62, %v1272_v61  ;;  %4101 = vmatpush3.bf16.msra.mxu1 %v4826_v18  ;;  %v4054_v1 = vpop.f32.mrb[48].mxu0 }
 0x2f7   : > { %v1246_v2 = vadd.f32 %v4054_v1, %v4879_v33  ;;  %4102 = vmatprep.subr.bf16.mxu1 %v4828_v19  ;;  %v1237_v3 = vpop.f32.mrb[49].mxu0  ;;  %v936_v62 = vrot.slane %v4740_v16, %v935_v59 }
 0x2f8   : > { %v1238_v4 = vadd.f32 %v1237_v3, %v4879_v33  ;;  %v4055_v5 = vpop.f32.mrb[50].mxu0  ;;  %4068 = vmatprep.mubr.msk.bf16.mxu1 %vm456_vm0, %v1290_v0 }
 0x2f9   : > { %v1249_v13 = vadd.f32 %v4055_v5, %v4879_v33  ;;  %v1240_v6 = vpop.f32.mrb[51].mxu0  ;;  %4069 = vmatmul.mubr.msk.bf16.gmra.mrb[28].mxu1 %vm456_vm0, %v1291_v63  ;;  %v1278_v18 = vmax.f32 %v1246_v2, 0.0 }
 0x2fa   : > { %v1241_v7 = vadd.f32 %v1240_v6, %v4879_v33  ;;  %4103 = vmatpush3.bf16.msra.mxu1 %v4828_v19  ;;  %v1276_v9 = vmax.f32 %v1238_v4, 0.0 }
 0x2fb   : > { %v1279_v8 = vmax.f32 %v1249_v13, 0.0  ;;  %4104 = vmatprep.subr.bf16.mxu1 %v4834_v20 }
 0x2fc   : > { %v1277_v10 = vmax.f32 %v1241_v7, 0.0 }
 0x2fd   : > { %v1293_v11 = vpack.c.bf16 %v1279_v8, %v1278_v18  ;;  %v358_v18 = vld [vmem:[%s4680_s10 + $0x48] sm:$0xff] }
 0x2fe   : > { %v1292_v12 = vpack.c.bf16 %v1277_v10, %v1276_v9  ;;  %4105 = vmatpush3.bf16.msra.mxu1 %v4834_v20  ;;  %v4058_v17 = vpop.f32.mrb[52].mxu0 }
 0x2ff   : > { %v1262_v25 = vadd.f32 %v4058_v17, %v4879_v33  ;;  %4106 = vmatprep.subr.bf16.mxu1 %v4836_v21  ;;  %v1253_v26 = vpop.f32.mrb[53].mxu0 }
 0x300   : > { %v1254_v27 = vadd.f32 %v1253_v26, %v4879_v33  ;;  %v4059_v28 = vpop.f32.mrb[54].mxu0  ;;  %4072 = vmatprep.mubr.msk.bf16.mxu1 %vm456_vm0, %v1292_v12 }
 0x301   : > { %v1265_v19 = vadd.f32 %v4059_v28, %v4879_v33  ;;  %v1256_v29 = vpop.f32.mrb[55].mxu0  ;;  %4073 = vmatmul.mubr.msk.bf16.gmra.mrb[32].mxu1 %vm456_vm0, %v1293_v11  ;;  %v1282_v20 = vmax.f32 %v1262_v25, 0.0 }
 0x302   : > { %v1257_v31 = vadd.f32 %v1256_v29, %v4879_v33  ;;  %4107 = vmatpush3.bf16.msra.mxu1 %v4836_v21  ;;  %v1280_v34 = vmax.f32 %v1254_v27, 0.0  ;;  %v356_v29 = vld [vmem:[%s4680_s10 + $0x38] sm:$0xff] }
 0x303   : > { %v1283_v32 = vmax.f32 %v1265_v19, 0.0  ;;  %4108 = vmatprep.subr.bf16.mxu1 %v4842_v22 }
 0x304   : > { %v1281_v35 = vmax.f32 %v1257_v31, 0.0 }
 0x305   : > { %v1295_v36 = vpack.c.bf16 %v1283_v32, %v1282_v20 }
 0x306   : > { %v1294_v37 = vpack.c.bf16 %v1281_v35, %v1280_v34  ;;  %4109 = vmatpush3.bf16.msra.mxu1 %v4842_v22  ;;  %v4084_v38 = vpop.f32.mrb[56].mxu0 }
 0x307   : > { %4110 = vmatprep.subr.bf16.mxu1 %v4844_v23  ;;  %v1547_v39 = vpop.f32.mrb[57].mxu0 }
 0x308   : > { %1626 = vrot.lane.b32.xlu0 %v1547_v39, %s4582_s29  ;;  %4076 = vmatprep.mubr.msk.bf16.mxu1 %vm456_vm0, %v1294_v37  ;;  %v4085_v21 = vpop.f32.mrb[58].mxu0 }
 0x309   : > { %1632 = vrot.lane.b32.xlu1 %v4085_v21, %s4582_s29  ;;  %4077 = vmatmul.mubr.msk.bf16.gmra.mrb[36].mxu1 %vm456_vm0, %v1295_v36  ;;  %v1550_v33 = vpop.f32.mrb[59].mxu0 }
 0x30a   : > { %4111 = vmatpush3.bf16.msra.mxu1 %v4844_v23 }
 0x30b   : > { %4112 = vmatprep.subr.bf16.mxu1 %v4853_v24 }
 0x30c   : > { %1630 = vrot.lane.b32.xlu0 %v4084_v38, %s4582_s29 }
 0x30d   : > { %1628 = vrot.lane.b32.xlu1 %v1550_v33, %s4582_s29 }
 0x30e   : > { %4113 = vmatpush3.bf16.msra.mxu1 %v4853_v24  ;;  %v4088_v22 = vpop.f32.mrb[60].mxu0 }
 0x30f   : > { %v1563_v40 = vpop.f32.mrb[61].mxu0 }
 0x310   : > { %1634 = vrot.lane.b32.xlu0 %v1563_v40, %s4582_s29  ;;  %v4089_v41 = vpop.f32.mrb[62].mxu0 }
 0x311   : > { %1640 = vrot.lane.b32.xlu1 %v4089_v41, %s4582_s29  ;;  %v1566_v42 = vpop.f32.mrb[63].mxu0 }
 0x314   : > { %1638 = vrot.lane.b32.xlu0 %v4088_v22, %s4582_s29 }
 0x315   : > { %1636 = vrot.lane.b32.xlu1 %v1566_v42, %s4582_s29 }
 0x316   : > { %v4092_v23 = vpop.f32.mrb[64].mxu0 }
 0x317   : > { %v1579_v30 = vpop.f32.mrb[65].mxu0 }
 0x318   : > { %1642 = vrot.lane.b32.xlu0 %v1579_v30, %s4582_s29  ;;  %v4093_v43 = vpop.f32.mrb[66].mxu0 }
 0x319   : > { %1648 = vrot.lane.b32.xlu1 %v4093_v43, %s4582_s29  ;;  %v1582_v24 = vpop.f32.mrb[67].mxu0 }
 0x31c   : > { %1646 = vrot.lane.b32.xlu0 %v4092_v23, %s4582_s29 }
 0x31d   : > { %1644 = vrot.lane.b32.xlu1 %v1582_v24, %s4582_s29 }
 0x31e   : > { %v4096_v44 = vpop.f32.mrb[68].mxu0 }
 0x31f   : > { %v1595_v45 = vpop.f32.mrb[69].mxu0 }
 0x320   : > { %1650 = vrot.lane.b32.xlu0 %v1595_v45, %s4582_s29  ;;  %v4097_v46 = vpop.f32.mrb[70].mxu0 }
 0x321   : > { %1711 = vperm.xlu1 %4310, %v1550_v33   ;;  %v1598_v47 = vpop.f32.mrb[71].mxu0 }
 0x324   : > { %1654 = vrot.lane.b32.xlu0 %v4096_v44, %s4582_s29 }
 0x325   : > { %1715 = vperm.xlu1 %4310, %v4084_v38  }
 0x328   : > { %1707 = vperm.xlu0 %4309, %v1547_v39  }
 0x329   : > { %1723 = vperm.xlu1 %4310, %v1563_v40  }
 0x32c   : > { %1719 = vperm.xlu0 %4309, %v4085_v21  }
 0x32d   : > { %1731 = vperm.xlu1 %4310, %v4088_v22  }
 0x330   : > { %1727 = vperm.xlu0 %4309, %v1566_v42  }
 0x331   : > { %1739 = vperm.xlu1 %4310, %v1579_v30  }
 0x334   : > { %1735 = vperm.xlu0 %4309, %v4089_v41  }
 0x335   : > { %1747 = vperm.xlu1 %4310, %v4092_v23  }
 0x338   : > { %1743 = vperm.xlu0 %4309, %v1582_v24  }
 0x339   : > { %1763 = vperm.xlu1 %4310, %v4096_v44  }
 0x33c   : > { %1751 = vperm.xlu0 %4309, %v4093_v43  }
 0x33d   : > { %1755 = vperm.xlu1 %4310, %v1595_v45  }
 0x340   : > { %1767 = vperm.xlu0 %4309, %v4097_v46  }
 0x341   : > { %1656 = vrot.lane.b32.xlu1 %v4097_v46, %s4582_s29 }
 0x344   : > { %1759 = vperm.xlu0 %4309, %v1598_v47  }
 0x345   : > { %1652 = vrot.lane.b32.xlu1 %v1598_v47, %s4582_s29 }
 0x37a   : > { %v1627_v48 = vpop.permute.xlu0 %1626 }
 0x37b   : > { %v1633_v49 = vpop.permute.xlu1 %1632  ;;  %1674 = vxpose.xlu1.b32.start [1/16] (narrow) %v1627_v48, 8  ;;  %v5053_v48 = vld [vmem:[%s4680_s10 + $0x108] sm:$0xff] }
 0x37c   : > { %vm1855_vm8 = vcmp.gt.f32.partialorder %v5053_v48, 0.0 }
 0x37e   : > { %v1631_v51 = vpop.permute.xlu0 %1630 }
 0x37f   : > { %v1629_v50 = vpop.permute.xlu1 %1628 }
 0x380   : > { %1675 = vxpose.xlu1.b32.cont [2/16] (narrow) %v1629_v50, 8 }
 0x382   : > { %v1635_v53 = vpop.permute.xlu0 %1634 }
 0x383   : > { %v1641_v52 = vpop.permute.xlu1 %1640 }
 0x384   : > { %1676 = vxpose.xlu1.b32.cont [3/16] (narrow) %v1631_v51, 8 }
 0x386   : > { %v1639_v55 = vpop.permute.xlu0 %1638 }
 0x387   : > { %v1637_v54 = vpop.permute.xlu1 %1636 }
 0x388   : > { %1677 = vxpose.xlu1.b32.cont [4/16] (narrow) %v1633_v49, 8 }
 0x38a   : > { %v1643_v57 = vpop.permute.xlu0 %1642 }
 0x38b   : > { %v1649_v56 = vpop.permute.xlu1 %1648 }
 0x38c   : > { %1678 = vxpose.xlu1.b32.cont [5/16] (narrow) %v1635_v53, 8 }
 0x38e   : > { %v1647_v61 = vpop.permute.xlu0 %1646 }
 0x38f   : > { %v1645_v58 = vpop.permute.xlu1 %1644 }
 0x390   : > { %1679 = vxpose.xlu1.b32.cont [6/16] (narrow) %v1637_v54, 8 }
 0x392   : > { %v1651_v8 = vpop.permute.xlu0 %1650 }
 0x394   : > { %1680 = vxpose.xlu1.b32.cont [7/16] (narrow) %v1639_v55, 8 }
 0x396   : > { %v1655_v55 = vpop.permute.xlu0 %1654 }
 0x398   : > { %1681 = vxpose.xlu1.b32.cont [8/16] (narrow) %v1641_v52, 8 }
 0x39c   : > { %1682 = vxpose.xlu1.b32.cont [9/16] (narrow) %v1643_v57, 8 }
 0x3a0   : > { %v4939_v60 = vpop.permute.xlu1 %1711  ;;  %1683 = vxpose.xlu1.b32.cont [10/16] (narrow) %v1645_v58, 8 }
 0x3a4   : > { %v4022_v63 = vpop.f32.mrb[8].mxu1  ;;  %v4942_v0 = vpop.permute.xlu1 %1715  ;;  %1684 = vxpose.xlu1.b32.cont [11/16] (narrow) %v1647_v61, 8 }
 0x3a5   : > { %v1007_v1 = vpop.f32.mrb[9].mxu1  ;;  %v4944_v3 = vadd.f32 %v4022_v63, %v936_v62 }
 0x3a6   : > { %v4023_v2 = vpop.f32.mrb[10].mxu1  ;;  %v4948_v13 = vadd.f32 %v1007_v1, %v936_v62 }
 0x3a7   : > { %5856 = vst [vmem:[#allocation8_spill] sm:$0xff] %v4944_v3  ;;  %v4946_v4 = vadd.f32 %v4023_v2, %v936_v62  ;;  %v1010_v5 = vpop.f32.mrb[11].mxu1 }
 0x3a8   : > { %5858 = vst [vmem:[#allocation10_spill] sm:$0xff] %v4948_v13  ;;  %v4950_v6 = vadd.f32 %v1010_v5, %v936_v62  ;;  %v4952_v7 = vpop.permute.xlu1 %1723  ;;  %1685 = vxpose.xlu1.b32.cont [12/16] (narrow) %v1649_v56, 8 }
 0x3a9   : > { %5857 = vst [vmem:[#allocation9_spill] sm:$0xff] %v4946_v4 }
 0x3aa   : > { %5859 = vst [vmem:[#allocation11_spill] sm:$0xff] %v4950_v6 }
 0x3ac   : > { %v4026_v9 = vpop.f32.mrb[12].mxu1  ;;  %v4958_v10 = vpop.permute.xlu1 %1731  ;;  %1686 = vxpose.xlu1.b32.cont [13/16] (narrow) %v1651_v8, 8 }
 0x3ad   : > { %v1023_v11 = vpop.f32.mrb[13].mxu1  ;;  %v4960_v17 = vadd.f32 %v4026_v9, %v936_v62 }
 0x3ae   : > { %v4027_v12 = vpop.f32.mrb[14].mxu1  ;;  %v4964_v27 = vadd.f32 %v1023_v11, %v936_v62  ;;  %v1708_v11 = vpop.permute.xlu0 %1707 }
 0x3af   : > { %5860 = vst [vmem:[#allocation12_spill] sm:$0xff] %v4960_v17  ;;  %v4962_v25 = vadd.f32 %v4027_v12, %v936_v62  ;;  %v1026_v26 = vpop.f32.mrb[15].mxu1 }
 0x3b0   : > { %5862 = vst [vmem:[#allocation14_spill] sm:$0xff] %v4964_v27  ;;  %v4966_v28 = vadd.f32 %v1026_v26, %v936_v62  ;;  %v4968_v19 = vpop.permute.xlu1 %1739 }
 0x3b1   : > { %5861 = vst [vmem:[#allocation13_spill] sm:$0xff] %v4962_v25 }
 0x3b2   : > { %5863 = vst [vmem:[#allocation15_spill] sm:$0xff] %v4966_v28 }
 0x3b4   : > { %v4030_v20 = vpop.f32.mrb[16].mxu1  ;;  %v4974_v32 = vpop.permute.xlu1 %1747 }
 0x3b5   : > { %v1039_v34 = vpop.f32.mrb[17].mxu1  ;;  %v4976_v36 = vadd.f32 %v4030_v20, %v936_v62  ;;  %v349_v20 = vld [vmem:[%s4680_s10] sm:$0xff] }
 0x3b6   : > { %v4031_v35 = vpop.f32.mrb[18].mxu1  ;;  %v4980_v39 = vadd.f32 %v1039_v34, %v936_v62  ;;  %v350_v34 = vld [vmem:[%s4680_s10 + $0x8] sm:$0xff] }
 0x3b7   : > { %5864 = vst [vmem:[#allocation16_spill] sm:$0xff] %v4976_v36  ;;  %v4978_v37 = vadd.f32 %v4031_v35, %v936_v62  ;;  %v1042_v38 = vpop.f32.mrb[19].mxu1  ;;  %v5042_v35 = vld [vmem:[%s4680_s10 + $0x100] sm:$0xff] }
 0x3b8   : > { %5866 = vst [vmem:[#allocation18_spill] sm:$0xff] %v4980_v39  ;;  %v4982_v21 = vadd.f32 %v1042_v38, %v936_v62  ;;  %v4984_v33 = vpop.permute.xlu1 %1763  ;;  %vm1854_vm5 = vcmp.gt.f32.partialorder %v5042_v35, 0.0  ;;  %v362_v39 = vld [vmem:[%s4680_s10 + $0x68] sm:$0xff] }
 0x3b9   : > { %5865 = vst [vmem:[#allocation17_spill] sm:$0xff] %v4978_v37 }
 0x3ba   : > { %5867 = vst [vmem:[#allocation19_spill] sm:$0xff] %v4982_v21 }
 0x3bc   : > { %v4990_v41 = vpop.permute.xlu1 %1755  ;;  %v4034_v42 = vpop.f32.mrb[20].mxu1 }
 0x3bd   : > { %v1055_v23 = vpop.f32.mrb[21].mxu1  ;;  %v4992_v43 = vadd.f32 %v4034_v42, %v936_v62 }
 0x3be   : > { %v4035_v30 = vpop.f32.mrb[22].mxu1  ;;  %v4996_v45 = vadd.f32 %v1055_v23, %v936_v62 }
 0x3bf   : > { %5868 = vst [vmem:[#allocation20_spill] sm:$0xff] %v4992_v43  ;;  %v4994_v24 = vadd.f32 %v4035_v30, %v936_v62  ;;  %v1058_v44 = vpop.f32.mrb[23].mxu1  ;;  %v351_v30 = vld [vmem:[%s4680_s10 + $0x10] sm:$0xff] }
 0x3c0   : > { %5870 = vst [vmem:[#allocation22_spill] sm:$0xff] %v4996_v45  ;;  %v4998_v46 = vadd.f32 %v1058_v44, %v936_v62  ;;  %v1657_v47 = vpop.permute.xlu1 %1656  ;;  %v1720_v44 = vpop.permute.xlu0 %1719 }
 0x3c1   : > { %5869 = vst [vmem:[#allocation21_spill] sm:$0xff] %v4994_v24 }
 0x3c2   : > { %5871 = vst [vmem:[#allocation23_spill] sm:$0xff] %v4998_v46  ;;  %v360_v46 = vld [vmem:[%s4680_s10 + $0x58] sm:$0xff] }
 0x3c4   : > { %v1653_v50 = vpop.permute.xlu1 %1652  ;;  %v5004_v51 = vpop.f32.mrb[24].mxu1 }
 0x3c5   : > { %1687 = vxpose.xlu1.b32.cont [14/16] (narrow) %v1653_v50, 8  ;;  %v5006_v52 = vpop.f32.mrb[25].mxu1 }
 0x3c6   : > { %v5008_v53 = vpop.f32.mrb[26].mxu1 }
 0x3c7   : > { %v5010_v54 = vpop.f32.mrb[27].mxu1 }
 0x3c9   : > { %1688 = vxpose.xlu1.b32.cont [15/16] (narrow) %v1655_v55, 8 }
 0x3cc   : > { %v5012_v56 = vpop.f32.mrb[28].mxu1 }
 0x3cd   : > { %1689 = vxpose.xlu1.b32.end [16/16] (narrow) %v1657_v47, 8  ;;  %v5014_v57 = vpop.f32.mrb[29].mxu1 }
 0x3ce   : > { %v5016_v58 = vpop.f32.mrb[30].mxu1 }
 0x3cf   : > { %v5018_v59 = vpop.f32.mrb[31].mxu1 }
 0x3d4   : > { %v5020_v61 = vpop.f32.mrb[32].mxu1 }
 0x3d5   : > { %v5022_v62 = vpop.f32.mrb[33].mxu1 }
 0x3d6   : > { %v5024_v63 = vpop.f32.mrb[34].mxu1 }
 0x3d7   : > { %v5026_v1 = vpop.f32.mrb[35].mxu1 }
 0x3dc   : > { %v5028_v2 = vpop.f32.mrb[36].mxu1 }
 0x3dd   : > { %v5030_v5 = vpop.f32.mrb[37].mxu1 }
 0x3de   : > { %v5032_v8 = vpop.f32.mrb[38].mxu1 }
 0x3df   : > { %5872 = vst [vmem:[#allocation24_spill] sm:$0xff] %v5032_v8  ;;  %v5034_v9 = vpop.f32.mrb[39].mxu1 }
 0x3e0   : > { %5873 = vst [vmem:[#allocation25_spill] sm:$0xff] %v5034_v9 }
 0x411   : > { %v1690_v12 = vpop.trf.xlu1 }
 0x412   : > { %v5037_v26 = vrot.slane %v1690_v12, %v4735_v15 }
 0x414   : > { %v1774_v38 = vadd.f32 %v5037_v26, %v1708_v11  ;;  %v1775_v42 = vadd.f32 %v5037_v26, %v4939_v60  ;;  %v1776_v23 = vadd.f32 %v5037_v26, %v4942_v0  ;;  %v1777_v55 = vadd.f32 %v5037_v26, %v1720_v44  ;;  %v352_v60 = vld [vmem:[%s4680_s10 + $0x18] sm:$0xff]  ;;  %v1728_v44 = vpop.permute.xlu0 %1727 }
 0x416   : > { %v1790_v47 = vadd.f32 %v1774_v38, %v349_v20  ;;  %v1791_v50 = vadd.f32 %v1775_v42, %v350_v34  ;;  %v1792_v49 = vadd.f32 %v1776_v23, %v351_v30  ;;  %v5063_v34 = vld [vmem:[%s4680_s10 + $0x110] sm:$0xff]  ;;  %v1793_v42 = vadd.f32 %v1777_v55, %v352_v60  ;;  %v353_v30 = vld [vmem:[%s4680_s10 + $0x20] sm:$0xff] }
 0x417   : > { %v1778_v23 = vadd.f32 %v5037_v26, %v4952_v7  ;;  %vm1856_vm10 = vcmp.gt.f32.partialorder %v5063_v34, 0.0  ;;  %v1779_v7 = vadd.f32 %v5037_v26, %v1728_v44 }
 0x418   : > { %vm1806_vm6 = vcmp.gt.f32.partialorder %v1790_v47, 0.0  ;;  %v1822_v12 = vmul.f32 0.2, %v1790_v47  ;;  %v1823_v11 = vmul.f32 0.2, %v1791_v50  ;;  %vm1807_vm7 = vcmp.gt.f32.partialorder %v1791_v50, 0.0  ;;  %v1736_v44 = vpop.permute.xlu0 %1735 }
 0x419   : > { %v1824_v38 = vmul.f32 0.2, %v1792_v49  ;;  %vm1808_vm9 = vcmp.gt.f32.partialorder %v1792_v49, 0.0  ;;  %v1825_v55 = vmul.f32 0.2, %v1793_v42  ;;  %vm1809_vm11 = vcmp.gt.f32.partialorder %v1793_v42, 0.0 }
 0x41a   : > { %v1838_v22 = vsel %vm1806_vm6, %v1790_v47, %v1822_v12  ;;  %v1839_v20 = vsel %vm1807_vm7, %v1791_v50, %v1823_v11  ;;  %v5075_v50 = vld [vmem:[%s4680_s10 + $0x118] sm:$0xff]  ;;  %v1794_v12 = vadd.f32 %v1778_v23, %v353_v30  ;;  %v354_v11 = vld [vmem:[%s4680_s10 + $0x28] sm:$0xff]  ;;  %v1780_v23 = vadd.f32 %v5037_v26, %v4958_v10  ;;  %v355_v30 = vld [vmem:[%s4680_s10 + $0x30] sm:$0xff] }
 0x41b   : > { %v5058_v0 = vsel %vm1854_vm5, %v1838_v22, -1e+09  ;;  %v5070_v22 = vsel %vm1855_vm8, %v1839_v20, -1e+09  ;;  %v1840_v47 = vsel %vm1808_vm9, %v1792_v49, %v1824_v38  ;;  %vm1857_vm12 = vcmp.gt.f32.partialorder %v5075_v50, 0.0  ;;  %v5086_v49 = vld [vmem:[%s4680_s10 + $0x120] sm:$0xff] }
 0x41c   : > { %1886 = vmax.xlane.f32.xlu0 %v5058_v0  ;;  %v5081_v60 = vsel %vm1856_vm10, %v1840_v47, -1e+09  ;;  %v1841_v20 = vsel %vm1809_vm11, %v1793_v42, %v1825_v55  ;;  %v1826_v38 = vmul.f32 0.2, %v1794_v12  ;;  %v1795_v40 = vadd.f32 %v1779_v7, %v354_v11  ;;  %v5098_v55 = vld [vmem:[%s4680_s10 + $0x128] sm:$0xff] }
 0x41d   : > { %vm1810_vm13 = vcmp.gt.f32.partialorder %v1794_v12, 0.0  ;;  %v5093_v47 = vsel %vm1857_vm12, %v1841_v20, -1e+09  ;;  %vm1858_vm14 = vcmp.gt.f32.partialorder %v5086_v49, 0.0  ;;  %v1796_v11 = vadd.f32 %v1780_v23, %v355_v30  ;;  %v1744_v30 = vpop.permute.xlu0 %1743 }
 0x41e   : > { %v1842_v42 = vsel %vm1810_vm13, %v1794_v12, %v1826_v38  ;;  %v1827_v7 = vmul.f32 0.2, %v1795_v40  ;;  %v1781_v10 = vadd.f32 %v5037_v26, %v1736_v44  ;;  %vm1811_vm15 = vcmp.gt.f32.partialorder %v1795_v40, 0.0  ;;  %v5109_v12 = vld [vmem:[%s4680_s10 + $0x130] sm:$0xff]  ;;  %v357_v44 = vld [vmem:[%s4680_s10 + $0x40] sm:$0xff] }
 0x41f   : > { %v5104_v31 = vsel %vm1858_vm14, %v1842_v42, -1e+09  ;;  %vm1859_vm0 = vcmp.gt.f32.partialorder %v5098_v55, 0.0  ;;  %v1828_v38 = vmul.f32 0.2, %v1796_v11  ;;  %v1782_v23 = vadd.f32 %v5037_v26, %v4968_v19 }
 0x420   : > { %1888 = vmax.xlane.f32.xlu0 %v5070_v22  ;;  %v1843_v20 = vsel %vm1811_vm15, %v1795_v40, %v1827_v7  ;;  %v1797_v16 = vadd.f32 %v1781_v10, %v356_v29  ;;  %vm1812_vm1 = vcmp.gt.f32.partialorder %v1796_v11, 0.0  ;;  %vm1860_vm2 = vcmp.gt.f32.partialorder %v5109_v12, 0.0  ;;  %v5121_v7 = vld [vmem:[%s4680_s10 + $0x138] sm:$0xff] }
 0x421   : > { %v5116_v42 = vsel %vm1859_vm0, %v1843_v20, -1e+09  ;;  %v1844_v40 = vsel %vm1812_vm1, %v1796_v11, %v1828_v38  ;;  %v1798_v10 = vadd.f32 %v1782_v23, %v357_v44  ;;  %v1783_v19 = vadd.f32 %v5037_v26, %v1744_v30  ;;  %v1752_v43 = vpop.permute.xlu0 %1751  ;;  %v5132_v38 = vld [vmem:[%s4680_s10 + $0x140] sm:$0xff]  ;;  %v359_v44 = vld [vmem:[%s4680_s10 + $0x50] sm:$0xff] }
 0x422   : > { %v1829_v29 = vmul.f32 0.2, %v1797_v16  ;;  %vm1813_vm4 = vcmp.gt.f32.partialorder %v1797_v16, 0.0  ;;  %v5127_v20 = vsel %vm1860_vm2, %v1844_v40, -1e+09  ;;  %vm1861_vm6 = vcmp.gt.f32.partialorder %v5121_v7, 0.0 }
 0x423   : > { %v1830_v24 = vmul.f32 0.2, %v1798_v10  ;;  %v1799_v23 = vadd.f32 %v1783_v19, %v358_v18  ;;  %v1784_v30 = vadd.f32 %v5037_v26, %v4974_v32  ;;  %vm1814_vm7 = vcmp.gt.f32.partialorder %v1798_v10, 0.0 }
 0x424   : > { %1890 = vmax.xlane.f32.xlu0 %v5081_v60  ;;  %v1845_v11 = vsel %vm1813_vm4, %v1797_v16, %v1829_v29  ;;  %vm1862_vm9 = vcmp.gt.f32.partialorder %v5132_v38, 0.0  ;;  %v5144_v29 = vld [vmem:[%s4680_s10 + $0x148] sm:$0xff]  ;;  %v1785_v19 = vadd.f32 %v5037_v26, %v1752_v43  ;;  %v1786_v43 = vadd.f32 %v5037_v26, %v4990_v41 }
 0x425   : > { %v5139_v40 = vsel %vm1861_vm6, %v1845_v11, -1e+09  ;;  %v1846_v16 = vsel %vm1814_vm7, %v1798_v10, %v1830_v24  ;;  %v1831_v45 = vmul.f32 0.2, %v1799_v23  ;;  %v1800_v18 = vadd.f32 %v1784_v30, %v359_v44  ;;  %v1768_v32 = vpop.permute.xlu0 %1767  ;;  %v5155_v10 = vld [vmem:[%s4680_s10 + $0x150] sm:$0xff]  ;;  %v361_v44 = vld [vmem:[%s4680_s10 + $0x60] sm:$0xff] }
 0x426   : > { %vm1815_vm11 = vcmp.gt.f32.partialorder %v1799_v23, 0.0  ;;  %v5150_v11 = vsel %vm1862_vm9, %v1846_v16, -1e+09  ;;  %vm5853_vm13 = vcmp.gt.f32.partialorder %v5144_v29, 0.0  ;;  %v1801_v30 = vadd.f32 %v1785_v19, %v360_v46 }
 0x427   : > { %v1847_v24 = vsel %vm1815_vm11, %v1799_v23, %v1831_v45  ;;  %v1832_v36 = vmul.f32 0.2, %v1800_v18  ;;  %vm1816_vm15 = vcmp.gt.f32.partialorder %v1800_v18, 0.0  ;;  %vm5852_vm1 = vcmp.gt.f32.partialorder %v5155_v10, 0.0  ;;  %v5167_v23 = vld [vmem:[%s4680_s10 + $0x158] sm:$0xff] }
 0x428   : > { %1892 = vmax.xlane.f32.xlu0 %v5093_v47  ;;  %v5162_v16 = vsel %vm5853_vm13, %v1847_v24, -1e+09  ;;  %v1833_v46 = vmul.f32 0.2, %v1801_v30  ;;  %v1802_v19 = vadd.f32 %v1786_v43, %v361_v44  ;;  %vm1817_vm4 = vcmp.gt.f32.partialorder %v1801_v30, 0.0  ;;  %v363_v43 = vld [vmem:[%s4680_s10 + $0x70] sm:$0xff] }
 0x429   : > { %v1760_v37 = vpop.permute.xlu0 %1759  ;;  %v1848_v45 = vsel %vm1816_vm15, %v1800_v18, %v1832_v36  ;;  %vm5843_vm7 = vcmp.gt.f32.partialorder %v5167_v23, 0.0  ;;  %v5178_v36 = vld [vmem:[%s4680_s10 + $0x160] sm:$0xff]  ;;  %v1789_v25 = vadd.f32 %v5037_v26, %v1768_v32 }
 0x42a   : > { %v1787_v41 = vadd.f32 %v5037_v26, %v1760_v37  ;;  %v5173_v21 = vsel %vm5852_vm1, %v1848_v45, -1e+09  ;;  %v1849_v24 = vsel %vm1817_vm4, %v1801_v30, %v1833_v46  ;;  %v1834_v18 = vmul.f32 0.2, %v1802_v19 }
 0x42b   : > { %v1788_v37 = vadd.f32 %v5037_v26, %v4984_v33  ;;  %vm1818_vm11 = vcmp.gt.f32.partialorder %v1802_v19, 0.0  ;;  %v5185_v44 = vsel %vm5843_vm7, %v1849_v24, -1e+09  ;;  %vm5842_vm15 = vcmp.gt.f32.partialorder %v5178_v36, 0.0  ;;  %v364_v33 = vld [vmem:[%s4680_s10 + $0x78] sm:$0xff] }
 0x42c   : > { %1894 = vmax.xlane.f32.xlu0 %v5104_v31  ;;  %v1803_v17 = vadd.f32 %v1787_v41, %v362_v39  ;;  %v1850_v30 = vsel %vm1818_vm11, %v1802_v19, %v1834_v18  ;;  %v5191_v39 = vld [vmem:[%s4680_s10 + $0x168] sm:$0xff]  ;;  %v1805_v19 = vadd.f32 %v1789_v25, %v364_v33  ;;  %v5201_v18 = vld [vmem:[%s4680_s10 + $0x170] sm:$0xff] }
 0x42d   : > { %v1804_v46 = vadd.f32 %v1788_v37, %v363_v43  ;;  %v5196_v41 = vsel %vm5842_vm15, %v1850_v30, -1e+09  ;;  %vm5851_vm3 = vcmp.gt.f32.partialorder %v5191_v39, 0.0  ;;  %vm5850_vm15 = vcmp.gt.f32.partialorder %v5201_v18, 0.0  ;;  %v5210_v43 = vld [vmem:[%s4680_s10 + $0x178] sm:$0xff] }
 0x42e   : > { %v1835_v45 = vmul.f32 0.2, %v1803_v17  ;;  %vm1819_vm4 = vcmp.gt.f32.partialorder %v1803_v17, 0.0  ;;  %v1837_v37 = vmul.f32 0.2, %v1805_v19  ;;  %vm5849_vm7 = vcmp.gt.f32.partialorder %v5210_v43, 0.0 }
 0x42f   : > { %v1836_v27 = vmul.f32 0.2, %v1804_v46  ;;  %vm1820_vm11 = vcmp.gt.f32.partialorder %v1804_v46, 0.0 }
 0x430   : > { %1896 = vmax.xlane.f32.xlu0 %v5116_v42  ;;  %v1851_v24 = vsel %vm1819_vm4, %v1803_v17, %v1835_v45  ;;  %vm1821_vm4 = vcmp.gt.f32.partialorder %v1805_v19, 0.0 }
 0x431   : > { %v5205_v26 = vsel %vm5851_vm3, %v1851_v24, -1e+09  ;;  %v1852_v32 = vsel %vm1820_vm11, %v1804_v46, %v1836_v27  ;;  %v1853_v25 = vsel %vm1821_vm4, %v1805_v19, %v1837_v37  ;;  %vm5874_vm11 = vcmp.gt.f32.partialorder %v5167_v23, 0.0 }
 0x432   : > { %v5214_v17 = vsel %vm5850_vm15, %v1852_v32, -1e+09  ;;  %v5220_v30 = vsel %vm5849_vm7, %v1853_v25, -1e+09  ;;  %vm5875_vm4 = vcmp.gt.f32.partialorder %v5178_v36, 0.0 }
 0x434   : > { %1898 = vmax.xlane.f32.xlu0 %v5127_v20 }
 0x438   : > { %1900 = vmax.xlane.f32.xlu0 %v5139_v40 }
 0x43c   : > { %1902 = vmax.xlane.f32.xlu0 %v5150_v11 }
 0x440   : > { %1904 = vmax.xlane.f32.xlu0 %v5162_v16 }
 0x444   : > { %1906 = vmax.xlane.f32.xlu0 %v5173_v21 }
 0x448   : > { %1908 = vmax.xlane.f32.xlu0 %v5185_v44 }
 0x44c   : > { %1910 = vmax.xlane.f32.xlu0 %v5196_v41 }
 0x450   : > { %1912 = vmax.xlane.f32.xlu0 %v5205_v26 }
 0x454   : > { %1914 = vmax.xlane.f32.xlu0 %v5214_v17 }
 0x458   : > { %1916 = vmax.xlane.f32.xlu0 %v5220_v30 }
 0x4a9   : > { %v1887_v27 = vpop.xlane.xlu0 %1886 }
 0x4aa   : > { %v1918_v45 = vsub.f32 %v5058_v0, %v1887_v27 }
 0x4ac   : > { %v1934_v46 = vmul.f32 1.442695, %v1918_v45 }
 0x4ad   : > { %v1889_v33 = vpop.xlane.xlu0 %1888 }
 0x4ae   : > { %4345 = vpow2.f32 %v1934_v46  ;;  %v1919_v24 = vsub.f32 %v5070_v22, %v1889_v33 }
 0x4b0   : > { %v1936_v32 = vmul.f32 1.442695, %v1919_v24 }
 0x4b1   : > { %v1891_v28 = vpop.xlane.xlu0 %1890 }
 0x4b2   : > { %4347 = vpow2.f32 %v1936_v32  ;;  %v1920_v19 = vsub.f32 %v5081_v60, %v1891_v28 }
 0x4b4   : > { %v1938_v37 = vmul.f32 1.442695, %v1920_v19 }
 0x4b5   : > { %v1893_v3 = vpop.xlane.xlu0 %1892 }
 0x4b6   : > { %4349 = vpow2.f32 %v1938_v37  ;;  %v1921_v25 = vsub.f32 %v5093_v47, %v1893_v3 }
 0x4b8   : > { %v4346_v4 = vpop.eup %4345  ;;  %v1940_v13 = vmul.f32 1.442695, %v1921_v25 }
 0x4b9   : > { %v1895_v6 = vpop.xlane.xlu0 %1894  ;;  %v5229_v0 = vsel %vm1854_vm5, %v4346_v4, 0.0 }
 0x4ba   : > { %4351 = vpow2.f32 %v1940_v13  ;;  %v1922_v22 = vsub.f32 %v5104_v31, %v1895_v6  ;;  %1982 = vadd.xlane.f32.xlu0 %v5229_v0 }
 0x4bc   : > { %v4348_v27 = vpop.eup %4347  ;;  %v1942_v45 = vmul.f32 1.442695, %v1922_v22 }
 0x4bd   : > { %v1897_v28 = vpop.xlane.xlu0 %1896  ;;  %v5235_v60 = vsel %vm1855_vm8, %v4348_v27, 0.0 }
 0x4be   : > { %4353 = vpow2.f32 %v1942_v45  ;;  %v1923_v3 = vsub.f32 %v5116_v42, %v1897_v28  ;;  %1984 = vadd.xlane.f32.xlu0 %v5235_v60 }
 0x4c0   : > { %v4350_v47 = vpop.eup %4349  ;;  %v1944_v4 = vmul.f32 1.442695, %v1923_v3 }
 0x4c1   : > { %v1899_v46 = vpop.xlane.xlu0 %1898  ;;  %v5241_v13 = vsel %vm1856_vm10, %v4350_v47, 0.0 }
 0x4c2   : > { %4355 = vpow2.f32 %v1944_v4  ;;  %v1924_v6 = vsub.f32 %v5127_v20, %v1899_v46  ;;  %1986 = vadd.xlane.f32.xlu1 %v5241_v13 }
 0x4c4   : > { %v4352_v31 = vpop.eup %4351  ;;  %v1946_v33 = vmul.f32 1.442695, %v1924_v6 }
 0x4c5   : > { %v1901_v24 = vpop.xlane.xlu0 %1900  ;;  %v5247_v42 = vsel %vm1857_vm12, %v4352_v31, 0.0 }
 0x4c6   : > { %4357 = vpow2.f32 %v1946_v33  ;;  %v1925_v32 = vsub.f32 %v5139_v40, %v1901_v24  ;;  %1988 = vadd.xlane.f32.xlu0 %v5247_v42 }
 0x4c8   : > { %v4354_v19 = vpop.eup %4353  ;;  %v1948_v37 = vmul.f32 1.442695, %v1925_v32 }
 0x4c9   : > { %v1903_v25 = vpop.xlane.xlu0 %1902  ;;  %v5253_v20 = vsel %vm1858_vm14, %v4354_v19, 0.0 }
 0x4ca   : > { %4359 = vpow2.f32 %v1948_v37  ;;  %v1926_v22 = vsub.f32 %v5150_v11, %v1903_v25  ;;  %1990 = vadd.xlane.f32.xlu0 %v5253_v20 }
 0x4cc   : > { %v4356_v27 = vpop.eup %4355  ;;  %v1950_v45 = vmul.f32 1.442695, %v1926_v22 }
 0x4cd   : > { %v1905_v28 = vpop.xlane.xlu0 %1904  ;;  %v5259_v40 = vsel %vm1859_vm0, %v4356_v27, 0.0 }
 0x4ce   : > { %4361 = vpow2.f32 %v1950_v45  ;;  %v1927_v3 = vsub.f32 %v5162_v16, %v1905_v28  ;;  %1992 = vadd.xlane.f32.xlu0 %v5259_v40 }
 0x4d0   : > { %v4358_v47 = vpop.eup %4357  ;;  %v1952_v4 = vmul.f32 1.442695, %v1927_v3 }
 0x4d1   : > { %v1907_v46 = vpop.xlane.xlu0 %1906  ;;  %v5265_v11 = vsel %vm1860_vm2, %v4358_v47, 0.0 }
 0x4d2   : > { %4363 = vpow2.f32 %v1952_v4  ;;  %v1928_v6 = vsub.f32 %v5173_v21, %v1907_v46  ;;  %1994 = vadd.xlane.f32.xlu0 %v5265_v11 }
 0x4d4   : > { %v4360_v31 = vpop.eup %4359  ;;  %v1954_v33 = vmul.f32 1.442695, %v1928_v6 }
 0x4d5   : > { %v1909_v24 = vpop.xlane.xlu0 %1908  ;;  %v5271_v16 = vsel %vm1861_vm6, %v4360_v31, 0.0 }
 0x4d6   : > { %4365 = vpow2.f32 %v1954_v33  ;;  %v1929_v32 = vsub.f32 %v5185_v44, %v1909_v24  ;;  %1996 = vadd.xlane.f32.xlu0 %v5271_v16 }
 0x4d8   : > { %v4362_v19 = vpop.eup %4361  ;;  %v1956_v37 = vmul.f32 1.442695, %v1929_v32 }
 0x4d9   : > { %v1911_v25 = vpop.xlane.xlu0 %1910  ;;  %v5277_v21 = vsel %vm1862_vm9, %v4362_v19, 0.0 }
 0x4da   : > { %4367 = vpow2.f32 %v1956_v37  ;;  %v1930_v22 = vsub.f32 %v5196_v41, %v1911_v25  ;;  %1998 = vadd.xlane.f32.xlu0 %v5277_v21 }
 0x4dc   : > { %v4364_v27 = vpop.eup %4363  ;;  %v1958_v45 = vmul.f32 1.442695, %v1930_v22 }
 0x4dd   : > { %v1913_v28 = vpop.xlane.xlu0 %1912  ;;  %v5283_v44 = vsel %vm5853_vm13, %v4364_v27, 0.0 }
 0x4de   : > { %4369 = vpow2.f32 %v1958_v45  ;;  %v1931_v3 = vsub.f32 %v5205_v26, %v1913_v28  ;;  %2000 = vadd.xlane.f32.xlu0 %v5283_v44 }
 0x4e0   : > { %v4366_v47 = vpop.eup %4365  ;;  %v1960_v4 = vmul.f32 1.442695, %v1931_v3  ;;  %v4341_v3 = vld [vmem:[%s5827_s3 + $0x60] sm:$0xff]  }
 0x4e1   : > { %v1915_v46 = vpop.xlane.xlu0 %1914  ;;  %v5289_v41 = vsel %vm5852_vm1, %v4366_v47, 0.0  ;;  %4130 = vmatprep.subr.bf16.mxu0 %v4341_v3 }
 0x4e2   : > { %4371 = vpow2.f32 %v1960_v4  ;;  %v1932_v6 = vsub.f32 %v5214_v17, %v1915_v46  ;;  %2002 = vadd.xlane.f32.xlu0 %v5289_v41  ;;  %4131 = vmatpush3.bf16.msra.mxu0 %v4341_v3 }
 0x4e4   : > { %v4368_v31 = vpop.eup %4367  ;;  %v1962_v33 = vmul.f32 1.442695, %v1932_v6 }
 0x4e5   : > { %v1917_v24 = vpop.xlane.xlu0 %1916  ;;  %v5295_v26 = vsel %vm5874_vm11, %v4368_v31, 0.0 }
 0x4e6   : > { %4373 = vpow2.f32 %v1962_v33  ;;  %v1933_v32 = vsub.f32 %v5220_v30, %v1917_v24  ;;  %2004 = vadd.xlane.f32.xlu0 %v5295_v26 }
 0x4e8   : > { %v4370_v19 = vpop.eup %4369  ;;  %v1964_v37 = vmul.f32 1.442695, %v1933_v32 }
 0x4e9   : > { %v5301_v25 = vsel %vm5875_vm4, %v4370_v19, 0.0 }
 0x4ea   : > { %4375 = vpow2.f32 %v1964_v37  ;;  %2006 = vadd.xlane.f32.xlu0 %v5301_v25 }
 0x4ec   : > { %v4372_v17 = vpop.eup %4371 }
 0x4ed   : > { %v5306_v22 = vsel %vm5851_vm3, %v4372_v17, 0.0  ;;  %vm5876_vm3 = vcmask 130048  }
 0x4ee   : > { %2008 = vadd.xlane.f32.xlu1 %v5306_v22  ;;  %vm5881_vm13 = vmmov %vm5876_vm3 }
 0x4f0   : > { %v4374_v27 = vpop.eup %4373 }
 0x4f1   : > { %v5311_v30 = vsel %vm5850_vm15, %v4374_v27, 0.0 }
 0x4f2   : > { %2010 = vadd.xlane.f32.xlu0 %v5311_v30 }
 0x4f4   : > { %v4376_v45 = vpop.eup %4375 }
 0x4f5   : > { %v5316_v28 = vsel %vm5849_vm7, %v4376_v45, 0.0 }
 0x4f6   : > { %2012 = vadd.xlane.f32.xlu1 %v5316_v28 }
 0x547   : > { %v1983_v47 = vpop.xlane.xlu0 %1982 }
 0x548   : > { %v2014_v4 = vadd.f32 1e-09, %v1983_v47 }
 0x54a   : > { %4377 = vrcp.f32 %v2014_v4 }
 0x54b   : > { %v1985_v46 = vpop.xlane.xlu0 %1984 }
 0x54c   : > { %v2015_v6 = vadd.f32 1e-09, %v1985_v46 }
 0x54e   : > { %4379 = vrcp.f32 %v2015_v6 }
 0x54f   : > { %v1987_v31 = vpop.xlane.xlu1 %1986 }
 0x550   : > { %v2016_v33 = vadd.f32 1e-09, %v1987_v31 }
 0x552   : > { %4381 = vrcp.f32 %v2016_v33 }
 0x553   : > { %v1989_v24 = vpop.xlane.xlu0 %1988 }
 0x554   : > { %v2017_v32 = vadd.f32 1e-09, %v1989_v24  ;;  %v4378_v19 = vpop.eup %4377 }
 0x555   : > { %v2046_v45 = vmul.f32 %v4378_v19, %v5229_v0 }
 0x556   : > { %4383 = vrcp.f32 %v2017_v32 }
 0x557   : > { %v1991_v37 = vpop.xlane.xlu0 %1990 }
 0x558   : > { %v4380_v17 = vpop.eup %4379  ;;  %v2018_v27 = vadd.f32 1e-09, %v1991_v37 }
 0x559   : > { %v2047_v3 = vmul.f32 %v4380_v17, %v5235_v60 }
 0x55a   : > { %4385 = vrcp.f32 %v2018_v27 }
 0x55b   : > { %v1993_v9 = vpop.xlane.xlu0 %1992  ;;  %v2062_v47 = vpack.c.bf16 %v2047_v3, %v2046_v45 }
 0x55c   : > { %v2019_v4 = vadd.f32 1e-09, %v1993_v9  ;;  %v4382_v46 = vpop.eup %4381 }
 0x55d   : > { %4114 = vmatprep.mubr.bf16.mxu1 %v2062_v47  ;;  %v2048_v24 = vmul.f32 %v4382_v46, %v5241_v13 }
 0x55e   : > { %4387 = vrcp.f32 %v2019_v4 }
 0x55f   : > { %v1995_v6 = vpop.xlane.xlu0 %1994 }
 0x560   : > { %v4384_v31 = vpop.eup %4383  ;;  %v2020_v33 = vadd.f32 1e-09, %v1995_v6 }
 0x561   : > { %v2049_v32 = vmul.f32 %v4384_v31, %v5247_v42 }
 0x562   : > { %4389 = vrcp.f32 %v2020_v33 }
 0x563   : > { %v1997_v8 = vpop.xlane.xlu0 %1996  ;;  %v2063_v37 = vpack.c.bf16 %v2049_v32, %v2048_v24 }
 0x564   : > { %v2021_v0 = vadd.f32 1e-09, %v1997_v8  ;;  %v4386_v60 = vpop.eup %4385 }
 0x565   : > { %4115 = vmatmul.mubr.bf16.vlgmr.msra.gmra.mrb[40].mxu1 %v2063_v37  ;;  %v2050_v27 = vmul.f32 %v4386_v60, %v5253_v20 }
 0x566   : > { %4391 = vrcp.f32 %v2021_v0 }
 0x567   : > { %v1999_v19 = vpop.xlane.xlu0 %1998 }
 0x568   : > { %v4388_v17 = vpop.eup %4387  ;;  %v2022_v9 = vadd.f32 1e-09, %v1999_v19 }
 0x569   : > { %v2051_v45 = vmul.f32 %v4388_v17, %v5259_v40 }
 0x56a   : > { %4393 = vrcp.f32 %v2022_v9 }
 0x56b   : > { %v2001_v3 = vpop.xlane.xlu0 %2000  ;;  %v2064_v47 = vpack.c.bf16 %v2051_v45, %v2050_v27 }
 0x56c   : > { %v2023_v13 = vadd.f32 1e-09, %v2001_v3  ;;  %v4390_v42 = vpop.eup %4389 }
 0x56d   : > { %4118 = vmatprep.mubr.bf16.mxu1 %v2064_v47  ;;  %v2052_v6 = vmul.f32 %v4390_v42, %v5265_v11 }
 0x56e   : > { %4395 = vrcp.f32 %v2023_v13 }
 0x56f   : > { %v2003_v4 = vpop.xlane.xlu0 %2002 }
 0x570   : > { %v4392_v46 = vpop.eup %4391  ;;  %v2024_v8 = vadd.f32 1e-09, %v2003_v4 }
 0x571   : > { %v2053_v31 = vmul.f32 %v4392_v46, %v5271_v16 }
 0x572   : > { %4397 = vrcp.f32 %v2024_v8 }
 0x573   : > { %v2005_v33 = vpop.xlane.xlu0 %2004  ;;  %v2065_v24 = vpack.c.bf16 %v2053_v31, %v2052_v6 }
 0x574   : > { %v2025_v20 = vadd.f32 1e-09, %v2005_v33  ;;  %v4394_v40 = vpop.eup %4393 }
 0x575   : > { %4119 = vmatmul.mubr.bf16.gmra.mrb[44].mxu1 %v2065_v24  ;;  %v2054_v60 = vmul.f32 %v4394_v40, %v5277_v21  ;;  %v4342_v40 = vld [vmem:[%s5827_s3 + $0x80] sm:$0xff]  }
 0x576   : > { %4399 = vrcp.f32 %v2025_v20  ;;  %4148 = vmatprep.subr.bf16.mxu1 %v4342_v40 }
 0x577   : > { %v2007_v32 = vpop.xlane.xlu0 %2006  ;;  %4149 = vmatpush3.bf16.msra.mxu1 %v4342_v40 }
 0x578   : > { %v4396_v37 = vpop.eup %4395  ;;  %v2026_v0 = vadd.f32 1e-09, %v2007_v32 }
 0x579   : > { %v2055_v19 = vmul.f32 %v4396_v37, %v5283_v44 }
 0x57a   : > { %4401 = vrcp.f32 %v2026_v0 }
 0x57b   : > { %v2009_v17 = vpop.xlane.xlu1 %2008  ;;  %v2066_v9 = vpack.c.bf16 %v2055_v19, %v2054_v60 }
 0x57c   : > { %v2027_v11 = vadd.f32 1e-09, %v2009_v17  ;;  %v4398_v16 = vpop.eup %4397 }
 0x57d   : > { %4122 = vmatprep.mubr.bf16.mxu1 %v2066_v9  ;;  %v2056_v47 = vmul.f32 %v4398_v16, %v5289_v41 }
 0x57e   : > { %4403 = vrcp.f32 %v2027_v11 }
 0x57f   : > { %v2011_v27 = vpop.xlane.xlu0 %2010 }
 0x580   : > { %v4400_v45 = vpop.eup %4399  ;;  %v2028_v3 = vadd.f32 1e-09, %v2011_v27 }
 0x581   : > { %v2057_v13 = vmul.f32 %v4400_v45, %v5295_v26 }
 0x582   : > { %4405 = vrcp.f32 %v2028_v3 }
 0x583   : > { %v2013_v42 = vpop.xlane.xlu1 %2012  ;;  %v2067_v4 = vpack.c.bf16 %v2057_v13, %v2056_v47 }
 0x584   : > { %v2029_v21 = vadd.f32 1e-09, %v2013_v42  ;;  %v4402_v44 = vpop.eup %4401 }
 0x585   : > { %4123 = vmatmul.mubr.bf16.gmra.mrb[48].mxu1 %v2067_v4  ;;  %v2058_v8 = vmul.f32 %v4402_v44, %v5301_v25 }
 0x586   : > { %4407 = vrcp.f32 %v2029_v21 }
 0x588   : > { %v4404_v46 = vpop.eup %4403 }
 0x589   : > { %v2059_v6 = vmul.f32 %v4404_v46, %v5306_v22 }
 0x58b   : > { %v2068_v31 = vpack.c.bf16 %v2059_v6, %v2058_v8 }
 0x58c   : > { %v4406_v33 = vpop.eup %4405 }
 0x58d   : > { %4126 = vmatprep.mubr.bf16.mxu1 %v2068_v31  ;;  %v2060_v41 = vmul.f32 %v4406_v33, %v5311_v30 }
 0x590   : > { %v4408_v24 = vpop.eup %4407 }
 0x591   : > { %v2061_v26 = vmul.f32 %v4408_v24, %v5316_v28 }
 0x593   : > { %v2069_v20 = vpack.c.bf16 %v2061_v26, %v2060_v41 }
 0x595   : > { %4127 = vmatmul.mubr.bf16.gmra.mrb[52].mxu1 %v2069_v20 }
 0x638   : > { %v4116_v32 = vpop.f32.mrb[40].mxu1 }
 0x639   : > { %v2193_v25 = vmin.f32 %v4116_v32, 0.0  ;;  %v2112_v37 = vpop.f32.mrb[41].mxu1  ;;  %vm2177_vm11 = vcmp.gt.f32.partialorder %v4116_v32, 0.0 }
 0x63a   : > { %v2191_v22 = vmin.f32 %v2112_v37, 0.0  ;;  %v4117_v0 = vpop.f32.mrb[42].mxu1  ;;  %vm2175_vm4 = vcmp.gt.f32.partialorder %v2112_v37, 0.0 }
 0x63b   : > { %v2211_v60 = vmul.f32 1.442695, %v2193_v25  ;;  %v2194_v19 = vmin.f32 %v4117_v0, 0.0  ;;  %v2115_v17 = vpop.f32.mrb[43].mxu1  ;;  %vm2178_vm7 = vcmp.gt.f32.partialorder %v4117_v0, 0.0 }
 0x63c   : > { %v2207_v9 = vmul.f32 1.442695, %v2191_v22  ;;  %v2192_v30 = vmin.f32 %v2115_v17, 0.0  ;;  %vm2176_vm15 = vcmp.gt.f32.partialorder %v2115_v17, 0.0 }
 0x63d   : > { %4409 = vpow2.f32 %v2211_v60  ;;  %v2213_v28 = vmul.f32 1.442695, %v2194_v19 }
 0x63e   : > { %4411 = vpow2.f32 %v2207_v9  ;;  %v2209_v11 = vmul.f32 1.442695, %v2192_v30 }
 0x63f   : > { %4413 = vpow2.f32 %v2213_v28 }
 0x640   : > { %4415 = vpow2.f32 %v2209_v11 }
 0x647   : > { %v4410_v16 = vpop.eup %4409 }
 0x648   : > { %v4412_v27 = vpop.eup %4411  ;;  %v3767_v45 = vadd.f32 -1.0, %v4410_v16  ;;  %v4120_v3 = vpop.f32.mrb[44].mxu1 }
 0x649   : > { %v4414_v47 = vpop.eup %4413  ;;  %v3765_v13 = vadd.f32 -1.0, %v4412_v27  ;;  %v2197_v42 = vmin.f32 %v4120_v3, 0.0  ;;  %v2128_v4 = vpop.f32.mrb[45].mxu1 }
 0x64a   : > { %v4416_v21 = vpop.eup %4415  ;;  %v3768_v44 = vadd.f32 -1.0, %v4414_v47  ;;  %v2195_v46 = vmin.f32 %v2128_v4, 0.0  ;;  %v4121_v8 = vpop.f32.mrb[46].mxu1  ;;  %v2257_v6 = vsel %vm2177_vm11, %v4116_v32, %v3767_v45  ;;  %vm5877_vm11 = vmmov %vm5876_vm3 }
 0x64b   : > { %v3766_v31 = vadd.f32 -1.0, %v4416_v21  ;;  %v2219_v33 = vmul.f32 1.442695, %v2197_v42  ;;  %v2131_v24 = vpop.f32.mrb[47].mxu1  ;;  %v2255_v41 = vsel %vm2175_vm4, %v2112_v37, %v3765_v13  ;;  %v2198_v40 = vmin.f32 %v4121_v8, 0.0 }
 0x64c   : > { %v2258_v26 = vsel %vm2178_vm7, %v4117_v0, %v3768_v44  ;;  %v2215_v20 = vmul.f32 1.442695, %v2195_v46  ;;  %v2196_v60 = vmin.f32 %v2131_v24, 0.0  ;;  %vm2181_vm7 = vcmp.gt.f32.partialorder %v4120_v3, 0.0 }
 0x64d   : > { %v2274_v25 = vpack.c.bf16 %v2258_v26, %v2257_v6  ;;  %v2256_v22 = vsel %vm2176_vm15, %v2115_v17, %v3766_v31  ;;  %4417 = vpow2.f32 %v2219_v33  ;;  %v2221_v9 = vmul.f32 1.442695, %v2198_v40 }
 0x64e   : > { %v2273_v19 = vpack.c.bf16 %v2256_v22, %v2255_v41  ;;  %4419 = vpow2.f32 %v2215_v20  ;;  %v2217_v30 = vmul.f32 1.442695, %v2196_v60  ;;  %vm2179_vm15 = vcmp.gt.f32.partialorder %v2128_v4, 0.0 }
 0x64f   : > { %4421 = vpow2.f32 %v2221_v9  ;;  %vm2182_vm4 = vcmp.gt.f32.partialorder %v4121_v8, 0.0  ;;  %vm2180_vm1 = vcmp.gt.f32.partialorder %v2131_v24, 0.0 }
 0x650   : > { %4132 = vmatprep.mubr.msk.bf16.mxu0 %vm5876_vm3, %v2273_v19  ;;  %4423 = vpow2.f32 %v2217_v30 }
 0x651   : > { %4133 = vmatmul.mubr.msk.bf16.vlgmr.msra.gmra.mrb[72].mxu0 %vm5877_vm11, %v2274_v25  ;;  %vm5878_vm11 = vmmov %vm5876_vm3 }
 0x657   : > { %v4418_v32 = vpop.eup %4417 }
 0x658   : > { %v4420_v28 = vpop.eup %4419  ;;  %v3771_v37 = vadd.f32 -1.0, %v4418_v32  ;;  %v4124_v0 = vpop.f32.mrb[48].mxu1 }
 0x659   : > { %v3769_v11 = vadd.f32 -1.0, %v4420_v28  ;;  %v2201_v16 = vmin.f32 %v4124_v0, 0.0  ;;  %v2144_v27 = vpop.f32.mrb[49].mxu1  ;;  %v4422_v17 = vpop.eup %4421 }
 0x65a   : > { %v2199_v45 = vmin.f32 %v2144_v27, 0.0  ;;  %v4125_v47 = vpop.f32.mrb[50].mxu1  ;;  %v4424_v13 = vpop.eup %4423  ;;  %v3772_v42 = vadd.f32 -1.0, %v4422_v17  ;;  %v2261_v46 = vsel %vm2181_vm7, %v4120_v3, %v3771_v37  ;;  %vm2185_vm7 = vcmp.gt.f32.partialorder %v4124_v0, 0.0 }
 0x65b   : > { %v2227_v21 = vmul.f32 1.442695, %v2201_v16  ;;  %v2147_v44 = vpop.f32.mrb[51].mxu1  ;;  %v3770_v6 = vadd.f32 -1.0, %v4424_v13  ;;  %v2202_v33 = vmin.f32 %v4125_v47, 0.0  ;;  %v2259_v41 = vsel %vm2179_vm15, %v2128_v4, %v3769_v11 }
 0x65c   : > { %v2223_v31 = vmul.f32 1.442695, %v2199_v45  ;;  %v2262_v26 = vsel %vm2182_vm4, %v4121_v8, %v3772_v42  ;;  %v2200_v20 = vmin.f32 %v2147_v44, 0.0  ;;  %vm2186_vm15 = vcmp.gt.f32.partialorder %v4125_v47, 0.0 }
 0x65d   : > { %4425 = vpow2.f32 %v2227_v21  ;;  %v2276_v40 = vpack.c.bf16 %v2262_v26, %v2261_v46  ;;  %v2260_v25 = vsel %vm2180_vm1, %v2131_v24, %v3770_v6  ;;  %v2229_v22 = vmul.f32 1.442695, %v2202_v33 }
 0x65e   : > { %4427 = vpow2.f32 %v2223_v31  ;;  %v2275_v60 = vpack.c.bf16 %v2260_v25, %v2259_v41  ;;  %v2225_v19 = vmul.f32 1.442695, %v2200_v20  ;;  %vm2183_vm1 = vcmp.gt.f32.partialorder %v2144_v27, 0.0 }
 0x65f   : > { %4429 = vpow2.f32 %v2229_v22  ;;  %vm2184_vm4 = vcmp.gt.f32.partialorder %v2147_v44, 0.0 }
 0x660   : > { %4431 = vpow2.f32 %v2225_v19  ;;  %4136 = vmatprep.mubr.msk.bf16.mxu0 %vm5876_vm3, %v2275_v60 }
 0x661   : > { %4137 = vmatmul.mubr.msk.bf16.gmra.mrb[76].mxu0 %vm5878_vm11, %v2276_v40  ;;  %vm5879_vm11 = vmmov %vm5876_vm3 }
 0x667   : > { %v4426_v3 = vpop.eup %4425 }
 0x668   : > { %v4428_v9 = vpop.eup %4427  ;;  %v3775_v30 = vadd.f32 -1.0, %v4426_v3  ;;  %v4128_v32 = vpop.f32.mrb[52].mxu1 }
 0x669   : > { %v3773_v4 = vadd.f32 -1.0, %v4428_v9  ;;  %v2205_v8 = vmin.f32 %v4128_v32, 0.0  ;;  %v2160_v28 = vpop.f32.mrb[53].mxu1  ;;  %v4430_v37 = vpop.eup %4429 }
 0x66a   : > { %v2203_v24 = vmin.f32 %v2160_v28, 0.0  ;;  %v4129_v11 = vpop.f32.mrb[54].mxu1  ;;  %v4432_v16 = vpop.eup %4431  ;;  %v3776_v17 = vadd.f32 -1.0, %v4430_v37  ;;  %v2265_v42 = vsel %vm2185_vm7, %v4124_v0, %v3775_v30  ;;  %vm2189_vm7 = vcmp.gt.f32.partialorder %v4128_v32, 0.0 }
 0x66b   : > { %v2235_v45 = vmul.f32 1.442695, %v2205_v8  ;;  %v2163_v13 = vpop.f32.mrb[55].mxu1  ;;  %v3774_v21 = vadd.f32 -1.0, %v4432_v16  ;;  %v2206_v6 = vmin.f32 %v4129_v11, 0.0  ;;  %v2263_v31 = vsel %vm2183_vm1, %v2144_v27, %v3773_v4 }
 0x66c   : > { %v2231_v46 = vmul.f32 1.442695, %v2203_v24  ;;  %v2266_v33 = vsel %vm2186_vm15, %v4125_v47, %v3776_v17  ;;  %v2204_v41 = vmin.f32 %v2163_v13, 0.0  ;;  %vm2190_vm1 = vcmp.gt.f32.partialorder %v4129_v11, 0.0 }
 0x66d   : > { %4433 = vpow2.f32 %v2235_v45  ;;  %v2278_v26 = vpack.c.bf16 %v2266_v33, %v2265_v42  ;;  %v2264_v20 = vsel %vm2184_vm4, %v2147_v44, %v3774_v21  ;;  %v2237_v40 = vmul.f32 1.442695, %v2206_v6 }
 0x66e   : > { %4435 = vpow2.f32 %v2231_v46  ;;  %v2277_v25 = vpack.c.bf16 %v2264_v20, %v2263_v31  ;;  %v2233_v22 = vmul.f32 1.442695, %v2204_v41  ;;  %vm2187_vm15 = vcmp.gt.f32.partialorder %v2160_v28, 0.0 }
 0x66f   : > { %4437 = vpow2.f32 %v2237_v40  ;;  %vm2188_vm4 = vcmp.gt.f32.partialorder %v2163_v13, 0.0 }
 0x670   : > { %4439 = vpow2.f32 %v2233_v22  ;;  %4140 = vmatprep.mubr.msk.bf16.mxu0 %vm5876_vm3, %v2277_v25 }
 0x671   : > { %4141 = vmatmul.mubr.msk.bf16.gmra.mrb[80].mxu0 %vm5879_vm11, %v2278_v26  ;;  %vm5880_vm11 = vmmov %vm5876_vm3 }
 0x677   : > { %v4434_v0 = vpop.eup %4433 }
 0x678   : > { %v4436_v60 = vpop.eup %4435  ;;  %v3779_v19 = vadd.f32 -1.0, %v4434_v0 }
 0x679   : > { %v4438_v3 = vpop.eup %4437  ;;  %v3777_v27 = vadd.f32 -1.0, %v4436_v60 }
 0x67a   : > { %v4440_v47 = vpop.eup %4439  ;;  %v3780_v9 = vadd.f32 -1.0, %v4438_v3  ;;  %v2269_v30 = vsel %vm2189_vm7, %v4128_v32, %v3779_v19  ;;  %vm5882_vm7 = vmmov %vm5876_vm3 }
 0x67b   : > { %v3778_v44 = vadd.f32 -1.0, %v4440_v47  ;;  %v2267_v8 = vsel %vm2187_vm15, %v2160_v28, %v3777_v27 }
 0x67c   : > { %v2270_v4 = vsel %vm2190_vm1, %v4129_v11, %v3780_v9  ;;  %vm5883_vm1 = vmmov %vm5876_vm3 }
 0x67d   : > { %v2280_v37 = vpack.c.bf16 %v2270_v4, %v2269_v30  ;;  %v2268_v24 = vsel %vm2188_vm4, %v2163_v13, %v3778_v44  ;;  %vm5884_vm15 = vmmov %vm5883_vm1 }
 0x67e   : > { %v2279_v16 = vpack.c.bf16 %v2268_v24, %v2267_v8  ;;  %vm5886_vm4 = vmmov %vm5883_vm1 }
 0x680   : > { %4144 = vmatprep.mubr.msk.bf16.mxu0 %vm5876_vm3, %v2279_v16  ;;  %vm5887_vm3 = vmmov %vm5883_vm1 }
 0x681   : > { %4145 = vmatmul.mubr.msk.bf16.gmra.mrb[84].mxu0 %vm5880_vm11, %v2280_v37  ;;  %vm5888_vm11 = vmmov %vm5883_vm1 }
 0x724   : > { %v4134_v17 = vpop.f32.mrb[72].mxu0 }
 0x725   : > { %v2345_v45 = vpop.f32.mrb[73].mxu0 }
 0x726   : > { %v4135_v42 = vpop.f32.mrb[74].mxu0 }
 0x727   : > { %v2411_v21 = vpack.c.bf16 %v4135_v42, %v4134_v17  ;;  %v2348_v46 = vpop.f32.mrb[75].mxu0 }
 0x728   : > { %v2410_v6 = vpack.c.bf16 %v2348_v46, %v2345_v45 }
 0x72a   : > { %4150 = vmatprep.mubr.msk.bf16.mxu1 %vm5881_vm13, %v2410_v6  ;;  %4166 = vmatprep.subr.bf16.mxu0 %v2410_v6  ;;  %vm5885_vm13 = vmmov %vm5883_vm1 }
 0x72b   : > { %4151 = vmatmul.mubr.msk.bf16.vlgmr.msra.gmra.mrb[56].mxu1 %vm5882_vm7, %v2411_v21  ;;  %4167 = vmatpush3.bf16.msra.mxu0 %v2410_v6 }
 0x72c   : > { %4168 = vmatprep.subr.bf16.mxu0 %v2411_v21 }
 0x72f   : > { %4169 = vmatpush3.bf16.msra.mxu0 %v2411_v21 }
 0x734   : > { %v4138_v32 = vpop.f32.mrb[76].mxu0 }
 0x735   : > { %v2361_v28 = vpop.f32.mrb[77].mxu0 }
 0x736   : > { %v4139_v11 = vpop.f32.mrb[78].mxu0 }
 0x737   : > { %v2413_v13 = vpack.c.bf16 %v4139_v11, %v4138_v32  ;;  %v2364_v31 = vpop.f32.mrb[79].mxu0 }
 0x738   : > { %v2412_v33 = vpack.c.bf16 %v2364_v31, %v2361_v28 }
 0x73a   : > { %4154 = vmatprep.mubr.msk.bf16.mxu1 %vm5883_vm1, %v2412_v33  ;;  %4170 = vmatprep.subr.bf16.mxu0 %v2412_v33 }
 0x73b   : > { %4155 = vmatmul.mubr.msk.bf16.gmra.mrb[60].mxu1 %vm5884_vm15, %v2413_v13  ;;  %4171 = vmatpush3.bf16.msra.mxu0 %v2412_v33 }
 0x73c   : > { %4172 = vmatprep.subr.bf16.mxu0 %v2413_v13 }
 0x73f   : > { %4173 = vmatpush3.bf16.msra.mxu0 %v2413_v13 }
 0x744   : > { %v4142_v41 = vpop.f32.mrb[80].mxu0 }
 0x745   : > { %v2377_v26 = vpop.f32.mrb[81].mxu0 }
 0x746   : > { %v4143_v20 = vpop.f32.mrb[82].mxu0 }
 0x747   : > { %v2415_v40 = vpack.c.bf16 %v4143_v20, %v4142_v41  ;;  %v2380_v25 = vpop.f32.mrb[83].mxu0 }
 0x748   : > { %v2414_v22 = vpack.c.bf16 %v2380_v25, %v2377_v26 }
 0x74a   : > { %4158 = vmatprep.mubr.msk.bf16.mxu1 %vm5885_vm13, %v2414_v22  ;;  %4174 = vmatprep.subr.bf16.mxu0 %v2414_v22 }
 0x74b   : > { %4159 = vmatmul.mubr.msk.bf16.gmra.mrb[64].mxu1 %vm5886_vm4, %v2415_v40  ;;  %4175 = vmatpush3.bf16.msra.mxu0 %v2414_v22 }
 0x74c   : > { %4176 = vmatprep.subr.bf16.mxu0 %v2415_v40 }
 0x74f   : > { %4177 = vmatpush3.bf16.msra.mxu0 %v2415_v40 }
 0x754   : > { %v4146_v0 = vpop.f32.mrb[84].mxu0 }
 0x755   : > { %v2393_v60 = vpop.f32.mrb[85].mxu0 }
 0x756   : > { %v4147_v19 = vpop.f32.mrb[86].mxu0 }
 0x757   : > { %v2417_v3 = vpack.c.bf16 %v4147_v19, %v4146_v0  ;;  %v2396_v27 = vpop.f32.mrb[87].mxu0 }
 0x758   : > { %v2416_v47 = vpack.c.bf16 %v2396_v27, %v2393_v60 }
 0x75a   : > { %4162 = vmatprep.mubr.msk.bf16.mxu1 %vm5887_vm3, %v2416_v47  ;;  %4178 = vmatprep.subr.bf16.mxu0 %v2416_v47 }
 0x75b   : > { %4163 = vmatmul.mubr.msk.bf16.gmra.mrb[68].mxu1 %vm5888_vm11, %v2417_v3  ;;  %4179 = vmatpush3.bf16.msra.mxu0 %v2416_v47 }
 0x75c   : > { %4180 = vmatprep.subr.bf16.mxu0 %v2417_v3 }
 0x75f   : > { %4181 = vmatpush3.bf16.msra.mxu0 %v2417_v3 }
 0x7fe   : > { %v4152_v9 = vpop.f32.mrb[56].mxu1 }
 0x7ff   : > { %2565 = vrot.lane.b32.xlu1 %v4152_v9, %s4582_s29  ;;  %v2482_v44 = vpop.f32.mrb[57].mxu1 }
 0x800   : > { %2561 = vrot.lane.b32.xlu0 %v2482_v44, %s4582_s29  ;;  %v4153_v30 = vpop.f32.mrb[58].mxu1 }
 0x801   : > { %v2485_v4 = vpop.f32.mrb[59].mxu1 }
 0x803   : > { %2650 = vperm.xlu1 %4310, %v4152_v9  }
 0x804   : > { %2567 = vrot.lane.b32.xlu0 %v4153_v30, %s4582_s29 }
 0x807   : > { %2642 = vperm.xlu1 %4310, %v2482_v44  }
 0x808   : > { %2646 = vperm.xlu0 %4309, %v2485_v4  }
 0x80b   : > { %2563 = vrot.lane.b32.xlu1 %v2485_v4, %s4582_s29 }
 0x80e   : > { %v4156_v8 = vpop.f32.mrb[60].mxu1 }
 0x80f   : > { %2573 = vrot.lane.b32.xlu1 %v4156_v8, %s4582_s29  ;;  %v2498_v37 = vpop.f32.mrb[61].mxu1 }
 0x810   : > { %v4157_v24 = vpop.f32.mrb[62].mxu1 }
 0x811   : > { %2575 = vrot.lane.b32.xlu0 %v4157_v24, %s4582_s29  ;;  %v2501_v16 = vpop.f32.mrb[63].mxu1 }
 0x813   : > { %2569 = vrot.lane.b32.xlu1 %v2498_v37, %s4582_s29 }
 0x815   : > { %2571 = vrot.lane.b32.xlu0 %v2501_v16, %s4582_s29 }
 0x81e   : > { %v4160_v17 = vpop.f32.mrb[64].mxu1 }
 0x81f   : > { %2581 = vrot.lane.b32.xlu1 %v4160_v17, %s4582_s29  ;;  %v2514_v45 = vpop.f32.mrb[65].mxu1 }
 0x820   : > { %v4161_v42 = vpop.f32.mrb[66].mxu1 }
 0x821   : > { %2583 = vrot.lane.b32.xlu0 %v4161_v42, %s4582_s29  ;;  %v2517_v21 = vpop.f32.mrb[67].mxu1 }
 0x823   : > { %2577 = vrot.lane.b32.xlu1 %v2514_v45, %s4582_s29 }
 0x825   : > { %2579 = vrot.lane.b32.xlu0 %v2517_v21, %s4582_s29 }
 0x82e   : > { %v4164_v46 = vpop.f32.mrb[68].mxu1 }
 0x82f   : > { %2589 = vrot.lane.b32.xlu1 %v4164_v46, %s4582_s29  ;;  %v2530_v6 = vpop.f32.mrb[69].mxu1 }
 0x830   : > { %v4165_v32 = vpop.f32.mrb[70].mxu1 }
 0x831   : > { %2591 = vrot.lane.b32.xlu0 %v4165_v32, %s4582_s29  ;;  %v2533_v28 = vpop.f32.mrb[71].mxu1 }
 0x833   : > { %2585 = vrot.lane.b32.xlu1 %v2530_v6, %s4582_s29 }
 0x835   : > { %2587 = vrot.lane.b32.xlu0 %v2533_v28, %s4582_s29 }
 0x837   : > { %2658 = vperm.xlu1 %4310, %v2498_v37  }
 0x839   : > { %2654 = vperm.xlu0 %4309, %v4153_v30  }
 0x83b   : > { %2666 = vperm.xlu1 %4310, %v4156_v8  }
 0x83d   : > { %2662 = vperm.xlu0 %4309, %v2501_v16  }
 0x83f   : > { %2674 = vperm.xlu1 %4310, %v2514_v45  }
 0x841   : > { %2670 = vperm.xlu0 %4309, %v4157_v24  }
 0x843   : > { %2682 = vperm.xlu1 %4310, %v4160_v17  }
 0x845   : > { %2678 = vperm.xlu0 %4309, %v2517_v21   ;;  %v3647_v21 = vld [vmem:[%s4680_s10 + $0x80] sm:$0xff] }
 0x847   : > { %2690 = vperm.xlu1 %4310, %v2530_v6  }
 0x849   : > { %2686 = vperm.xlu0 %4309, %v4161_v42  }
 0x84b   : > { %2698 = vperm.xlu1 %4310, %v4164_v46   ;;  %v3648_v46 = vld [vmem:[%s4680_s10 + $0x88] sm:$0xff] }
 0x84d   : > { %2702 = vperm.xlu0 %4309, %v4165_v32  }
 0x851   : > { %2694 = vperm.xlu0 %4309, %v2533_v28  }
 0x871   : > { %v2566_v13 = vpop.permute.xlu1 %2565 }
 0x872   : > { %v2562_v11 = vpop.permute.xlu0 %2561 }
 0x874   : > { %2609 = vxpose.xlu1.b32.start [1/16] (narrow) %v2562_v11, 8  ;;  %v3649_v11 = vld [vmem:[%s4680_s10 + $0x90] sm:$0xff] }
 0x876   : > { %v2568_v41 = vpop.permute.xlu0 %2567 }
 0x882   : > { %v2651_v31 = vpop.permute.xlu1 %2650 }
 0x886   : > { %v2643_v33 = vpop.permute.xlu1 %2642 }
 0x887   : > { %v2647_v20 = vpop.permute.xlu0 %2646 }
 0x88a   : > { %v2564_v26 = vpop.permute.xlu1 %2563 }
 0x88b   : > { %2610 = vxpose.xlu1.b32.cont [2/16] (narrow) %v2564_v26, 8  ;;  %v2576_v25 = vpop.permute.xlu0 %2575 }
 0x88e   : > { %v2574_v40 = vpop.permute.xlu1 %2573 }
 0x88f   : > { %2611 = vxpose.xlu1.b32.cont [3/16] (narrow) %v2566_v13, 8  ;;  %v2572_v0 = vpop.permute.xlu0 %2571 }
 0x892   : > { %v2570_v22 = vpop.permute.xlu1 %2569 }
 0x893   : > { %2612 = vxpose.xlu1.b32.cont [4/16] (narrow) %v2568_v41, 8  ;;  %v2584_v19 = vpop.permute.xlu0 %2583 }
 0x896   : > { %v2582_v60 = vpop.permute.xlu1 %2581 }
 0x897   : > { %2613 = vxpose.xlu1.b32.cont [5/16] (narrow) %v2570_v22, 8  ;;  %v2580_v27 = vpop.permute.xlu0 %2579 }
 0x89a   : > { %v2578_v3 = vpop.permute.xlu1 %2577 }
 0x89b   : > { %2614 = vxpose.xlu1.b32.cont [6/16] (narrow) %v2572_v0, 8  ;;  %v3650_v0 = vld [vmem:[%s4680_s10 + $0x98] sm:$0xff] }
 0x89f   : > { %2615 = vxpose.xlu1.b32.cont [7/16] (narrow) %v2574_v40, 8 }
 0x8a1   : > { %v2590_v47 = vpop.permute.xlu1 %2589 }
 0x8a3   : > { %2616 = vxpose.xlu1.b32.cont [8/16] (narrow) %v2576_v25, 8  ;;  %v2592_v9 = vpop.permute.xlu0 %2591 }
 0x8a5   : > { %v2586_v44 = vpop.permute.xlu1 %2585 }
 0x8a7   : > { %2617 = vxpose.xlu1.b32.cont [9/16] (narrow) %v2578_v3, 8  ;;  %v2588_v30 = vpop.permute.xlu0 %2587 }
 0x8ab   : > { %2618 = vxpose.xlu1.b32.cont [10/16] (narrow) %v2580_v27, 8  ;;  %v3651_v27 = vld [vmem:[%s4680_s10 + $0xa0] sm:$0xff] }
 0x8af   : > { %2619 = vxpose.xlu1.b32.cont [11/16] (narrow) %v2582_v60, 8 }
 0x8b3   : > { %2620 = vxpose.xlu1.b32.cont [12/16] (narrow) %v2584_v19, 8 }
 0x8b6   : > { %v2659_v4 = vpop.permute.xlu1 %2658 }
 0x8b7   : > { %2621 = vxpose.xlu1.b32.cont [13/16] (narrow) %v2586_v44, 8 }
 0x8b8   : > { %v2655_v13 = vpop.permute.xlu0 %2654 }
 0x8ba   : > { %v2667_v8 = vpop.permute.xlu1 %2666 }
 0x8bb   : > { %2622 = vxpose.xlu1.b32.cont [14/16] (narrow) %v2588_v30, 8 }
 0x8be   : > { %v2675_v37 = vpop.permute.xlu1 %2674 }
 0x8bf   : > { %2623 = vxpose.xlu1.b32.cont [15/16] (narrow) %v2590_v47, 8  ;;  %v2663_v47 = vpop.permute.xlu0 %2662 }
 0x8c2   : > { %v5373_v24 = vpop.permute.xlu1 %2682 }
 0x8c3   : > { %2624 = vxpose.xlu1.b32.end [16/16] (narrow) %v2592_v9, 8 }
 0x8c6   : > { %v5375_v16 = vpop.permute.xlu1 %2690 }
 0x8ca   : > { %v5377_v17 = vpop.permute.xlu1 %2698 }
 0x907   : > { %v2625_v45 = vpop.trf.xlu1 }
 0x908   : > { %v5380_v42 = vrot.slane %v2625_v45, %v4735_v15 }
 0x90a   : > { %v2709_v6 = vadd.f32 %v5380_v42, %v2643_v33  ;;  %v2710_v32 = vadd.f32 %v5380_v42, %v2647_v20  ;;  %v2711_v28 = vadd.f32 %v5380_v42, %v2651_v31  ;;  %v2712_v40 = vadd.f32 %v5380_v42, %v2655_v13  ;;  %v3653_v13 = vld [vmem:[%s4680_s10 + $0xb0] sm:$0xff] }
 0x90b   : > { %v2713_v3 = vadd.f32 %v5380_v42, %v2659_v4 }
 0x90c   : > { %v2725_v41 = vadd.f32 %v3647_v21, %v2709_v6  ;;  %v2726_v26 = vadd.f32 %v3648_v46, %v2710_v32  ;;  %v2727_v22 = vadd.f32 %v3649_v11, %v2711_v28  ;;  %v2728_v19 = vadd.f32 %v3650_v0, %v2712_v40  ;;  %v3652_v46 = vld [vmem:[%s4680_s10 + $0xa8] sm:$0xff]  ;;  %v3654_v0 = vld [vmem:[%s4680_s10 + $0xb8] sm:$0xff] }
 0x90d   : > { %v2729_v45 = vadd.f32 %v3651_v27, %v2713_v3  ;;  %v2714_v21 = vadd.f32 %v5380_v42, %v2663_v47  ;;  %v2715_v11 = vadd.f32 %v5380_v42, %v2667_v8  ;;  %v3655_v27 = vld [vmem:[%s4680_s10 + $0xc0] sm:$0xff] }
 0x90e   : > { %vm2741_vm7 = vcmp.gt.f32.partialorder %v2725_v41, 0.0  ;;  %v2757_v25 = vmul.f32 0.2, %v2725_v41  ;;  %v2758_v15 = vmul.f32 0.2, %v2726_v26  ;;  %vm2742_vm1 = vcmp.gt.f32.partialorder %v2726_v26, 0.0 }
 0x90f   : > { %v2759_v20 = vmul.f32 0.2, %v2727_v22  ;;  %vm2743_vm15 = vcmp.gt.f32.partialorder %v2727_v22, 0.0  ;;  %v2760_v30 = vmul.f32 0.2, %v2728_v19  ;;  %vm2744_vm13 = vcmp.gt.f32.partialorder %v2728_v19, 0.0 }
 0x910   : > { %v2773_v60 = vsel %vm2741_vm7, %v2725_v41, %v2757_v25  ;;  %v2774_v31 = vsel %vm2742_vm1, %v2726_v26, %v2758_v15  ;;  %v2761_v32 = vmul.f32 0.2, %v2729_v45  ;;  %v2730_v28 = vadd.f32 %v3652_v46, %v2714_v21  ;;  %v2671_v41 = vpop.permute.xlu0 %2670  ;;  %v3656_v46 = vld [vmem:[%s4680_s10 + $0xc8] sm:$0xff] }
 0x911   : > { %v5392_v33 = vsel %vm1854_vm5, %v2773_v60, -1e+09  ;;  %v5399_v9 = vsel %vm1855_vm8, %v2774_v31, -1e+09  ;;  %v2775_v44 = vsel %vm2743_vm15, %v2727_v22, %v2759_v20  ;;  %v2776_v6 = vsel %vm2744_vm13, %v2728_v19, %v2760_v30 }
 0x912   : > { %2805 = vmax.xlane.f32.xlu0 %v5392_v33  ;;  %v5406_v4 = vsel %vm1856_vm10, %v2775_v44, -1e+09  ;;  %vm2745_vm4 = vcmp.gt.f32.partialorder %v2729_v45, 0.0  ;;  %v5413_v26 = vsel %vm1857_vm12, %v2776_v6, -1e+09  ;;  %v2731_v15 = vadd.f32 %v3653_v13, %v2715_v11 }
 0x913   : > { %v2777_v40 = vsel %vm2745_vm4, %v2729_v45, %v2761_v32  ;;  %v2762_v25 = vmul.f32 0.2, %v2730_v28  ;;  %v2716_v22 = vadd.f32 %v5380_v42, %v2671_v41  ;;  %vm2746_vm3 = vcmp.gt.f32.partialorder %v2730_v28, 0.0  ;;  %v3657_v41 = vld [vmem:[%s4680_s10 + $0xd0] sm:$0xff] }
 0x914   : > { %v5420_v8 = vsel %vm1858_vm14, %v2777_v40, -1e+09  ;;  %v2763_v31 = vmul.f32 0.2, %v2731_v15  ;;  %v2717_v19 = vadd.f32 %v5380_v42, %v2675_v37  ;;  %v2679_v3 = vpop.permute.xlu0 %2678  ;;  %vm2747_vm11 = vcmp.gt.f32.partialorder %v2731_v15, 0.0 }
 0x915   : > { %v2778_v60 = vsel %vm2746_vm3, %v2730_v28, %v2762_v25  ;;  %v2732_v20 = vadd.f32 %v3654_v0, %v2716_v22  ;;  %v2718_v21 = vadd.f32 %v5380_v42, %v2679_v3  ;;  %v2719_v13 = vadd.f32 %v5380_v42, %v5373_v24 }
 0x916   : > { %2807 = vmax.xlane.f32.xlu0 %v5399_v9  ;;  %v5427_v47 = vsel %vm1859_vm0, %v2778_v60, -1e+09  ;;  %v2779_v44 = vsel %vm2747_vm11, %v2731_v15, %v2763_v31  ;;  %v2733_v45 = vadd.f32 %v3655_v27, %v2717_v19  ;;  %v3658_v31 = vld [vmem:[%s4680_s10 + $0xd8] sm:$0xff]  ;;  %v2721_v27 = vadd.f32 %v5380_v42, %v5375_v16 }
 0x917   : > { %v2764_v30 = vmul.f32 0.2, %v2732_v20  ;;  %vm2748_vm7 = vcmp.gt.f32.partialorder %v2732_v20, 0.0  ;;  %v5434_v37 = vsel %vm1860_vm2, %v2779_v44, -1e+09  ;;  %v2734_v11 = vadd.f32 %v3656_v46, %v2718_v21  ;;  %v3659_v44 = vld [vmem:[%s4680_s10 + $0xe0] sm:$0xff] }
 0x918   : > { %v2687_v6 = vpop.permute.xlu0 %2686  ;;  %v2765_v28 = vmul.f32 0.2, %v2733_v45  ;;  %vm2749_vm1 = vcmp.gt.f32.partialorder %v2733_v45, 0.0  ;;  %v2735_v22 = vadd.f32 %v3657_v41, %v2719_v13  ;;  %vm5889_vm4 = vcmp.gt.f32.partialorder %v5144_v29, 0.0 }
 0x919   : > { %v2780_v32 = vsel %vm2748_vm7, %v2732_v20, %v2764_v30  ;;  %v2766_v15 = vmul.f32 0.2, %v2734_v11  ;;  %v2720_v0 = vadd.f32 %v5380_v42, %v2687_v6  ;;  %vm2750_vm15 = vcmp.gt.f32.partialorder %v2734_v11, 0.0 }
 0x91a   : > { %2809 = vmax.xlane.f32.xlu0 %v5406_v4  ;;  %v5442_v40 = vsel %vm1861_vm6, %v2780_v32, -1e+09  ;;  %v2781_v25 = vsel %vm2749_vm1, %v2733_v45, %v2765_v28  ;;  %v2767_v19 = vmul.f32 0.2, %v2735_v22  ;;  %vm2751_vm13 = vcmp.gt.f32.partialorder %v2735_v22, 0.0  ;;  %v3660_v28 = vld [vmem:[%s4680_s10 + $0xe8] sm:$0xff] }
 0x91b   : > { %v5449_v24 = vsel %vm1862_vm9, %v2781_v25, -1e+09  ;;  %v2782_v20 = vsel %vm2750_vm15, %v2734_v11, %v2766_v15  ;;  %v2736_v3 = vadd.f32 %v3658_v31, %v2720_v0  ;;  %v2737_v6 = vadd.f32 %v3659_v44, %v2721_v27  ;;  %v3661_v15 = vld [vmem:[%s4680_s10 + $0xf0] sm:$0xff] }
 0x91c   : > { %v2703_v60 = vpop.permute.xlu0 %2702  ;;  %v5457_v45 = vsel %vm5889_vm4, %v2782_v20, -1e+09  ;;  %v2783_v21 = vsel %vm2751_vm13, %v2735_v22, %v2767_v19  ;;  %vm5890_vm11 = vcmp.gt.f32.partialorder %v5155_v10, 0.0  ;;  %v2723_v25 = vadd.f32 %v5380_v42, %v5377_v17 }
 0x91d   : > { %v2768_v46 = vmul.f32 0.2, %v2736_v3  ;;  %vm2752_vm3 = vcmp.gt.f32.partialorder %v2736_v3, 0.0  ;;  %v5464_v16 = vsel %vm5890_vm11, %v2783_v21, -1e+09  ;;  %vm2753_vm7 = vcmp.gt.f32.partialorder %v2737_v6, 0.0 }
 0x91e   : > { %2811 = vmax.xlane.f32.xlu0 %v5413_v26  ;;  %v2769_v13 = vmul.f32 0.2, %v2737_v6  ;;  %vm5891_vm1 = vcmp.gt.f32.partialorder %v5167_v23, 0.0  ;;  %v2739_v20 = vadd.f32 %v3661_v15, %v2723_v25  ;;  %v2724_v19 = vadd.f32 %v5380_v42, %v2703_v60 }
 0x91f   : > { %v2784_v11 = vsel %vm2752_vm3, %v2736_v3, %v2768_v46  ;;  %v3662_v3 = vld [vmem:[%s4680_s10 + $0xf8] sm:$0xff]  ;;  %vm5892_vm13 = vcmp.gt.f32.partialorder %v5178_v36, 0.0  ;;  %vm5893_vm3 = vcmp.gt.f32.partialorder %v5191_v39, 0.0 }
 0x920   : > { %v2695_v30 = vpop.permute.xlu0 %2694  ;;  %v5472_v22 = vsel %vm5891_vm1, %v2784_v11, -1e+09  ;;  %v2785_v0 = vsel %vm2753_vm7, %v2737_v6, %v2769_v13  ;;  %v2771_v44 = vmul.f32 0.2, %v2739_v20  ;;  %vm2755_vm4 = vcmp.gt.f32.partialorder %v2739_v20, 0.0 }
 0x921   : > { %v2722_v32 = vadd.f32 %v5380_v42, %v2695_v30  ;;  %v5479_v27 = vsel %vm5892_vm13, %v2785_v0, -1e+09  ;;  %v2740_v30 = vadd.f32 %v3662_v3, %v2724_v19  ;;  %vm5894_vm7 = vcmp.gt.f32.partialorder %v5201_v18, 0.0 }
 0x922   : > { %2813 = vmax.xlane.f32.xlu0 %v5420_v8  ;;  %v2787_v46 = vsel %vm2755_vm4, %v2739_v20, %v2771_v44  ;;  %vm5895_vm1 = vcmp.gt.f32.partialorder %v5210_v43, 0.0 }
 0x923   : > { %v2738_v41 = vadd.f32 %v3660_v28, %v2722_v32  ;;  %v2772_v42 = vmul.f32 0.2, %v2740_v30  ;;  %vm2756_vm11 = vcmp.gt.f32.partialorder %v2740_v30, 0.0  ;;  %v5489_v60 = vsel %vm5894_vm7, %v2787_v46, -1e+09 }
 0x925   : > { %v2770_v31 = vmul.f32 0.2, %v2738_v41  ;;  %vm2754_vm15 = vcmp.gt.f32.partialorder %v2738_v41, 0.0  ;;  %v2788_v6 = vsel %vm2756_vm11, %v2740_v30, %v2772_v42 }
 0x926   : > { %2815 = vmax.xlane.f32.xlu0 %v5427_v47  ;;  %v5494_v32 = vsel %vm5895_vm1, %v2788_v6, -1e+09 }
 0x927   : > { %v2786_v17 = vsel %vm2754_vm15, %v2738_v41, %v2770_v31 }
 0x928   : > { %v5484_v21 = vsel %vm5893_vm3, %v2786_v17, -1e+09 }
 0x92a   : > { %2817 = vmax.xlane.f32.xlu0 %v5434_v37 }
 0x92e   : > { %2819 = vmax.xlane.f32.xlu0 %v5442_v40 }
 0x932   : > { %2821 = vmax.xlane.f32.xlu0 %v5449_v24 }
 0x936   : > { %2823 = vmax.xlane.f32.xlu0 %v5457_v45 }
 0x93a   : > { %2825 = vmax.xlane.f32.xlu0 %v5464_v16 }
 0x93e   : > { %2827 = vmax.xlane.f32.xlu0 %v5472_v22 }
 0x942   : > { %2829 = vmax.xlane.f32.xlu0 %v5479_v27 }
 0x946   : > { %2831 = vmax.xlane.f32.xlu0 %v5484_v21 }
 0x94a   : > { %2833 = vmax.xlane.f32.xlu0 %v5489_v60 }
 0x94e   : > { %2835 = vmax.xlane.f32.xlu0 %v5494_v32 }
 0x99f   : > { %v2806_v28 = vpop.xlane.xlu0 %2805 }
 0x9a0   : > { %v2837_v11 = vsub.f32 %v5392_v33, %v2806_v28 }
 0x9a2   : > { %v2853_v13 = vmul.f32 1.442695, %v2837_v11 }
 0x9a3   : > { %v2808_v41 = vpop.xlane.xlu0 %2807 }
 0x9a4   : > { %4441 = vpow2.f32 %v2853_v13  ;;  %v2838_v25 = vsub.f32 %v5399_v9, %v2808_v41 }
 0x9a6   : > { %v2855_v15 = vmul.f32 1.442695, %v2838_v25 }
 0x9a7   : > { %v2810_v0 = vpop.xlane.xlu0 %2809 }
 0x9a8   : > { %4443 = vpow2.f32 %v2855_v15  ;;  %v2839_v31 = vsub.f32 %v5406_v4, %v2810_v0 }
 0x9aa   : > { %v2857_v20 = vmul.f32 1.442695, %v2839_v31 }
 0x9ab   : > { %v2812_v19 = vpop.xlane.xlu0 %2811 }
 0x9ac   : > { %4445 = vpow2.f32 %v2857_v20  ;;  %v2840_v3 = vsub.f32 %v5413_v26, %v2812_v19 }
 0x9ae   : > { %v4442_v17 = vpop.eup %4441  ;;  %v2859_v44 = vmul.f32 1.442695, %v2840_v3 }
 0x9af   : > { %v2814_v30 = vpop.xlane.xlu0 %2813  ;;  %v5503_v33 = vsel %vm1854_vm5, %v4442_v17, 0.0  ;;  %vm5896_vm5 = vcmp.gt.f32.partialorder %v5144_v29, 0.0 }
 0x9b0   : > { %4447 = vpow2.f32 %v2859_v44  ;;  %v2841_v9 = vsub.f32 %v5420_v8, %v2814_v30  ;;  %2901 = vadd.xlane.f32.xlu0 %v5503_v33 }
 0x9b2   : > { %v4444_v46 = vpop.eup %4443  ;;  %v2861_v42 = vmul.f32 1.442695, %v2841_v9 }
 0x9b3   : > { %v2816_v4 = vpop.xlane.xlu0 %2815  ;;  %v5509_v6 = vsel %vm1855_vm8, %v4444_v46, 0.0  ;;  %vm5897_vm8 = vcmp.gt.f32.partialorder %v5155_v10, 0.0 }
 0x9b4   : > { %4449 = vpow2.f32 %v2861_v42  ;;  %v2842_v26 = vsub.f32 %v5427_v47, %v2816_v4  ;;  %2903 = vadd.xlane.f32.xlu0 %v5509_v6 }
 0x9b6   : > { %v4446_v35 = vpop.eup %4445  ;;  %v2863_v28 = vmul.f32 1.442695, %v2842_v26 }
 0x9b7   : > { %v2818_v11 = vpop.xlane.xlu0 %2817  ;;  %v5515_v8 = vsel %vm1856_vm10, %v4446_v35, 0.0  ;;  %vm5898_vm10 = vcmp.gt.f32.partialorder %v5167_v23, 0.0 }
 0x9b8   : > { %4451 = vpow2.f32 %v2863_v28  ;;  %v2843_v13 = vsub.f32 %v5434_v37, %v2818_v11  ;;  %2905 = vadd.xlane.f32.xlu1 %v5515_v8 }
 0x9ba   : > { %v4448_v48 = vpop.eup %4447  ;;  %v2865_v41 = vmul.f32 1.442695, %v2843_v13 }
 0x9bb   : > { %v2820_v25 = vpop.xlane.xlu0 %2819  ;;  %v5521_v47 = vsel %vm1857_vm12, %v4448_v48, 0.0  ;;  %vm5899_vm12 = vmmov %vm5892_vm13 }
 0x9bc   : > { %4453 = vpow2.f32 %v2865_v41  ;;  %v2844_v15 = vsub.f32 %v5442_v40, %v2820_v25  ;;  %2907 = vadd.xlane.f32.xlu0 %v5521_v47 }
 0x9be   : > { %v4450_v34 = vpop.eup %4449  ;;  %v2867_v0 = vmul.f32 1.442695, %v2844_v15 }
 0x9bf   : > { %v2822_v31 = vpop.xlane.xlu0 %2821  ;;  %v5527_v37 = vsel %vm1858_vm14, %v4450_v34, 0.0  ;;  %vm5900_vm14 = vmmov %vm5893_vm3 }
 0x9c0   : > { %4455 = vpow2.f32 %v2867_v0  ;;  %v2845_v20 = vsub.f32 %v5449_v24, %v2822_v31  ;;  %2909 = vadd.xlane.f32.xlu0 %v5527_v37 }
 0x9c2   : > { %v4452_v50 = vpop.eup %4451  ;;  %v2869_v19 = vmul.f32 1.442695, %v2845_v20 }
 0x9c3   : > { %v2824_v3 = vpop.xlane.xlu0 %2823  ;;  %v5533_v40 = vsel %vm1859_vm0, %v4452_v50, 0.0  ;;  %vm5901_vm0 = vmmov %vm5894_vm7 }
 0x9c4   : > { %4457 = vpow2.f32 %v2869_v19  ;;  %v2846_v17 = vsub.f32 %v5457_v45, %v2824_v3  ;;  %2911 = vadd.xlane.f32.xlu0 %v5533_v40 }
 0x9c6   : > { %v4454_v49 = vpop.eup %4453  ;;  %v2871_v44 = vmul.f32 1.442695, %v2846_v17 }
 0x9c7   : > { %v2826_v30 = vpop.xlane.xlu0 %2825  ;;  %v5539_v24 = vsel %vm1860_vm2, %v4454_v49, 0.0  ;;  %vm5902_vm2 = vmmov %vm5895_vm1  ;;  %vm5903_vm1 = vcmask 130048  }
 0x9c8   : > { %4459 = vpow2.f32 %v2871_v44  ;;  %v2847_v9 = vsub.f32 %v5464_v16, %v2826_v30  ;;  %2913 = vadd.xlane.f32.xlu0 %v5539_v24 }
 0x9ca   : > { %v4456_v55 = vpop.eup %4455  ;;  %v2873_v46 = vmul.f32 1.442695, %v2847_v9 }
 0x9cb   : > { %v2828_v42 = vpop.xlane.xlu0 %2827  ;;  %v5545_v45 = vsel %vm1861_vm6, %v4456_v55, 0.0 }
 0x9cc   : > { %4461 = vpow2.f32 %v2873_v46  ;;  %v2848_v4 = vsub.f32 %v5472_v22, %v2828_v42  ;;  %2915 = vadd.xlane.f32.xlu0 %v5545_v45 }
 0x9ce   : > { %v4458_v12 = vpop.eup %4457  ;;  %v2875_v26 = vmul.f32 1.442695, %v2848_v4 }
 0x9cf   : > { %v2830_v35 = vpop.xlane.xlu0 %2829  ;;  %v5551_v16 = vsel %vm1862_vm9, %v4458_v12, 0.0 }
 0x9d0   : > { %4463 = vpow2.f32 %v2875_v26  ;;  %v2849_v28 = vsub.f32 %v5479_v27, %v2830_v35  ;;  %2917 = vadd.xlane.f32.xlu0 %v5551_v16 }
 0x9d2   : > { %v4460_v7 = vpop.eup %4459  ;;  %v2877_v11 = vmul.f32 1.442695, %v2849_v28 }
 0x9d3   : > { %v2832_v13 = vpop.xlane.xlu0 %2831  ;;  %v5557_v22 = vsel %vm5896_vm5, %v4460_v7, 0.0  ;;  %vm5904_vm5 = vmmov %vm5903_vm1 }
 0x9d4   : > { %4465 = vpow2.f32 %v2877_v11  ;;  %v2850_v48 = vsub.f32 %v5484_v21, %v2832_v13  ;;  %2919 = vadd.xlane.f32.xlu0 %v5557_v22 }
 0x9d6   : > { %v4462_v38 = vpop.eup %4461  ;;  %v2879_v41 = vmul.f32 1.442695, %v2850_v48 }
 0x9d7   : > { %v2834_v25 = vpop.xlane.xlu0 %2833  ;;  %v5563_v27 = vsel %vm5897_vm8, %v4462_v38, 0.0 }
 0x9d8   : > { %4467 = vpow2.f32 %v2879_v41  ;;  %v2851_v15 = vsub.f32 %v5489_v60, %v2834_v25  ;;  %2921 = vadd.xlane.f32.xlu0 %v5563_v27 }
 0x9da   : > { %v4464_v29 = vpop.eup %4463  ;;  %v2881_v34 = vmul.f32 1.442695, %v2851_v15 }
 0x9db   : > { %v2836_v0 = vpop.xlane.xlu0 %2835  ;;  %v5569_v21 = vsel %vm5898_vm10, %v4464_v29, 0.0 }
 0x9dc   : > { %4469 = vpow2.f32 %v2881_v34  ;;  %v2852_v31 = vsub.f32 %v5494_v32, %v2836_v0  ;;  %2923 = vadd.xlane.f32.xlu0 %v5569_v21 }
 0x9de   : > { %v4466_v10 = vpop.eup %4465  ;;  %v2883_v20 = vmul.f32 1.442695, %v2852_v31 }
 0x9df   : > { %v5575_v50 = vsel %vm5899_vm12, %v4466_v10, 0.0 }
 0x9e0   : > { %4471 = vpow2.f32 %v2883_v20  ;;  %2925 = vadd.xlane.f32.xlu0 %v5575_v50 }
 0x9e2   : > { %v4468_v60 = vpop.eup %4467 }
 0x9e3   : > { %v5580_v23 = vsel %vm5900_vm14, %v4468_v60, 0.0 }
 0x9e4   : > { %2927 = vadd.xlane.f32.xlu1 %v5580_v23 }
 0x9e6   : > { %v4470_v19 = vpop.eup %4469 }
 0x9e7   : > { %v5585_v32 = vsel %vm5901_vm0, %v4470_v19, 0.0 }
 0x9e8   : > { %2929 = vadd.xlane.f32.xlu0 %v5585_v32 }
 0x9ea   : > { %v4472_v36 = vpop.eup %4471 }
 0x9eb   : > { %v5590_v3 = vsel %vm5902_vm2, %v4472_v36, 0.0 }
 0x9ec   : > { %2931 = vadd.xlane.f32.xlu1 %v5590_v3 }
 0xa3d   : > { %v2902_v17 = vpop.xlane.xlu0 %2901 }
 0xa3e   : > { %v2933_v39 = vadd.f32 1e-09, %v2902_v17 }
 0xa40   : > { %4473 = vrcp.f32 %v2933_v39 }
 0xa41   : > { %v2904_v49 = vpop.xlane.xlu0 %2903 }
 0xa42   : > { %v2934_v44 = vadd.f32 1e-09, %v2904_v49 }
 0xa44   : > { %4475 = vrcp.f32 %v2934_v44 }
 0xa45   : > { %v2906_v30 = vpop.xlane.xlu1 %2905 }
 0xa46   : > { %v2935_v9 = vadd.f32 1e-09, %v2906_v30 }
 0xa48   : > { %4477 = vrcp.f32 %v2935_v9 }
 0xa49   : > { %v2908_v18 = vpop.xlane.xlu0 %2907 }
 0xa4a   : > { %v2936_v55 = vadd.f32 1e-09, %v2908_v18  ;;  %v4474_v46 = vpop.eup %4473 }
 0xa4b   : > { %v2965_v12 = vmul.f32 %v4474_v46, %v5503_v33 }
 0xa4c   : > { %4479 = vrcp.f32 %v2936_v55 }
 0xa4d   : > { %v2910_v42 = vpop.xlane.xlu0 %2909 }
 0xa4e   : > { %v4476_v4 = vpop.eup %4475  ;;  %v2937_v43 = vadd.f32 1e-09, %v2910_v42 }
 0xa4f   : > { %v2966_v26 = vmul.f32 %v4476_v4, %v5509_v6 }
 0xa50   : > { %4481 = vrcp.f32 %v2937_v43 }
 0xa51   : > { %v2912_v35 = vpop.xlane.xlu0 %2911  ;;  %v2981_v28 = vpack.c.bf16 %v2966_v26, %v2965_v12 }
 0xa52   : > { %v2938_v7 = vadd.f32 1e-09, %v2912_v35  ;;  %v4478_v11 = vpop.eup %4477 }
 0xa53   : > { %4182 = vmatprep.mubr.bf16.mxu0 %v2981_v28  ;;  %v2967_v41 = vmul.f32 %v4478_v11, %v5515_v8 }
 0xa54   : > { %4483 = vrcp.f32 %v2938_v7 }
 0xa55   : > { %v2914_v13 = vpop.xlane.xlu0 %2913 }
 0xa56   : > { %v4480_v48 = vpop.eup %4479  ;;  %v2939_v38 = vadd.f32 1e-09, %v2914_v13 }
 0xa57   : > { %v2968_v25 = vmul.f32 %v4480_v48, %v5521_v47 }
 0xa58   : > { %4485 = vrcp.f32 %v2939_v38 }
 0xa59   : > { %v2916_v15 = vpop.xlane.xlu0 %2915  ;;  %v2982_v29 = vpack.c.bf16 %v2968_v25, %v2967_v41 }
 0xa5a   : > { %v2940_v33 = vadd.f32 1e-09, %v2916_v15  ;;  %v4482_v6 = vpop.eup %4481 }
 0xa5b   : > { %4183 = vmatmul.mubr.bf16.vlgmr.msra.gmra.mrb[88].mxu0 %v2982_v29  ;;  %v2969_v10 = vmul.f32 %v4482_v6, %v5527_v37 }
 0xa5c   : > { %4487 = vrcp.f32 %v2940_v33 }
 0xa5d   : > { %v2918_v34 = vpop.xlane.xlu0 %2917 }
 0xa5e   : > { %v4484_v0 = vpop.eup %4483  ;;  %v2941_v31 = vadd.f32 1e-09, %v2918_v34  ;;  %v4343_v34 = vld [vmem:[%s5827_s3 + $0x70] sm:$0xff]  }
 0xa5f   : > { %v2970_v20 = vmul.f32 %v4484_v0, %v5533_v40  ;;  %4198 = vmatprep.subr.bf16.mxu1 %v4343_v34 }
 0xa60   : > { %4489 = vrcp.f32 %v2941_v31  ;;  %4199 = vmatpush3.bf16.msra.mxu1 %v4343_v34 }
 0xa61   : > { %v2920_v60 = vpop.xlane.xlu0 %2919  ;;  %v2983_v19 = vpack.c.bf16 %v2970_v20, %v2969_v10 }
 0xa62   : > { %v2942_v8 = vadd.f32 1e-09, %v2920_v60  ;;  %v4486_v47 = vpop.eup %4485 }
 0xa63   : > { %4186 = vmatprep.mubr.bf16.mxu0 %v2983_v19  ;;  %v2971_v49 = vmul.f32 %v4486_v47, %v5539_v24 }
 0xa64   : > { %4491 = vrcp.f32 %v2942_v8 }
 0xa65   : > { %v2922_v36 = vpop.xlane.xlu0 %2921 }
 0xa66   : > { %v4488_v17 = vpop.eup %4487  ;;  %v2943_v39 = vadd.f32 1e-09, %v2922_v36 }
 0xa67   : > { %v2972_v44 = vmul.f32 %v4488_v17, %v5545_v45 }
 0xa68   : > { %4493 = vrcp.f32 %v2943_v39 }
 0xa69   : > { %v2924_v30 = vpop.xlane.xlu0 %2923  ;;  %v2984_v9 = vpack.c.bf16 %v2972_v44, %v2971_v49 }
 0xa6a   : > { %v2944_v37 = vadd.f32 1e-09, %v2924_v30  ;;  %v4490_v40 = vpop.eup %4489 }
 0xa6b   : > { %4187 = vmatmul.mubr.bf16.gmra.mrb[92].mxu0 %v2984_v9  ;;  %v2973_v42 = vmul.f32 %v4490_v40, %v5551_v16 }
 0xa6c   : > { %4495 = vrcp.f32 %v2944_v37 }
 0xa6d   : > { %v2926_v18 = vpop.xlane.xlu0 %2925 }
 0xa6e   : > { %v4492_v55 = vpop.eup %4491  ;;  %v2945_v46 = vadd.f32 1e-09, %v2926_v18 }
 0xa6f   : > { %v2974_v4 = vmul.f32 %v4492_v55, %v5557_v22 }
 0xa70   : > { %4497 = vrcp.f32 %v2945_v46 }
 0xa71   : > { %v2928_v43 = vpop.xlane.xlu1 %2927  ;;  %v2985_v12 = vpack.c.bf16 %v2974_v4, %v2973_v42 }
 0xa72   : > { %v2946_v24 = vadd.f32 1e-09, %v2928_v43  ;;  %v4494_v45 = vpop.eup %4493 }
 0xa73   : > { %4190 = vmatprep.mubr.bf16.mxu0 %v2985_v12  ;;  %v2975_v7 = vmul.f32 %v4494_v45, %v5563_v27 }
 0xa74   : > { %4499 = vrcp.f32 %v2946_v24 }
 0xa75   : > { %v2930_v26 = vpop.xlane.xlu0 %2929 }
 0xa76   : > { %v4496_v35 = vpop.eup %4495  ;;  %v2947_v28 = vadd.f32 1e-09, %v2930_v26 }
 0xa77   : > { %v2976_v11 = vmul.f32 %v4496_v35, %v5569_v21 }
 0xa78   : > { %4501 = vrcp.f32 %v2947_v28 }
 0xa79   : > { %v2932_v13 = vpop.xlane.xlu1 %2931  ;;  %v2986_v48 = vpack.c.bf16 %v2976_v11, %v2975_v7 }
 0xa7a   : > { %v2948_v16 = vadd.f32 1e-09, %v2932_v13  ;;  %v4498_v22 = vpop.eup %4497 }
 0xa7b   : > { %4191 = vmatmul.mubr.bf16.gmra.mrb[96].mxu0 %v2986_v48  ;;  %v2977_v41 = vmul.f32 %v4498_v22, %v5575_v50  ;;  %v5615_v50 = vld [vmem:[%s5827_s3 + $0x68] sm:$0xff]  }
 0xa7c   : > { %4503 = vrcp.f32 %v2948_v16  ;;  %4216 = vmatprep.subr.bf16.mxu1 %v5615_v50 }
 0xa7e   : > { %v4500_v38 = vpop.eup %4499 }
 0xa7f   : > { %v2978_v25 = vmul.f32 %v4500_v38, %v5580_v23  ;;  %v1298_v23 = vsub.s32 5, %v4732_v14 }
 0xa81   : > { %v2987_v15 = vpack.c.bf16 %v2978_v25, %v2977_v41 }
 0xa82   : > { %v4502_v29 = vpop.eup %4501 }
 0xa83   : > { %4194 = vmatprep.mubr.bf16.mxu0 %v2987_v15  ;;  %v2979_v27 = vmul.f32 %v4502_v29, %v5585_v32  ;;  %v5622_v32 = vld [vmem:[%s5828_s4] sm:$0xff] }
 0xa86   : > { %v4504_v33 = vpop.eup %4503 }
 0xa87   : > { %v2980_v21 = vmul.f32 %v4504_v33, %v5590_v3  ;;  %v5625_v3 = vrot.slane %v5622_v32, %v1298_v23 }
 0xa89   : > { %v2988_v6 = vpack.c.bf16 %v2980_v21, %v2979_v27  ;;  %v1379_v0 = vadd.f32 %v5004_v51, %v5625_v3  ;;  %v1371_v31 = vadd.f32 %v5006_v52, %v5625_v3  ;;  %v1382_v10 = vadd.f32 %v5008_v53, %v5625_v3 }
 0xa8a   : > { %v1374_v20 = vadd.f32 %v5010_v54, %v5625_v3  ;;  %v1395_v54 = vadd.f32 %v5012_v56, %v5625_v3  ;;  %v1387_v18 = vadd.f32 %v5014_v57, %v5625_v3  ;;  %v1398_v55 = vadd.f32 %v5016_v58, %v5625_v3 }
 0xa8b   : > { %4195 = vmatmul.mubr.bf16.gmra.mrb[100].mxu0 %v2988_v6  ;;  %v1435_v19 = vmax.f32 %v1379_v0, 0.0  ;;  %v1433_v36 = vmax.f32 %v1371_v31, 0.0  ;;  %v1436_v51 = vmax.f32 %v1382_v10, 0.0  ;;  %v1390_v46 = vadd.f32 %v5018_v59, %v5625_v3 }
 0xa8c   : > { %v1434_v9 = vmax.f32 %v1374_v20, 0.0  ;;  %v1439_v42 = vmax.f32 %v1395_v54, 0.0  ;;  %v1437_v4 = vmax.f32 %v1387_v18, 0.0  ;;  %v1440_v43 = vmax.f32 %v1398_v55, 0.0 }
 0xa8d   : > { %v1438_v12 = vmax.f32 %v1390_v46, 0.0 }
 0xb2e   : > { %v4184_v60 = vpop.f32.mrb[88].mxu0 }
 0xb2f   : > { %v3088_v8 = vmax.f32 %v4184_v60, 0.0  ;;  %v3023_v47 = vpop.f32.mrb[89].mxu0 }
 0xb30   : > { %v3086_v17 = vmax.f32 %v3023_v47, 0.0  ;;  %v4185_v39 = vpop.f32.mrb[90].mxu0 }
 0xb31   : > { %v3104_v49 = vmul.f32 %v3088_v8, %v1435_v19  ;;  %v3089_v44 = vmax.f32 %v4185_v39, 0.0  ;;  %v3026_v30 = vpop.f32.mrb[91].mxu0  ;;  %v1414_v39 = vadd.f32 %v5024_v63, %v5625_v3 }
 0xb32   : > { %v3102_v37 = vmul.f32 %v3086_v17, %v1433_v36  ;;  %v3087_v52 = vmax.f32 %v3026_v30, 0.0  ;;  %v1411_v36 = vadd.f32 %v5020_v61, %v5625_v3  ;;  %v1403_v17 = vadd.f32 %v5022_v62, %v5625_v3 }
 0xb33   : > { %4505 = vrsqrt.f32 %v3104_v49  ;;  %v3105_v53 = vmul.f32 %v3089_v44, %v1436_v51  ;;  %vm3134_vm6 = vcmp.eq.f32.partialorder %v3104_v49, inf  ;;  %vm3136_vm9 = vcmp.eq.f32.partialorder %v3104_v49, 0.0 }
 0xb34   : > { %4507 = vrsqrt.f32 %v3102_v37  ;;  %v3103_v40 = vmul.f32 %v3087_v52, %v1434_v9  ;;  %v3137_v45 = vand.u32 2147483648, %v3104_v49  ;;  %vm3120_vm15 = vcmp.eq.f32.partialorder %v3102_v37, inf }
 0xb35   : > { %4509 = vrsqrt.f32 %v3105_v53  ;;  %vm3141_vm13 = vcmp.eq.f32.partialorder %v3105_v53, inf  ;;  %vm3122_vm4 = vcmp.eq.f32.partialorder %v3102_v37, 0.0  ;;  %v3123_v57 = vand.u32 2147483648, %v3102_v37 }
 0xb36   : > { %4511 = vrsqrt.f32 %v3103_v40  ;;  %vm3143_vm3 = vcmp.eq.f32.partialorder %v3105_v53, 0.0  ;;  %v3144_v58 = vand.u32 2147483648, %v3105_v53  ;;  %vm3127_vm11 = vcmp.eq.f32.partialorder %v3103_v40, inf }
 0xb37   : > { %vm3129_vm7 = vcmp.eq.f32.partialorder %v3103_v40, 0.0  ;;  %v3130_v29 = vand.u32 2147483648, %v3103_v40  ;;  %v1443_v44 = vmax.f32 %v1411_v36, 0.0  ;;  %v1441_v30 = vmax.f32 %v1403_v17, 0.0 }
 0xb38   : > { %v1444_v51 = vmax.f32 %v1414_v39, 0.0 }
 0xb3d   : > { %v4506_v24 = vpop.eup %4505 }
 0xb3e   : > { %v4508_v26 = vpop.eup %4507  ;;  %v3133_v56 = vmul.f32 %v4506_v24, %v3104_v49  ;;  %v4188_v35 = vpop.f32.mrb[92].mxu0 }
 0xb3f   : > { %v3092_v28 = vmax.f32 %v4188_v35, 0.0  ;;  %v3039_v7 = vpop.f32.mrb[93].mxu0  ;;  %v3119_v59 = vmul.f32 %v4508_v26, %v3102_v37  ;;  %v4510_v11 = vpop.eup %4509 }
 0xb40   : > { %v3135_v13 = vsel %vm3134_vm6, %v3104_v49, %v3133_v56  ;;  %v3090_v48 = vmax.f32 %v3039_v7, 0.0  ;;  %v4189_v16 = vpop.f32.mrb[94].mxu0  ;;  %v4512_v22 = vpop.eup %4511  ;;  %v3140_v38 = vmul.f32 %v4510_v11, %v3105_v53  ;;  %v1406_v49 = vadd.f32 %v5026_v1, %v5625_v3 }
 0xb41   : > { %v5644_v41 = vmul.f32 %v3092_v28, %v1439_v42  ;;  %v3093_v25 = vmax.f32 %v4189_v16, 0.0  ;;  %v3042_v15 = vpop.f32.mrb[95].mxu0  ;;  %v3121_v21 = vsel %vm3120_vm15, %v3102_v37, %v3119_v59  ;;  %v3126_v6 = vmul.f32 %v4512_v22, %v3103_v40  ;;  %vm5905_vm15 = vmmov %vm5903_vm1 }
 0xb42   : > { %v5646_v33 = vmul.f32 %v3090_v48, %v1437_v4  ;;  %v3091_v27 = vmax.f32 %v3042_v15, 0.0  ;;  %v3142_v34 = vsel %vm3141_vm13, %v3105_v53, %v3140_v38  ;;  %v3138_v0 = vsel %vm3136_vm9, %v3137_v45, %v3135_v13  ;;  %vm5908_vm13 = vmmov %vm5903_vm1 }
 0xb43   : > { %4513 = vrsqrt.f32 %v5644_v41  ;;  %v5651_v23 = vmul.f32 %v3093_v25, %v1440_v43  ;;  %v3128_v10 = vsel %vm3127_vm11, %v3103_v40, %v3126_v6  ;;  %v3145_v20 = vsel %vm3143_vm3, %v3144_v58, %v3142_v34 }
 0xb44   : > { %4515 = vrsqrt.f32 %v5646_v33  ;;  %v3107_v31 = vmul.f32 %v3091_v27, %v1438_v12  ;;  %v3124_v60 = vsel %vm3122_vm4, %v3123_v57, %v3121_v21  ;;  %v3131_v19 = vsel %vm3129_vm7, %v3130_v29, %v3128_v10  ;;  %v5906_v29 = vld [vmem:[#allocation24_spill] sm:$0xff]  ;;  %v5907_v27 = vld [vmem:[#allocation25_spill] sm:$0xff] }
 0xb45   : > { %4517 = vrsqrt.f32 %v5651_v23  ;;  %v3243_v8 = vpack.c.bf16 %v3145_v20, %v3138_v0  ;;  %v3242_v47 = vpack.c.bf16 %v3131_v19, %v3124_v60  ;;  %v1442_v9 = vmax.f32 %v1406_v49, 0.0 }
 0xb46   : > { %4519 = vrsqrt.f32 %v3107_v31  ;;  %vm3148_vm8 = vcmp.eq.f32.partialorder %v5646_v33, inf  ;;  %vm3150_vm10 = vcmp.eq.f32.partialorder %v5646_v33, 0.0  ;;  %v3151_v62 = vand.u32 2147483648, %v5646_v33 }
 0xb47   : > { %4200 = vmatprep.mubr.msk.bf16.mxu1 %vm5903_vm1, %v3242_v47  ;;  %vm3155_vm12 = vcmp.eq.f32.partialorder %v3107_v31, inf  ;;  %vm3157_vm14 = vcmp.eq.f32.partialorder %v3107_v31, 0.0  ;;  %v3158_v63 = vand.u32 2147483648, %v3107_v31  ;;  %vm3162_vm0 = vcmp.eq.f32.partialorder %v5644_v41, inf }
 0xb48   : > { %4201 = vmatmul.mubr.msk.bf16.vlgmr.msra.gmra.mrb[72].mxu1 %vm5904_vm5, %v3243_v8  ;;  %vm3164_vm2 = vcmp.eq.f32.partialorder %v5644_v41, 0.0  ;;  %vm3169_vm6 = vcmp.eq.f32.partialorder %v5651_v23, inf  ;;  %vm3171_vm9 = vcmp.eq.f32.partialorder %v5651_v23, 0.0  ;;  %v3172_v12 = vand.u32 2147483648, %v5651_v23 }
 0xb49   : > { %4217 = vmatpush3.bf16.msra.mxu1 %v5615_v50  ;;  %v3165_v50 = vand.u32 2147483648, %v5644_v41  ;;  %v1427_v25 = vadd.f32 %v5028_v2, %v5625_v3  ;;  %v1419_v15 = vadd.f32 %v5030_v5, %v5625_v3  ;;  %v1422_v21 = vadd.f32 %v5907_v27, %v5625_v3  ;;  %v5913_v27 = vld [vmem:[#allocation11_spill] sm:$0xff] }
 0xb4b   : > { %v1447_v6 = vmax.f32 %v1427_v25, 0.0  ;;  %v1445_v34 = vmax.f32 %v1419_v15, 0.0  ;;  %v1446_v0 = vmax.f32 %v1422_v21, 0.0  ;;  %v5914_v21 = vld [vmem:[#allocation10_spill] sm:$0xff] }
 0xb4d   : > { %v4514_v61 = vpop.eup %4513 }
 0xb4e   : > { %v4516_v1 = vpop.eup %4515  ;;  %v4192_v37 = vpop.f32.mrb[96].mxu0  ;;  %v3161_v52 = vmul.f32 %v4514_v61, %v5644_v41 }
 0xb4f   : > { %v4518_v53 = vpop.eup %4517  ;;  %v3096_v40 = vmax.f32 %v4192_v37, 0.0  ;;  %v3055_v54 = vpop.f32.mrb[97].mxu0  ;;  %v3147_v18 = vmul.f32 %v4516_v1, %v5646_v33 }
 0xb50   : > { %v4520_v55 = vpop.eup %4519  ;;  %v3094_v46 = vmax.f32 %v3055_v54, 0.0  ;;  %v4193_v42 = vpop.f32.mrb[98].mxu0  ;;  %v3163_v4 = vsel %vm3162_vm0, %v5644_v41, %v3161_v52  ;;  %v3168_v43 = vmul.f32 %v4518_v53, %v5651_v23 }
 0xb51   : > { %v5684_v24 = vmul.f32 %v3096_v40, %v1443_v44  ;;  %v3097_v45 = vmax.f32 %v4193_v42, 0.0  ;;  %v3058_v26 = vpop.f32.mrb[99].mxu0  ;;  %v3149_v56 = vsel %vm3148_vm8, %v5646_v33, %v3147_v18  ;;  %v3154_v35 = vmul.f32 %v4520_v55, %v3107_v31 }
 0xb52   : > { %v3110_v57 = vmul.f32 %v3094_v46, %v1441_v30  ;;  %v3095_v58 = vmax.f32 %v3058_v26, 0.0  ;;  %v3152_v28 = vsel %vm3150_vm10, %v3151_v62, %v3149_v56  ;;  %v3166_v7 = vsel %vm3164_vm2, %v3165_v50, %v3163_v4 }
 0xb53   : > { %4521 = vrsqrt.f32 %v5684_v24  ;;  %v5694_v59 = vmul.f32 %v3097_v45, %v1444_v51  ;;  %v3156_v11 = vsel %vm3155_vm12, %v3107_v31, %v3154_v35  ;;  %v3170_v13 = vsel %vm3169_vm6, %v5651_v23, %v3168_v43  ;;  %vm5909_vm12 = vmmov %vm5908_vm13 }
 0xb54   : > { %4523 = vrsqrt.f32 %v3110_v57  ;;  %v3111_v48 = vmul.f32 %v3095_v58, %v1442_v9  ;;  %v3159_v16 = vsel %vm3157_vm14, %v3158_v63, %v3156_v11  ;;  %v3173_v22 = vsel %vm3171_vm9, %v3172_v12, %v3170_v13  ;;  %vm5910_vm14 = vmmov %vm5909_vm12 }
 0xb55   : > { %4525 = vrsqrt.f32 %v5694_v59  ;;  %v3244_v38 = vpack.c.bf16 %v3159_v16, %v3152_v28  ;;  %v3245_v41 = vpack.c.bf16 %v3173_v22, %v3166_v7  ;;  %v1430_v33 = vadd.f32 %v5906_v29, %v5625_v3 }
 0xb56   : > { %4527 = vrsqrt.f32 %v3111_v48  ;;  %vm3176_vm4 = vcmp.eq.f32.partialorder %v3110_v57, inf  ;;  %vm3178_vm3 = vcmp.eq.f32.partialorder %v3110_v57, 0.0  ;;  %v3179_v31 = vand.u32 2147483648, %v3110_v57 }
 0xb57   : > { %4204 = vmatprep.mubr.msk.bf16.mxu1 %vm5905_vm15, %v3244_v38  ;;  %v1448_v23 = vmax.f32 %v1430_v33, 0.0  ;;  %vm3183_vm11 = vcmp.eq.f32.partialorder %v3111_v48, inf  ;;  %vm3185_vm7 = vcmp.eq.f32.partialorder %v3111_v48, 0.0  ;;  %v3186_v5 = vand.u32 2147483648, %v3111_v48 }
 0xb58   : > { %4205 = vmatmul.mubr.msk.bf16.gmra.mrb[76].mxu1 %vm5908_vm13, %v3245_v41  ;;  %vm3190_vm1 = vcmp.eq.f32.partialorder %v5684_v24, inf  ;;  %vm3192_vm5 = vcmp.eq.f32.partialorder %v5684_v24, 0.0  ;;  %v3193_v3 = vand.u32 2147483648, %v5684_v24  ;;  %vm3197_vm8 = vcmp.eq.f32.partialorder %v5694_v59, inf }
 0xb59   : > { %vm3199_vm10 = vcmp.eq.f32.partialorder %v5694_v59, 0.0  ;;  %v3200_v51 = vand.u32 2147483648, %v5694_v59 }
 0xb5d   : > { %v4522_v2 = vpop.eup %4521 }
 0xb5e   : > { %v4524_v10 = vpop.eup %4523  ;;  %v4196_v20 = vpop.f32.mrb[100].mxu0  ;;  %v3189_v60 = vmul.f32 %v4522_v2, %v5684_v24  ;;  %v5921_v2 = vld [vmem:[#allocation15_spill] sm:$0xff] }
 0xb5f   : > { %v4526_v19 = vpop.eup %4525  ;;  %v3100_v8 = vmax.f32 %v4196_v20, 0.0  ;;  %v3071_v47 = vpop.f32.mrb[101].mxu0  ;;  %v3175_v36 = vmul.f32 %v4524_v10, %v3110_v57  ;;  %v5925_v10 = vld [vmem:[#allocation13_spill] sm:$0xff]  ;;  %v5926_v20 = vld [vmem:[#allocation12_spill] sm:$0xff] }
 0xb60   : > { %v4528_v17 = vpop.eup %4527  ;;  %v3098_v39 = vmax.f32 %v3071_v47, 0.0  ;;  %v4197_v49 = vpop.f32.mrb[102].mxu0  ;;  %v3191_v44 = vsel %vm3190_vm1, %v5684_v24, %v3189_v60  ;;  %v3196_v30 = vmul.f32 %v4526_v19, %v5694_v59  ;;  %v5927_v60 = vpack.c.bf16 %v5925_v10, %v5926_v20  ;;  %v5930_v19 = vld [vmem:[#allocation18_spill] sm:$0xff]  ;;  %v5933_v47 = vld [vmem:[#allocation17_spill] sm:$0xff] }
 0xb61   : > { %v3116_v9 = vmul.f32 %v3100_v8, %v1447_v6  ;;  %v3101_v61 = vmax.f32 %v4197_v49, 0.0  ;;  %v3074_v62 = vpop.f32.mrb[103].mxu0  ;;  %v3177_v63 = vsel %vm3176_vm4, %v3110_v57, %v3175_v36  ;;  %v3182_v1 = vmul.f32 %v4528_v17, %v3111_v48  ;;  %v5934_v36 = vld [vmem:[#allocation16_spill] sm:$0xff]  ;;  %v5938_v49 = vld [vmem:[#allocation22_spill] sm:$0xff] }
 0xb62   : > { %v3114_v37 = vmul.f32 %v3098_v39, %v1445_v34  ;;  %v3099_v52 = vmax.f32 %v3074_v62, 0.0  ;;  %v3180_v50 = vsel %vm3178_vm3, %v3179_v31, %v3177_v63  ;;  %v3194_v53 = vsel %vm3192_vm5, %v3193_v3, %v3191_v44  ;;  %v5917_v34 = vld [vmem:[#allocation9_spill] sm:$0xff]  ;;  %v5922_v31 = vld [vmem:[#allocation14_spill] sm:$0xff]  ;;  %v5929_v3 = vld [vmem:[#allocation19_spill] sm:$0xff] }
 0xb63   : > { %4529 = vrsqrt.f32 %v3116_v9  ;;  %v3117_v40 = vmul.f32 %v3101_v61, %v1448_v23  ;;  %v3184_v54 = vsel %vm3183_vm11, %v3111_v48, %v3182_v1  ;;  %v3198_v18 = vsel %vm3197_vm8, %v5694_v59, %v3196_v30  ;;  %vm5911_vm11 = vmmov %vm5909_vm12  ;;  %v5918_v23 = vld [vmem:[#allocation8_spill] sm:$0xff]  ;;  %v5937_v39 = vld [vmem:[#allocation23_spill] sm:$0xff] }
 0xb64   : > { %4531 = vrsqrt.f32 %v3114_v37  ;;  %v3115_v55 = vmul.f32 %v3099_v52, %v1446_v0  ;;  %v3187_v46 = vsel %vm3185_vm7, %v3186_v5, %v3184_v54  ;;  %v3201_v42 = vsel %vm3199_vm10, %v3200_v51, %v3198_v18  ;;  %vm5912_vm7 = vmmov %vm5911_vm11  ;;  %v5941_v30 = vld [vmem:[#allocation21_spill] sm:$0xff]  ;;  %v5942_v51 = vld [vmem:[#allocation20_spill] sm:$0xff] }
 0xb65   : > { %4533 = vrsqrt.f32 %v3117_v40  ;;  %v3246_v4 = vpack.c.bf16 %v3187_v46, %v3180_v50  ;;  %v3247_v43 = vpack.c.bf16 %v3201_v42, %v3194_v53  ;;  %vm3204_vm0 = vcmp.eq.f32.partialorder %v3114_v37, inf  ;;  %vm5916_vm1 = vmmov %vm5912_vm7 }
 0xb66   : > { %4535 = vrsqrt.f32 %v3115_v55  ;;  %vm3206_vm2 = vcmp.eq.f32.partialorder %v3114_v37, 0.0  ;;  %v3207_v35 = vand.u32 2147483648, %v3114_v37  ;;  %vm3218_vm6 = vcmp.eq.f32.partialorder %v3116_v9, inf  ;;  %vm5920_vm5 = vmmov %vm5916_vm1 }
 0xb67   : > { %4208 = vmatprep.mubr.msk.bf16.mxu1 %vm5909_vm12, %v3246_v4  ;;  %vm3211_vm9 = vcmp.eq.f32.partialorder %v3115_v55, inf  ;;  %v3221_v28 = vand.u32 2147483648, %v3116_v9  ;;  %vm3225_vm15 = vcmp.eq.f32.partialorder %v3117_v40, inf  ;;  %v3228_v13 = vand.u32 2147483648, %v3117_v40  ;;  %vm5924_vm8 = vmmov %vm5916_vm1 }
 0xb68   : > { %4209 = vmatmul.mubr.msk.bf16.gmra.mrb[80].mxu1 %vm5910_vm14, %v3247_v43  ;;  %v3214_v48 = vand.u32 2147483648, %v3115_v55  ;;  %vm3220_vm13 = vcmp.eq.f32.partialorder %v3116_v9, 0.0  ;;  %vm3227_vm4 = vcmp.eq.f32.partialorder %v3117_v40, 0.0  ;;  %vm3213_vm3 = vcmp.eq.f32.partialorder %v3115_v55, 0.0  ;;  %vm5928_vm10 = vmmov %vm5916_vm1 }
 0xb69   : > { %v5915_v6 = vpack.c.bf16 %v5913_v27, %v5914_v21  ;;  %v5919_v0 = vpack.c.bf16 %v5917_v34, %v5918_v23  ;;  %v5923_v5 = vpack.c.bf16 %v5921_v2, %v5922_v31  ;;  %v5931_v8 = vpack.c.bf16 %v5929_v3, %v5930_v19  ;;  %vm5932_vm12 = vmmov %vm5916_vm1 }
 0xb6a   : > { %v5935_v17 = vpack.c.bf16 %v5933_v47, %v5934_v36  ;;  %vm5936_vm14 = vmmov %vm5916_vm1  ;;  %v5939_v44 = vpack.c.bf16 %v5937_v39, %v5938_v49  ;;  %v3506_v61 = vsub.s32 6, %v4732_v14 }
 0xb6c   : > { %v3507_v62 = vrot.slane %v5622_v32, %v3506_v61 }
 0xb6d   : > { %v4530_v12 = vpop.eup %4529 }
 0xb6e   : > { %v4532_v24 = vpop.eup %4531  ;;  %v3217_v45 = vmul.f32 %v4530_v12, %v3116_v9 }
 0xb6f   : > { %v4534_v26 = vpop.eup %4533  ;;  %v3203_v56 = vmul.f32 %v4532_v24, %v3114_v37 }
 0xb70   : > { %v4536_v57 = vpop.eup %4535  ;;  %v3219_v58 = vsel %vm3218_vm6, %v3116_v9, %v3217_v45  ;;  %v3224_v7 = vmul.f32 %v4534_v26, %v3117_v40  ;;  %v5943_v9 = vpack.c.bf16 %v5941_v30, %v5942_v51  ;;  %vm3524_vm6 = vcmask 31744  }
 0xb71   : > { %v3205_v59 = vsel %vm3204_vm0, %v3114_v37, %v3203_v56  ;;  %v3210_v11 = vmul.f32 %v4536_v57, %v3115_v55  ;;  %v3222_v38 = vsel %vm3220_vm13, %v3221_v28, %v3219_v58  ;;  %vm5940_vm0 = vmmov %vm5916_vm1 }
 0xb72   : > { %v3226_v16 = vsel %vm3225_vm15, %v3117_v40, %v3224_v7  ;;  %v3208_v25 = vsel %vm3206_vm2, %v3207_v35, %v3205_v59  ;;  %vm5944_vm2 = vmmov %vm5940_vm0 }
 0xb73   : > { %v3212_v22 = vsel %vm3211_vm9, %v3115_v55, %v3210_v11  ;;  %v3229_v41 = vsel %vm3227_vm4, %v3228_v13, %v3226_v16 }
 0xb74   : > { %v3215_v15 = vsel %vm3213_vm3, %v3214_v48, %v3212_v22  ;;  %v3249_v29 = vpack.c.bf16 %v3229_v41, %v3222_v38 }
 0xb75   : > { %v3248_v33 = vpack.c.bf16 %v3215_v15, %v3208_v25 }
 0xb77   : > { %4212 = vmatprep.mubr.msk.bf16.mxu1 %vm5911_vm11, %v3248_v33 }
 0xb78   : > { %4213 = vmatmul.mubr.msk.bf16.gmra.mrb[84].mxu1 %vm5912_vm7, %v3249_v29 }
 0xb79   : > { %4218 = vmatprep.mubr.msk.bf16.mxu1 %vm5916_vm1, %v5915_v6 }
 0xb80   : > { %4219 = vmatmul.mubr.msk.bf16.vlgmr.msra.gmra.mrb[72].mxu1 %vm5920_vm5, %v5919_v0 }
 0xb81   : > { %4222 = vmatprep.mubr.msk.bf16.mxu1 %vm5924_vm8, %v5923_v5 }
 0xb88   : > { %4223 = vmatmul.mubr.msk.bf16.gmra.mrb[76].mxu1 %vm5928_vm10, %v5927_v60 }
 0xb89   : > { %4226 = vmatprep.mubr.msk.bf16.mxu1 %vm5932_vm12, %v5931_v8 }
 0xb90   : > { %4227 = vmatmul.mubr.msk.bf16.gmra.mrb[80].mxu1 %vm5936_vm14, %v5935_v17 }
 0xb91   : > { %4230 = vmatprep.mubr.msk.bf16.mxu1 %vm5940_vm0, %v5939_v44 }
 0xb98   : > { %4231 = vmatmul.mubr.msk.bf16.gmra.mrb[84].mxu1 %vm5944_vm2, %v5943_v9 }
 0xc53   : > { %v4220_v63 = vpop.f32.mrb[72].mxu1 }
 0xc54   : > { %v3510_v1 = vadd.f32 %v4220_v63, %v3507_v62  ;;  %v3441_v37 = vpop.f32.mrb[73].mxu1 }
 0xc55   : > { %v3508_v52 = vadd.f32 %v3507_v62, %v3441_v37  ;;  %v4221_v50 = vpop.f32.mrb[74].mxu1 }
 0xc56   : > { %3527 = vst.msk [vmem:[%s5777_s25 + $0x10] sm:$0xff] %vm3524_vm6, %v3510_v1  ;;  %v3511_v14 = vadd.f32 %v4221_v50, %v3507_v62  ;;  %v3444_v32 = vpop.f32.mrb[75].mxu1 }
 0xc57   : > { %3525 = vst.msk [vmem:[%s5777_s25] sm:$0xff] %vm3524_vm6, %v3508_v52  ;;  %v3509_v53 = vadd.f32 %v3507_v62, %v3444_v32 }
 0xc58   : > { %3528 = vst.msk [vmem:[%s5777_s25 + $0x18] sm:$0xff] %vm3524_vm6, %v3511_v14 }
 0xc59   : > { %3526 = vst.msk [vmem:[%s5777_s25 + $0x8] sm:$0xff] %vm3524_vm6, %v3509_v53 }
 0xc5b   : > { %v4224_v40 = vpop.f32.mrb[76].mxu1 }
 0xc5c   : > { %v3514_v54 = vadd.f32 %v4224_v40, %v3507_v62  ;;  %v3457_v18 = vpop.f32.mrb[77].mxu1 }
 0xc5d   : > { %v3512_v55 = vadd.f32 %v3507_v62, %v3457_v18  ;;  %v4225_v46 = vpop.f32.mrb[78].mxu1 }
 0xc5e   : > { %3531 = vst.msk [vmem:[%s5777_s25 + $0x30] sm:$0xff] %vm3524_vm6, %v3514_v54  ;;  %v3515_v42 = vadd.f32 %v4225_v46, %v3507_v62  ;;  %v3460_v4 = vpop.f32.mrb[79].mxu1 }
 0xc5f   : > { %3529 = vst.msk [vmem:[%s5777_s25 + $0x20] sm:$0xff] %vm3524_vm6, %v3512_v55  ;;  %v3513_v43 = vadd.f32 %v3507_v62, %v3460_v4 }
 0xc60   : > { %3532 = vst.msk [vmem:[%s5777_s25 + $0x38] sm:$0xff] %vm3524_vm6, %v3515_v42 }
 0xc61   : > { %3530 = vst.msk [vmem:[%s5777_s25 + $0x28] sm:$0xff] %vm3524_vm6, %v3513_v43 }
 0xc63   : > { %v4228_v12 = vpop.f32.mrb[80].mxu1 }
 0xc64   : > { %v3518_v24 = vadd.f32 %v4228_v12, %v3507_v62  ;;  %v3473_v45 = vpop.f32.mrb[81].mxu1 }
 0xc65   : > { %v3516_v26 = vadd.f32 %v3507_v62, %v3473_v45  ;;  %v4229_v56 = vpop.f32.mrb[82].mxu1 }
 0xc66   : > { %3535 = vst.msk [vmem:[%s5777_s25 + $0x50] sm:$0xff] %vm3524_vm6, %v3518_v24  ;;  %v3519_v35 = vadd.f32 %v4229_v56, %v3507_v62  ;;  %v3476_v57 = vpop.f32.mrb[83].mxu1 }
 0xc67   : > { %3533 = vst.msk [vmem:[%s5777_s25 + $0x40] sm:$0xff] %vm3524_vm6, %v3516_v26  ;;  %v3517_v58 = vadd.f32 %v3507_v62, %v3476_v57 }
 0xc68   : > { %3536 = vst.msk [vmem:[%s5777_s25 + $0x58] sm:$0xff] %vm3524_vm6, %v3519_v35 }
 0xc69   : > { %3534 = vst.msk [vmem:[%s5777_s25 + $0x48] sm:$0xff] %vm3524_vm6, %v3517_v58 }
 0xc6b   : > { %v4232_v28 = vpop.f32.mrb[84].mxu1 }
 0xc6c   : > { %v3522_v7 = vadd.f32 %v4232_v28, %v3507_v62  ;;  %v3489_v59 = vpop.f32.mrb[85].mxu1 }
 0xc6d   : > { %v3520_v11 = vadd.f32 %v3507_v62, %v3489_v59  ;;  %v4233_v13 = vpop.f32.mrb[86].mxu1 }
 0xc6e   : > { %3539 = vst.msk [vmem:[%s5777_s25 + $0x70] sm:$0xff] %vm3524_vm6, %v3522_v7  ;;  %v3523_v48 = vadd.f32 %v4233_v13, %v3507_v62  ;;  %v3492_v16 = vpop.f32.mrb[87].mxu1 }
 0xc6f   : > { %3537 = vst.msk [vmem:[%s5777_s25 + $0x60] sm:$0xff] %vm3524_vm6, %v3520_v11  ;;  %v3521_v22 = vadd.f32 %v3507_v62, %v3492_v16 }
 0xc70   : > { %3540 = vst.msk [vmem:[%s5777_s25 + $0x78] sm:$0xff] %vm3524_vm6, %v3523_v48 }
 0xc71   : > { %3538 = vst.msk [vmem:[%s5777_s25 + $0x68] sm:$0xff] %vm3524_vm6, %v3521_v22 }
 0xc72 PF: > { %p15_p12 = scmp.ge.s32.totalorder %s4633_s23, 4   ;;  %s5945_s18 = smov %s4564_s19 }
 0xc73   : > { %s5946_s19 = smov %s4568_s20  ;;  %s5947_s20 = smov %s4643_s26 }
 0xc74   : > { %s5948_s21 = smov %s4633_s23  ;;  %17 = sbr.rel (!%p15_p12) target bundleno = 3 (0x3), region = 93 }
 0xc7b   :  { %3563 = vsyncpa [#allocation3], 1 }
 0xc7c   :  { %3565 = vsyncpa [#allocation3 + $0x1], 1 }

</bundles_post_ra>
